<compile_context>
chip_gen: v6e
topology: v6e:2x2x1
jax: 0.10.0
libtpu: 0.0.40
codegen_flags: <defaults>
</compile_context>

<pallas_src>
import jax
import jax.numpy as jnp
from jax import lax
from jax.experimental import pallas as pl
from jax.experimental.pallas import tpu as pltpu


def _merge_c2f_kernel(x1p_ref, x2_ref, x3_ref, wd_ref, bd_ref, wu_ref, bu_ref,
                      wc_ref, bc_ref, out_ref, merged_ref):
    """Fused conv_down + conv_up + concat + 3x3 conv for one batch element.

    x1p_ref : (1, H*W, 4*Cd)    bf16  space-to-depth patches of x1 (2x2/s2 taps)
    x2_ref  : (1, H, W, Cout)   bf16
    x3_ref  : (1, Hh*W, Cu)     bf16  x3 with every column duplicated (W-upsampled)
    wd_ref  : (4*Cd, Cout)      bf16  conv_down weight, rows ordered (dy, dx, ci)
    bd_ref  : (1, Cout)         f32
    wu_ref  : (4, Cu, Cout)     bf16  conv_up weight, tap t = dy*2 + dx
    bu_ref  : (1, Cout)         f32
    wc_ref  : (9, 3*Cout, Cout) bf16  3x3 conv weight, tap t = ky*3 + kx
    bc_ref  : (1, Cout)         f32
    out_ref : (1, H, W, Cout)   f32
    merged_ref : VMEM scratch (H+2, W+2, 3*Cout) bf16 -- concat buffer + 3x3 halo
    """
    _, H, W, Cout = x2_ref.shape
    Hh = H // 2
    Cm = 3 * Cout
    f32, bf16 = jnp.float32, jnp.bfloat16

    # ---- zero ONLY the 1-pixel halo ring (interior is fully overwritten) -----
    # (done every grid step on purpose: with megacore "parallel" each core owns
    #  its own scratch, so a program_id==0 gate would be wrong)
    zrow = jnp.zeros((1, W + 2, Cm), bf16)
    merged_ref[0:1, :, :] = zrow
    merged_ref[H + 1:H + 2, :, :] = zrow
    zcol = jnp.zeros((H, 1, Cm), bf16)
    merged_ref[1:H + 1, 0:1, :] = zcol
    merged_ref[1:H + 1, W + 1:W + 2, :] = zcol

    # ---- conv_down(x1): one MXU matmul over K = 4*Cd -------------------------
    y1 = jnp.dot(x1p_ref[0], wd_ref[...], preferred_element_type=f32) + bd_ref[...]
    merged_ref[1:H + 1, 1:W + 1, 0:Cout] = y1.reshape(H, W, Cout).astype(bf16)

    # ---- x2 passthrough (middle block of the channel concat, no cast) --------
    merged_ref[1:H + 1, 1:W + 1, Cout:2 * Cout] = x2_ref[0]

    # ---- conv_up(x3): ConvTranspose2d(k=2, s=2), no tap overlap --------------
    # x3_ref is width-duplicated, so output column w uses tap dx = w % 2 of the
    # same input row (column-parity select); the row interleave is a stack along
    # a new axis + outer-dim-only reshape followed by ONE store.
    x3f = x3_ref[0]                                              # (Hh*W, Cu) bf16
    col = lax.broadcasted_iota(jnp.int32, (Hh, W, 1), 1)
    col_even = (col % 2) == 0
    rows = []
    for dy in range(2):
        y_even = jnp.dot(x3f, wu_ref[2 * dy + 0],
                         preferred_element_type=f32).reshape(Hh, W, Cout)
        y_odd = jnp.dot(x3f, wu_ref[2 * dy + 1],
                        preferred_element_type=f32).reshape(Hh, W, Cout)
        rows.append(jnp.where(col_even, y_even, y_odd))
    # (Hh, 2, W, Cout) -> (H, W, Cout): merges the two leading dims only.
    yup = jnp.stack(rows, axis=1).reshape(H, W, Cout) + bu_ref[...]
    merged_ref[1:H + 1, 1:W + 1, 2 * Cout:3 * Cout] = yup.astype(bf16)

    # ---- 3x3 conv (pad=1) over the merged tensor -----------------------------
    # bf16 operands straight from the scratch (no casts), f32 accumulation.
    # The sublane-unaligned kx window is materialized once per kx (3 shifted
    # slabs); the ky shift is a free outer-row slice.
    m = merged_ref[...]                                          # (H+2, W+2, Cm) bf16
    acc = jnp.zeros((H * W, Cout), f32)
    for kx in range(3):
        s = m[:, kx:kx + W, :]                                   # (H+2, W, Cm)
        for ky in range(3):
            p = s[ky:ky + H].reshape(H * W, Cm)
            acc = acc + jnp.dot(p, wc_ref[3 * ky + kx],
                                preferred_element_type=f32)
    out_ref[0] = (acc + bc_ref[...]).reshape(H, W, Cout).astype(out_ref.dtype)


def merge_c2f_t_forward(x1, x2, x3, params):
    """Pallas implementation of merge_c2f_t.forward (NCHW in, NCHW out)."""
    N, Cout, H, W = x2.shape
    Cd = x1.shape[1]
    Cu = x3.shape[1]
    Hh, Wh = H // 2, W // 2
    Cm = 3 * Cout
    assert x1.shape == (N, Cd, 2 * H, 2 * W), x1.shape
    assert x3.shape == (N, Cu, Hh, Wh), x3.shape

    bf16, f32 = jnp.bfloat16, jnp.float32

    # Host-side layout prep (fused by XLA with the unavoidable NCHW->NHWC moves).
    # space-to-depth for the stride-2 conv_down: (N,Cd,2H,2W) -> (N,H*W,4*Cd),
    # with the 4*Cd axis ordered (dy, dx, ci).
    x1p = (x1.reshape(N, Cd, H, 2, W, 2)
             .transpose(0, 2, 4, 3, 5, 1)
             .reshape(N, H * W, 4 * Cd)).astype(bf16)
    x2_nhwc = jnp.transpose(x2, (0, 2, 3, 1)).astype(bf16)
    # width-duplicate x3 so the transposed conv needs no in-kernel W interleave
    # (x3 is the smallest input; conv_up FLOPs are negligible vs the 3x3 conv).
    x3dup = (jnp.repeat(jnp.transpose(x3, (0, 2, 3, 1)), 2, axis=2)
               .reshape(N, Hh * W, Cu)).astype(bf16)

    # Weights: torch layouts -> matmul-friendly, bf16 for the MXU.
    wd = params["wd"].transpose(2, 3, 1, 0).reshape(4 * Cd, Cout).astype(bf16)
    wu = params["wu"].transpose(2, 3, 0, 1).reshape(4, Cu, Cout).astype(bf16)
    wc = params["wc"].transpose(2, 3, 1, 0).reshape(9, Cm, Cout).astype(bf16)
    bd = params["bd"].reshape(1, Cout).astype(f32)
    bu = params["bu"].reshape(1, Cout).astype(f32)
    bc = params["bc"].reshape(1, Cout).astype(f32)

    # Explicit VMEM budget: double-buffered input/output blocks + weights
    # + the bf16 merged scratch, with 2x headroom (default scoped limit is only
    # 16 MiB on v5e).  Capped at 64 MiB so it stays legal on v7x.
    in_bytes = (H * W * 4 * Cd + H * W * Cout + Hh * W * Cu) * 2
    w_bytes = (4 * Cd * Cout + 4 * Cu * Cout + 9 * Cm * Cout) * 2 + 3 * Cout * 4
    out_bytes = H * W * Cout * 4
    scratch_bytes = (H + 2) * (W + 2) * Cm * 2
    vmem_limit = int(min(64 * 2**20,
                         max(32 * 2**20,
                             2 * (2 * (in_bytes + w_bytes + out_bytes)
                                  + scratch_bytes))))

    out_nhwc = pl.pallas_call(
        _merge_c2f_kernel,
        out_shape=jax.ShapeDtypeStruct((N, H, W, Cout), f32),
        grid=(N,),
        in_specs=[
            pl.BlockSpec((1, H * W, 4 * Cd), lambda n: (n, 0, 0)),
            pl.BlockSpec((1, H, W, Cout), lambda n: (n, 0, 0, 0)),
            pl.BlockSpec((1, Hh * W, Cu), lambda n: (n, 0, 0)),
            pl.BlockSpec((4 * Cd, Cout), lambda n: (0, 0)),
            pl.BlockSpec((1, Cout), lambda n: (0, 0)),
            pl.BlockSpec((4, Cu, Cout), lambda n: (0, 0, 0)),
            pl.BlockSpec((1, Cout), lambda n: (0, 0)),
            pl.BlockSpec((9, Cm, Cout), lambda n: (0, 0, 0)),
            pl.BlockSpec((1, Cout), lambda n: (0, 0)),
        ],
        out_specs=pl.BlockSpec((1, H, W, Cout), lambda n: (n, 0, 0, 0)),
        scratch_shapes=[pltpu.VMEM((H + 2, W + 2, Cm), bf16)],
        compiler_params=pltpu.CompilerParams(
            dimension_semantics=("parallel",),     # batch is independent (v7x: 2 TCs)
            vmem_limit_bytes=vmem_limit),
    )(x1p, x2_nhwc, x3dup, wd, bd, wu, bu, wc, bc)

    return jnp.transpose(out_nhwc, (0, 3, 1, 2))                 # -> NCHW


def _ref_forward(x1, x2, x3, params):
    """Pure-JAX f32 reference with PyTorch semantics (NCHW in/out)."""
    dn = ("NCHW", "OIHW", "NCHW")
    hi = lax.Precision.HIGHEST
    y1 = lax.conv_general_dilated(x1, params["wd"], (2, 2), "VALID",
                                  dimension_numbers=dn, precision=hi)
    y1 = y1 + params["bd"][None, :, None, None]
    # ConvTranspose2d(k=2, s=2): out[n,o,2h+p,2w+q] = sum_i x3[n,i,h,w] * wu[i,o,p,q]
    y3 = jnp.einsum("nihw,iopq->nohpwq", x3, params["wu"], precision=hi)
    N, Co, Hh, _, Wh, _ = y3.shape
    y3 = y3.reshape(N, Co, 2 * Hh, 2 * Wh) + params["bu"][None, :, None, None]
    merged = jnp.concatenate([y1, x2, y3], axis=1)
    out = lax.conv_general_dilated(merged, params["wc"], (1, 1), "SAME",
                                   dimension_numbers=dn, precision=hi)
    return out + params["bc"][None, :, None, None]


def _init_params(key, cd, cu, co):
    """Parameters in the PyTorch layouts of merge_c2f_t."""
    ks = jax.random.split(key, 6)
    wd = jax.random.normal(ks[0], (co, cd, 2, 2), jnp.float32) / jnp.sqrt(4 * cd)
    bd = 0.05 * jax.random.normal(ks[1], (co,), jnp.float32)
    wu = jax.random.normal(ks[2], (cu, co, 2, 2), jnp.float32) / jnp.sqrt(4 * cu)
    bu = 0.05 * jax.random.normal(ks[3], (co,), jnp.float32)
    wc = jax.random.normal(ks[4], (co, 3 * co, 3, 3), jnp.float32) / jnp.sqrt(27 * co)
    bc = 0.05 * jax.random.normal(ks[5], (co,), jnp.float32)
    return dict(wd=wd, bd=bd, wu=wu, bu=bu, wc=wc, bc=bc)


if __name__ == "__main__":
    key = jax.random.PRNGKey(0)
    k1, k2, k3, kp = jax.random.split(key, 4)

    N, CD, CU, CO, H, W = 2, 4, 4, 8, 16, 16
    x1 = jax.random.normal(k1, (N, CD, 2 * H, 2 * W), jnp.float32)   # (2, 4, 32, 32)
    x2 = jax.random.normal(k2, (N, CO, H, W), jnp.float32)           # (2, 8, 16, 16)
    x3 = jax.random.normal(k3, (N, CU, H // 2, W // 2), jnp.float32) # (2, 4,  8,  8)
    params = _init_params(kp, CD, CU, CO)

    out = jax.block_until_ready(jax.jit(merge_c2f_t_forward)(x1, x2, x3, params))
    ref = _ref_forward(x1, x2, x3, params)

    assert out.shape == (N, CO, H, W), out.shape
    # tolerance reflects the deliberate bf16 MXU operands (f32 accumulation)
    # versus the pure-f32 reference.
    max_err = float(jnp.max(jnp.abs(out - ref)))
    assert jnp.allclose(out, ref, rtol=5e-2, atol=5e-2), max_err
    print("KERNEL_OK")
</pallas_src>

<mosaic_0001>
module attributes {stable_mosaic.version = 11 : i64} {
  func.func @_merge_c2f_kernel(%arg0: i32, %arg1: memref<1x256x16xbf16, #tpu.memory_space<vmem>>, %arg2: memref<1x16x16x8xbf16, #tpu.memory_space<vmem>>, %arg3: memref<1x128x4xbf16, #tpu.memory_space<vmem>>, %arg4: memref<16x8xbf16, #tpu.memory_space<vmem>>, %arg5: memref<1x8xf32, #tpu.memory_space<vmem>>, %arg6: memref<4x4x8xbf16, #tpu.memory_space<vmem>>, %arg7: memref<1x8xf32, #tpu.memory_space<vmem>>, %arg8: memref<9x24x8xbf16, #tpu.memory_space<vmem>>, %arg9: memref<1x8xf32, #tpu.memory_space<vmem>>, %arg10: memref<1x16x16x8xf32, #tpu.memory_space<vmem>>, %arg11: memref<18x18x24xbf16, #tpu.memory_space<vmem>>) attributes {dimension_semantics = [#tpu.dimension_semantics<parallel>], iteration_bounds = array<i64: 2>, scalar_prefetch = 0 : i64, scratch_operands = 1 : i64, tpu.core_type = #tpu.core_type<tc>, window_params = [{transform_indices = @transform_0, window_bounds = array<i64: 1, 256, 16>}, {transform_indices = @transform_1, window_bounds = array<i64: 1, 16, 16, 8>}, {transform_indices = @transform_2, window_bounds = array<i64: 1, 128, 4>}, {pipeline_mode = #tpu.pipeline_mode<synchronous>, transform_indices = @transform_3, window_bounds = array<i64: 16, 8>}, {pipeline_mode = #tpu.pipeline_mode<synchronous>, transform_indices = @transform_4, window_bounds = array<i64: 1, 8>}, {pipeline_mode = #tpu.pipeline_mode<synchronous>, transform_indices = @transform_5, window_bounds = array<i64: 4, 4, 8>}, {pipeline_mode = #tpu.pipeline_mode<synchronous>, transform_indices = @transform_6, window_bounds = array<i64: 1, 8>}, {pipeline_mode = #tpu.pipeline_mode<synchronous>, transform_indices = @transform_7, window_bounds = array<i64: 9, 24, 8>}, {pipeline_mode = #tpu.pipeline_mode<synchronous>, transform_indices = @transform_8, window_bounds = array<i64: 1, 8>}, {transform_indices = @transform_9, window_bounds = array<i64: 1, 16, 16, 8>}]} {
    %cst = arith.constant 0.000000e+00 : bf16
    %0 = vector.broadcast %cst : bf16 to vector<1x18x24xbf16>
    %c0 = arith.constant 0 : index
    %c0_0 = arith.constant 0 : index
    %c0_1 = arith.constant 0 : index
    %1 = vector.load %arg11[%c0, %c0_0, %c0_1] : memref<18x18x24xbf16, #tpu.memory_space<vmem>>, vector<1x18x24xbf16>
    tpu.vector_store %arg11[%c0, %c0_0, %c0_1], %0 {strides = array<i32>} : memref<18x18x24xbf16, #tpu.memory_space<vmem>>, vector<1x18x24xbf16>,
    %c17 = arith.constant 17 : index
    %c0_2 = arith.constant 0 : index
    %c0_3 = arith.constant 0 : index
    %2 = vector.load %arg11[%c17, %c0_2, %c0_3] : memref<18x18x24xbf16, #tpu.memory_space<vmem>>, vector<1x18x24xbf16>
    tpu.vector_store %arg11[%c17, %c0_2, %c0_3], %0 {strides = array<i32>} : memref<18x18x24xbf16, #tpu.memory_space<vmem>>, vector<1x18x24xbf16>,
    %cst_4 = arith.constant 0.000000e+00 : bf16
    %3 = vector.broadcast %cst_4 : bf16 to vector<16x1x24xbf16>
    %c1 = arith.constant 1 : index
    %c0_5 = arith.constant 0 : index
    %c0_6 = arith.constant 0 : index
    %4 = vector.load %arg11[%c1, %c0_5, %c0_6] : memref<18x18x24xbf16, #tpu.memory_space<vmem>>, vector<16x1x24xbf16>
    tpu.vector_store %arg11[%c1, %c0_5, %c0_6], %3 {strides = array<i32>} : memref<18x18x24xbf16, #tpu.memory_space<vmem>>, vector<16x1x24xbf16>,
    %c1_7 = arith.constant 1 : index
    %c17_8 = arith.constant 17 : index
    %c0_9 = arith.constant 0 : index
    %5 = vector.load %arg11[%c1_7, %c17_8, %c0_9] : memref<18x18x24xbf16, #tpu.memory_space<vmem>>, vector<16x1x24xbf16>
    tpu.vector_store %arg11[%c1_7, %c17_8, %c0_9], %3 {strides = array<i32>} : memref<18x18x24xbf16, #tpu.memory_space<vmem>>, vector<16x1x24xbf16>,
    %c0_10 = arith.constant 0 : index
    %c0_11 = arith.constant 0 : index
    %c0_12 = arith.constant 0 : index
    %6 = vector.load %arg1[%c0_10, %c0_11, %c0_12] : memref<1x256x16xbf16, #tpu.memory_space<vmem>>, vector<1x256x16xbf16>
    %7 = vector.shape_cast %6 : vector<1x256x16xbf16> to vector<256x16xbf16>
    %c0_13 = arith.constant 0 : index
    %c0_14 = arith.constant 0 : index
    %8 = vector.load %arg4[%c0_13, %c0_14] : memref<16x8xbf16, #tpu.memory_space<vmem>>, vector<16x8xbf16>
    %cst_15 = arith.constant dense<0.000000e+00> : vector<256x8xf32>
    %9 = tpu.matmul %7, %8, %cst_15 {dimension_numbers = #tpu.dot_dimension_numbers<[1], [0], [0], [1], [0, 0, 1, 1], [], []>} : vector<256x16xbf16>, vector<16x8xbf16>, vector<256x8xf32> -> vector<256x8xf32>
    %c0_16 = arith.constant 0 : index
    %c0_17 = arith.constant 0 : index
    %10 = vector.load %arg5[%c0_16, %c0_17] : memref<1x8xf32, #tpu.memory_space<vmem>>, vector<1x8xf32>
    %11 = vector.broadcast %10 : vector<1x8xf32> to vector<256x8xf32>
    %12 = arith.addf %9, %11 : vector<256x8xf32>
    %13 = vector.shape_cast %12 : vector<256x8xf32> to vector<16x16x8xf32>
    %14 = arith.truncf %13 : vector<16x16x8xf32> to vector<16x16x8xbf16>
    %c1_18 = arith.constant 1 : index
    %c1_19 = arith.constant 1 : index
    %c0_20 = arith.constant 0 : index
    %15 = vector.load %arg11[%c1_18, %c1_19, %c0_20] : memref<18x18x24xbf16, #tpu.memory_space<vmem>>, vector<16x16x8xbf16>
    tpu.vector_store %arg11[%c1_18, %c1_19, %c0_20], %14 {strides = array<i32>} : memref<18x18x24xbf16, #tpu.memory_space<vmem>>, vector<16x16x8xbf16>,
    %c0_21 = arith.constant 0 : index
    %c0_22 = arith.constant 0 : index
    %c0_23 = arith.constant 0 : index
    %c0_24 = arith.constant 0 : index
    %16 = vector.load %arg2[%c0_21, %c0_22, %c0_23, %c0_24] : memref<1x16x16x8xbf16, #tpu.memory_space<vmem>>, vector<1x16x16x8xbf16>
    %17 = vector.shape_cast %16 : vector<1x16x16x8xbf16> to vector<16x16x8xbf16>
    %c1_25 = arith.constant 1 : index
    %c1_26 = arith.constant 1 : index
    %c8 = arith.constant 8 : index
    %18 = vector.load %arg11[%c1_25, %c1_26, %c8] : memref<18x18x24xbf16, #tpu.memory_space<vmem>>, vector<16x16x8xbf16>
    tpu.vector_store %arg11[%c1_25, %c1_26, %c8], %17 {strides = array<i32>} : memref<18x18x24xbf16, #tpu.memory_space<vmem>>, vector<16x16x8xbf16>,
    %c0_27 = arith.constant 0 : index
    %c0_28 = arith.constant 0 : index
    %c0_29 = arith.constant 0 : index
    %19 = vector.load %arg3[%c0_27, %c0_28, %c0_29] : memref<1x128x4xbf16, #tpu.memory_space<vmem>>, vector<1x128x4xbf16>
    %20 = vector.shape_cast %19 : vector<1x128x4xbf16> to vector<128x4xbf16>
    %21 = tpu.iota {dimensions = array<i32: 1>} : vector<8x16x1xi32>
    %c2_i32 = arith.constant 2 : i32
    %c0_i32 = arith.constant 0 : i32
    %22 = arith.cmpi eq, %c2_i32, %c0_i32 : i32
    %c1_i32 = arith.constant 1 : i32
    %23 = arith.select %22, %c1_i32, %c2_i32 : i32
    %24 = vector.broadcast %23 : i32 to vector<8x16x1xi32>
    %25 = arith.remsi %21, %24 : vector<8x16x1xi32>
    %c0_i32_30 = arith.constant 0 : i32
    %26 = vector.broadcast %c0_i32_30 : i32 to vector<8x16x1xi32>
    %27 = arith.cmpi ne, %25, %26 : vector<8x16x1xi32>
    %c0_i32_31 = arith.constant 0 : i32
    %28 = vector.broadcast %c0_i32_31 : i32 to vector<8x16x1xi32>
    %29 = arith.cmpi slt, %25, %28 : vector<8x16x1xi32>
    %c0_i32_32 = arith.constant 0 : i32
    %30 = arith.cmpi slt, %23, %c0_i32_32 : i32
    %31 = vector.broadcast %30 : i1 to vector<8x16x1xi1>
    %32 = vector.broadcast %31 : vector<8x16x1xi1> to vector<8x16x1xi1>
    %33 = arith.xori %29, %32 : vector<8x16x1xi1>
    %34 = arith.andi %33, %27 : vector<8x16x1xi1>
    %35 = vector.broadcast %23 : i32 to vector<8x16x1xi32>
    %36 = arith.addi %25, %35 : vector<8x16x1xi32>
    %37 = arith.select %34, %36, %25 : vector<8x16x1xi1>, vector<8x16x1xi32>
    %c0_i32_33 = arith.constant 0 : i32
    %38 = vector.broadcast %c0_i32_33 : i32 to vector<8x16x1xi32>
    %39 = arith.cmpi eq, %37, %38 : vector<8x16x1xi32>
    %c0_34 = arith.constant 0 : index
    %c0_35 = arith.constant 0 : index
    %c0_36 = arith.constant 0 : index
    %40 = vector.load %arg6[%c0_34, %c0_35, %c0_36] : memref<4x4x8xbf16, #tpu.memory_space<vmem>>, vector<1x4x8xbf16>
    %41 = vector.shape_cast %40 : vector<1x4x8xbf16> to vector<4x8xbf16>
    %cst_37 = arith.constant dense<0.000000e+00> : vector<128x8xf32>
    %42 = tpu.matmul %20, %41, %cst_37 {dimension_numbers = #tpu.dot_dimension_numbers<[1], [0], [0], [1], [0, 0, 1, 1], [], []>} : vector<128x4xbf16>, vector<4x8xbf16>, vector<128x8xf32> -> vector<128x8xf32>
    %43 = vector.shape_cast %42 : vector<128x8xf32> to vector<8x16x8xf32>
    %c1_38 = arith.constant 1 : index
    %c0_39 = arith.constant 0 : index
    %c0_40 = arith.constant 0 : index
    %44 = vector.load %arg6[%c1_38, %c0_39, %c0_40] : memref<4x4x8xbf16, #tpu.memory_space<vmem>>, vector<1x4x8xbf16>
    %45 = vector.shape_cast %44 : vector<1x4x8xbf16> to vector<4x8xbf16>
    %cst_41 = arith.constant dense<0.000000e+00> : vector<128x8xf32>
    %46 = tpu.matmul %20, %45, %cst_41 {dimension_numbers = #tpu.dot_dimension_numbers<[1], [0], [0], [1], [0, 0, 1, 1], [], []>} : vector<128x4xbf16>, vector<4x8xbf16>, vector<128x8xf32> -> vector<128x8xf32>
    %47 = vector.shape_cast %46 : vector<128x8xf32> to vector<8x16x8xf32>
    %48 = vector.shape_cast %39 : vector<8x16x1xi1> to vector<8x16x1xi1>
    %49 = vector.broadcast %48 : vector<8x16x1xi1> to vector<8x16x8xi1>
    %50 = arith.select %49, %43, %47 : vector<8x16x8xi1>, vector<8x16x8xf32>
    %c2 = arith.constant 2 : index
    %c0_42 = arith.constant 0 : index
    %c0_43 = arith.constant 0 : index
    %51 = vector.load %arg6[%c2, %c0_42, %c0_43] : memref<4x4x8xbf16, #tpu.memory_space<vmem>>, vector<1x4x8xbf16>
    %52 = vector.shape_cast %51 : vector<1x4x8xbf16> to vector<4x8xbf16>
    %cst_44 = arith.constant dense<0.000000e+00> : vector<128x8xf32>
    %53 = tpu.matmul %20, %52, %cst_44 {dimension_numbers = #tpu.dot_dimension_numbers<[1], [0], [0], [1], [0, 0, 1, 1], [], []>} : vector<128x4xbf16>, vector<4x8xbf16>, vector<128x8xf32> -> vector<128x8xf32>
    %54 = vector.shape_cast %53 : vector<128x8xf32> to vector<8x16x8xf32>
    %c3 = arith.constant 3 : index
    %c0_45 = arith.constant 0 : index
    %c0_46 = arith.constant 0 : index
    %55 = vector.load %arg6[%c3, %c0_45, %c0_46] : memref<4x4x8xbf16, #tpu.memory_space<vmem>>, vector<1x4x8xbf16>
    %56 = vector.shape_cast %55 : vector<1x4x8xbf16> to vector<4x8xbf16>
    %cst_47 = arith.constant dense<0.000000e+00> : vector<128x8xf32>
    %57 = tpu.matmul %20, %56, %cst_47 {dimension_numbers = #tpu.dot_dimension_numbers<[1], [0], [0], [1], [0, 0, 1, 1], [], []>} : vector<128x4xbf16>, vector<4x8xbf16>, vector<128x8xf32> -> vector<128x8xf32>
    %58 = vector.shape_cast %57 : vector<128x8xf32> to vector<8x16x8xf32>
    %59 = vector.shape_cast %39 : vector<8x16x1xi1> to vector<8x16x1xi1>
    %60 = vector.broadcast %59 : vector<8x16x1xi1> to vector<8x16x8xi1>
    %61 = arith.select %60, %54, %58 : vector<8x16x8xi1>, vector<8x16x8xf32>
    %62 = vector.shape_cast %50 : vector<8x16x8xf32> to vector<8x1x16x8xf32>
    %63 = vector.shape_cast %61 : vector<8x16x8xf32> to vector<8x1x16x8xf32>
    %64 = tpu.concatenate %62, %63 in 1 : vector<8x1x16x8xf32>, vector<8x1x16x8xf32> -> vector<8x2x16x8xf32>
    %65 = vector.shape_cast %64 : vector<8x2x16x8xf32> to vector<16x16x8xf32>
    %c0_48 = arith.constant 0 : index
    %c0_49 = arith.constant 0 : index
    %66 = vector.load %arg7[%c0_48, %c0_49] : memref<1x8xf32, #tpu.memory_space<vmem>>, vector<1x8xf32>
    %67 = vector.shape_cast %66 : vector<1x8xf32> to vector<1x1x8xf32>
    %68 = vector.broadcast %67 : vector<1x1x8xf32> to vector<16x16x8xf32>
    %69 = arith.addf %65, %68 : vector<16x16x8xf32>
    %70 = arith.truncf %69 : vector<16x16x8xf32> to vector<16x16x8xbf16>
    %c1_50 = arith.constant 1 : index
    %c1_51 = arith.constant 1 : index
    %c16 = arith.constant 16 : index
    %71 = vector.load %arg11[%c1_50, %c1_51, %c16] : memref<18x18x24xbf16, #tpu.memory_space<vmem>>, vector<16x16x8xbf16>
    tpu.vector_store %arg11[%c1_50, %c1_51, %c16], %70 {strides = array<i32>} : memref<18x18x24xbf16, #tpu.memory_space<vmem>>, vector<16x16x8xbf16>,
    %c0_52 = arith.constant 0 : index
    %c0_53 = arith.constant 0 : index
    %c0_54 = arith.constant 0 : index
    %72 = vector.load %arg11[%c0_52, %c0_53, %c0_54] : memref<18x18x24xbf16, #tpu.memory_space<vmem>>, vector<18x18x24xbf16>
    %cst_55 = arith.constant 0.000000e+00 : f32
    %73 = vector.broadcast %cst_55 : f32 to vector<256x8xf32>
    %74 = vector.extract_strided_slice %72 {offsets = [0, 0, 0], sizes = [18, 16, 24], strides = [1, 1, 1]} : vector<18x18x24xbf16> to vector<18x16x24xbf16>
    %75 = vector.extract_strided_slice %74 {offsets = [0, 0, 0], sizes = [16, 16, 24], strides = [1, 1, 1]} : vector<18x16x24xbf16> to vector<16x16x24xbf16>
    %76 = vector.shape_cast %75 : vector<16x16x24xbf16> to vector<256x24xbf16>
    %c0_56 = arith.constant 0 : index
    %c0_57 = arith.constant 0 : index
    %c0_58 = arith.constant 0 : index
    %77 = vector.load %arg8[%c0_56, %c0_57, %c0_58] : memref<9x24x8xbf16, #tpu.memory_space<vmem>>, vector<1x24x8xbf16>
    %78 = vector.shape_cast %77 : vector<1x24x8xbf16> to vector<24x8xbf16>
    %cst_59 = arith.constant dense<0.000000e+00> : vector<256x8xf32>
    %79 = tpu.matmul %76, %78, %cst_59 {dimension_numbers = #tpu.dot_dimension_numbers<[1], [0], [0], [1], [0, 0, 1, 1], [], []>} : vector<256x24xbf16>, vector<24x8xbf16>, vector<256x8xf32> -> vector<256x8xf32>
    %80 = arith.addf %73, %79 : vector<256x8xf32>
    %81 = vector.extract_strided_slice %74 {offsets = [1, 0, 0], sizes = [16, 16, 24], strides = [1, 1, 1]} : vector<18x16x24xbf16> to vector<16x16x24xbf16>
    %82 = vector.shape_cast %81 : vector<16x16x24xbf16> to vector<256x24xbf16>
    %c3_60 = arith.constant 3 : index
    %c0_61 = arith.constant 0 : index
    %c0_62 = arith.constant 0 : index
    %83 = vector.load %arg8[%c3_60, %c0_61, %c0_62] : memref<9x24x8xbf16, #tpu.memory_space<vmem>>, vector<1x24x8xbf16>
    %84 = vector.shape_cast %83 : vector<1x24x8xbf16> to vector<24x8xbf16>
    %cst_63 = arith.constant dense<0.000000e+00> : vector<256x8xf32>
    %85 = tpu.matmul %82, %84, %cst_63 {dimension_numbers = #tpu.dot_dimension_numbers<[1], [0], [0], [1], [0, 0, 1, 1], [], []>} : vector<256x24xbf16>, vector<24x8xbf16>, vector<256x8xf32> -> vector<256x8xf32>
    %86 = arith.addf %80, %85 : vector<256x8xf32>
    %87 = vector.extract_strided_slice %74 {offsets = [2, 0, 0], sizes = [16, 16, 24], strides = [1, 1, 1]} : vector<18x16x24xbf16> to vector<16x16x24xbf16>
    %88 = vector.shape_cast %87 : vector<16x16x24xbf16> to vector<256x24xbf16>
    %c6 = arith.constant 6 : index
    %c0_64 = arith.constant 0 : index
    %c0_65 = arith.constant 0 : index
    %89 = vector.load %arg8[%c6, %c0_64, %c0_65] : memref<9x24x8xbf16, #tpu.memory_space<vmem>>, vector<1x24x8xbf16>
    %90 = vector.shape_cast %89 : vector<1x24x8xbf16> to vector<24x8xbf16>
    %cst_66 = arith.constant dense<0.000000e+00> : vector<256x8xf32>
    %91 = tpu.matmul %88, %90, %cst_66 {dimension_numbers = #tpu.dot_dimension_numbers<[1], [0], [0], [1], [0, 0, 1, 1], [], []>} : vector<256x24xbf16>, vector<24x8xbf16>, vector<256x8xf32> -> vector<256x8xf32>
    %92 = arith.addf %86, %91 : vector<256x8xf32>
    %93 = vector.extract_strided_slice %72 {offsets = [0, 1, 0], sizes = [18, 16, 24], strides = [1, 1, 1]} : vector<18x18x24xbf16> to vector<18x16x24xbf16>
    %94 = vector.extract_strided_slice %93 {offsets = [0, 0, 0], sizes = [16, 16, 24], strides = [1, 1, 1]} : vector<18x16x24xbf16> to vector<16x16x24xbf16>
    %95 = vector.shape_cast %94 : vector<16x16x24xbf16> to vector<256x24xbf16>
    %c1_67 = arith.constant 1 : index
    %c0_68 = arith.constant 0 : index
    %c0_69 = arith.constant 0 : index
    %96 = vector.load %arg8[%c1_67, %c0_68, %c0_69] : memref<9x24x8xbf16, #tpu.memory_space<vmem>>, vector<1x24x8xbf16>
    %97 = vector.shape_cast %96 : vector<1x24x8xbf16> to vector<24x8xbf16>
    %cst_70 = arith.constant dense<0.000000e+00> : vector<256x8xf32>
    %98 = tpu.matmul %95, %97, %cst_70 {dimension_numbers = #tpu.dot_dimension_numbers<[1], [0], [0], [1], [0, 0, 1, 1], [], []>} : vector<256x24xbf16>, vector<24x8xbf16>, vector<256x8xf32> -> vector<256x8xf32>
    %99 = arith.addf %92, %98 : vector<256x8xf32>
    %100 = vector.extract_strided_slice %93 {offsets = [1, 0, 0], sizes = [16, 16, 24], strides = [1, 1, 1]} : vector<18x16x24xbf16> to vector<16x16x24xbf16>
    %101 = vector.shape_cast %100 : vector<16x16x24xbf16> to vector<256x24xbf16>
    %c4 = arith.constant 4 : index
    %c0_71 = arith.constant 0 : index
    %c0_72 = arith.constant 0 : index
    %102 = vector.load %arg8[%c4, %c0_71, %c0_72] : memref<9x24x8xbf16, #tpu.memory_space<vmem>>, vector<1x24x8xbf16>
    %103 = vector.shape_cast %102 : vector<1x24x8xbf16> to vector<24x8xbf16>
    %cst_73 = arith.constant dense<0.000000e+00> : vector<256x8xf32>
    %104 = tpu.matmul %101, %103, %cst_73 {dimension_numbers = #tpu.dot_dimension_numbers<[1], [0], [0], [1], [0, 0, 1, 1], [], []>} : vector<256x24xbf16>, vector<24x8xbf16>, vector<256x8xf32> -> vector<256x8xf32>
    %105 = arith.addf %99, %104 : vector<256x8xf32>
    %106 = vector.extract_strided_slice %93 {offsets = [2, 0, 0], sizes = [16, 16, 24], strides = [1, 1, 1]} : vector<18x16x24xbf16> to vector<16x16x24xbf16>
    %107 = vector.shape_cast %106 : vector<16x16x24xbf16> to vector<256x24xbf16>
    %c7 = arith.constant 7 : index
    %c0_74 = arith.constant 0 : index
    %c0_75 = arith.constant 0 : index
    %108 = vector.load %arg8[%c7, %c0_74, %c0_75] : memref<9x24x8xbf16, #tpu.memory_space<vmem>>, vector<1x24x8xbf16>
    %109 = vector.shape_cast %108 : vector<1x24x8xbf16> to vector<24x8xbf16>
    %cst_76 = arith.constant dense<0.000000e+00> : vector<256x8xf32>
    %110 = tpu.matmul %107, %109, %cst_76 {dimension_numbers = #tpu.dot_dimension_numbers<[1], [0], [0], [1], [0, 0, 1, 1], [], []>} : vector<256x24xbf16>, vector<24x8xbf16>, vector<256x8xf32> -> vector<256x8xf32>
    %111 = arith.addf %105, %110 : vector<256x8xf32>
    %112 = vector.extract_strided_slice %72 {offsets = [0, 2, 0], sizes = [18, 16, 24], strides = [1, 1, 1]} : vector<18x18x24xbf16> to vector<18x16x24xbf16>
    %113 = vector.extract_strided_slice %112 {offsets = [0, 0, 0], sizes = [16, 16, 24], strides = [1, 1, 1]} : vector<18x16x24xbf16> to vector<16x16x24xbf16>
    %114 = vector.shape_cast %113 : vector<16x16x24xbf16> to vector<256x24xbf16>
    %c2_77 = arith.constant 2 : index
    %c0_78 = arith.constant 0 : index
    %c0_79 = arith.constant 0 : index
    %115 = vector.load %arg8[%c2_77, %c0_78, %c0_79] : memref<9x24x8xbf16, #tpu.memory_space<vmem>>, vector<1x24x8xbf16>
    %116 = vector.shape_cast %115 : vector<1x24x8xbf16> to vector<24x8xbf16>
    %cst_80 = arith.constant dense<0.000000e+00> : vector<256x8xf32>
    %117 = tpu.matmul %114, %116, %cst_80 {dimension_numbers = #tpu.dot_dimension_numbers<[1], [0], [0], [1], [0, 0, 1, 1], [], []>} : vector<256x24xbf16>, vector<24x8xbf16>, vector<256x8xf32> -> vector<256x8xf32>
    %118 = arith.addf %111, %117 : vector<256x8xf32>
    %119 = vector.extract_strided_slice %112 {offsets = [1, 0, 0], sizes = [16, 16, 24], strides = [1, 1, 1]} : vector<18x16x24xbf16> to vector<16x16x24xbf16>
    %120 = vector.shape_cast %119 : vector<16x16x24xbf16> to vector<256x24xbf16>
    %c5 = arith.constant 5 : index
    %c0_81 = arith.constant 0 : index
    %c0_82 = arith.constant 0 : index
    %121 = vector.load %arg8[%c5, %c0_81, %c0_82] : memref<9x24x8xbf16, #tpu.memory_space<vmem>>, vector<1x24x8xbf16>
    %122 = vector.shape_cast %121 : vector<1x24x8xbf16> to vector<24x8xbf16>
    %cst_83 = arith.constant dense<0.000000e+00> : vector<256x8xf32>
    %123 = tpu.matmul %120, %122, %cst_83 {dimension_numbers = #tpu.dot_dimension_numbers<[1], [0], [0], [1], [0, 0, 1, 1], [], []>} : vector<256x24xbf16>, vector<24x8xbf16>, vector<256x8xf32> -> vector<256x8xf32>
    %124 = arith.addf %118, %123 : vector<256x8xf32>
    %125 = vector.extract_strided_slice %112 {offsets = [2, 0, 0], sizes = [16, 16, 24], strides = [1, 1, 1]} : vector<18x16x24xbf16> to vector<16x16x24xbf16>
    %126 = vector.shape_cast %125 : vector<16x16x24xbf16> to vector<256x24xbf16>
    %c8_84 = arith.constant 8 : index
    %c0_85 = arith.constant 0 : index
    %c0_86 = arith.constant 0 : index
    %127 = vector.load %arg8[%c8_84, %c0_85, %c0_86] : memref<9x24x8xbf16, #tpu.memory_space<vmem>>, vector<1x24x8xbf16>
    %128 = vector.shape_cast %127 : vector<1x24x8xbf16> to vector<24x8xbf16>
    %cst_87 = arith.constant dense<0.000000e+00> : vector<256x8xf32>
    %129 = tpu.matmul %126, %128, %cst_87 {dimension_numbers = #tpu.dot_dimension_numbers<[1], [0], [0], [1], [0, 0, 1, 1], [], []>} : vector<256x24xbf16>, vector<24x8xbf16>, vector<256x8xf32> -> vector<256x8xf32>
    %130 = arith.addf %124, %129 : vector<256x8xf32>
    %c0_88 = arith.constant 0 : index
    %c0_89 = arith.constant 0 : index
    %131 = vector.load %arg9[%c0_88, %c0_89] : memref<1x8xf32, #tpu.memory_space<vmem>>, vector<1x8xf32>
    %132 = vector.broadcast %131 : vector<1x8xf32> to vector<256x8xf32>
    %133 = arith.addf %130, %132 : vector<256x8xf32>
    %134 = vector.shape_cast %133 : vector<256x8xf32> to vector<16x16x8xf32>
    %c0_90 = arith.constant 0 : index
    %c0_91 = arith.constant 0 : index
    %c0_92 = arith.constant 0 : index
    %c0_93 = arith.constant 0 : index
    %135 = vector.load %arg10[%c0_90, %c0_91, %c0_92, %c0_93] : memref<1x16x16x8xf32, #tpu.memory_space<vmem>>, vector<1x16x16x8xf32>
    %136 = vector.shape_cast %135 : vector<1x16x16x8xf32> to vector<16x16x8xf32>
    %137 = vector.shape_cast %134 : vector<16x16x8xf32> to vector<1x16x16x8xf32>
    tpu.vector_store %arg10[%c0_90, %c0_91, %c0_92, %c0_93], %137 {strides = array<i32>} : memref<1x16x16x8xf32, #tpu.memory_space<vmem>>, vector<1x16x16x8xf32>,
    return
  }
  func.func @transform_0(%arg0: i32) -> (i32, i32, i32) {
    %c0_i32 = arith.constant 0 : i32
    %c0_i32_0 = arith.constant 0 : i32
    %c0_i32_1 = arith.constant 0 : i32
    return %arg0, %c0_i32, %c0_i32_0 : i32, i32, i32
  }
  func.func @transform_1(%arg0: i32) -> (i32, i32, i32, i32) {
    %c0_i32 = arith.constant 0 : i32
    %c0_i32_0 = arith.constant 0 : i32
    %c0_i32_1 = arith.constant 0 : i32
    %c0_i32_2 = arith.constant 0 : i32
    return %arg0, %c0_i32, %c0_i32_0, %c0_i32_1 : i32, i32, i32, i32
  }
  func.func @transform_2(%arg0: i32) -> (i32, i32, i32) {
    %c0_i32 = arith.constant 0 : i32
    %c0_i32_0 = arith.constant 0 : i32
    %c0_i32_1 = arith.constant 0 : i32
    return %arg0, %c0_i32, %c0_i32_0 : i32, i32, i32
  }
  func.func @transform_3(%arg0: i32) -> (i32, i32) {
    %c0_i32 = arith.constant 0 : i32
    %c0_i32_0 = arith.constant 0 : i32
    %c0_i32_1 = arith.constant 0 : i32
    return %c0_i32, %c0_i32_0 : i32, i32
  }
  func.func @transform_4(%arg0: i32) -> (i32, i32) {
    %c0_i32 = arith.constant 0 : i32
    %c0_i32_0 = arith.constant 0 : i32
    %c0_i32_1 = arith.constant 0 : i32
    return %c0_i32, %c0_i32_0 : i32, i32
  }
  func.func @transform_5(%arg0: i32) -> (i32, i32, i32) {
    %c0_i32 = arith.constant 0 : i32
    %c0_i32_0 = arith.constant 0 : i32
    %c0_i32_1 = arith.constant 0 : i32
    %c0_i32_2 = arith.constant 0 : i32
    return %c0_i32, %c0_i32_0, %c0_i32_1 : i32, i32, i32
  }
  func.func @transform_6(%arg0: i32) -> (i32, i32) {
    %c0_i32 = arith.constant 0 : i32
    %c0_i32_0 = arith.constant 0 : i32
    %c0_i32_1 = arith.constant 0 : i32
    return %c0_i32, %c0_i32_0 : i32, i32
  }
  func.func @transform_7(%arg0: i32) -> (i32, i32, i32) {
    %c0_i32 = arith.constant 0 : i32
    %c0_i32_0 = arith.constant 0 : i32
    %c0_i32_1 = arith.constant 0 : i32
    %c0_i32_2 = arith.constant 0 : i32
    return %c0_i32, %c0_i32_0, %c0_i32_1 : i32, i32, i32
  }
  func.func @transform_8(%arg0: i32) -> (i32, i32) {
    %c0_i32 = arith.constant 0 : i32
    %c0_i32_0 = arith.constant 0 : i32
    %c0_i32_1 = arith.constant 0 : i32
    return %c0_i32, %c0_i32_0 : i32, i32
  }
  func.func @transform_9(%arg0: i32) -> (i32, i32, i32, i32) {
    %c0_i32 = arith.constant 0 : i32
    %c0_i32_0 = arith.constant 0 : i32
    %c0_i32_1 = arith.constant 0 : i32
    %c0_i32_2 = arith.constant 0 : i32
    return %arg0, %c0_i32, %c0_i32_0, %c0_i32_1 : i32, i32, i32, i32
  }
}

</mosaic_0001>

<bundles_post_ra>
// kernel: merge_c2f_t_forward.1
= control target key start
LH: loop header
LB: loop body
LE: loop exit
PB: predicated region body
PF: predicated region fallthrough
CT: control target
= control target key end

     0   :  { %s7389_s30 = smov 0   ;;  %s10828_s0 = inlined_call_operand.vmem [shape: bf16[2,256,16], index: 0, kind: input, shape index: {}]   ;;  %s10829_s1 = inlined_call_operand.vmem [shape: bf16[2,16,16,8], index: 1, kind: input, shape index: {}]   ;;  %s10830_s2 = inlined_call_operand.vmem [shape: bf16[2,128,4], index: 2, kind: input, shape index: {}]   ;;  %s10831_s3 = inlined_call_operand.vmem [shape: bf16[16,8], index: 3, kind: input, shape index: {}]   ;;  %s10832_s4 = inlined_call_operand.vmem [shape: f32[1,8], index: 4, kind: input, shape index: {}]   ;;  %s10833_s5 = inlined_call_operand.vmem [shape: bf16[4,4,8], index: 5, kind: input, shape index: {}]   ;;  %s10834_s6 = inlined_call_operand.vmem [shape: f32[1,8], index: 6, kind: input, shape index: {}]   ;;  %s10835_s7 = inlined_call_operand.vmem [shape: bf16[9,24,8], index: 7, kind: input, shape index: {}]   ;;  %s10836_s8 = inlined_call_operand.vmem [shape: f32[1,8], index: 8, kind: input, shape index: {}]   ;;  %s10837_s9 = inlined_call_operand.vmem [shape: f32[2,16,16,8], index: 9, kind: output, shape index: {}]  }
   0x1 LB: > { %s6109_s10 = sadd.s32 4294967295, %s7334_s30   ;;  %p6113_p0 = scmp.ge.s32.totalorder %s7334_s30, 1  ;;  %s7334_s30 = sphi %s7389_s30, %s19_s30  }
   0x2   : > { %p307_p1 = scmp.lt.s32.totalorder %s7334_s30, 3 }
   0x4   : > { %p308_p2 = pnand %p6113_p0, %p307_p1 }
   0x6   : > { %311 = sbr.rel (%p308_p2) target bundleno = 978 (0x3d2), region = 56 }
   0xb   : > { %v7264_v0 = vld [vmem:[%s10831_s3] sm:$0xff]   ;;  %p353_p3 = scmp.lt.s32.totalorder %s6109_s10, 1  ;;  %vm2033_vm0 = vcmask 1041408   ;;  %vm612_vm1 = vcmask 130048   ;;  %s7336_s11 = smov 8   ;;  %vm2008_vm3 = vcmask 31744  }
   0xc   : > { %v1967_v1 = vld [vmem:[%s10833_s5] sm:$0x3]  ;;  %7238 = vmatprep.subr.bf16.mxu1 %v7264_v0  ;;  %6808 = vmatprep.subr.bf16.mxu0 %v7264_v0  ;;  %v6213_v2 = vld [vmem:[%s10833_s5 + $0x4] sm:$0x3]  ;;  %v7420_v4 = vld [vmem:[%s10833_s5 + $0x2] sm:$0x3] }
   0xd   : > { %s11287_s10 = smov (!%p353_p3, %s6109_s10), 1  ;;  %7239 = vmatpush3.bf16.msra.mxu1 %v7264_v0  ;;  %6809 = vmatpush3.bf16.msra.mxu0 %v7264_v0  ;;  %v2035_v6 = vsel %vm2033_vm0, %v1967_v1, 0  ;;  %v2259_v25 = vsel %vm2033_vm0, %v6213_v2, 0  ;;  %vm385_vm2 = vsmask.f32 256  ;;  %v2137_v52 = vsel %vm2033_vm0, %v7420_v4, 0 }
   0xe   : > { %s6525_s17 = sshll.u32 %s11287_s10, 7  ;;  %7240 = vmatprep.subr.msk.bf16.mxu1 %vm2033_vm0, %v1967_v1  ;;  %7242 = vmatprep.subr.msk.bf16.mxu0 %vm2033_vm0, %v6213_v2  ;;  %s6527_s23 = sshll.u32 %s11287_s10, 6  ;;  %vm918_vm4 = vsmask.f32 4368  ;;  %v7506_v54 = vld [vmem:[%s10833_s5 + $0x6] sm:$0x3] }
   0xf   : > { %s7414_s20 = scalar_lea.vmem %s10828_s0, %s6525_s17  ;;  %s7435_s26 = scalar_lea.vmem %s10830_s2, %s6527_s23  ;;  %vm7481_vm5 = vmor %vm385_vm2, %vm918_vm4  ;;  %vm377_vm6 = vcmask 188416   ;;  %vm435_vm8 = vsmask.f32 7938  ;;  %vm1240_vm10 = vcmask 60416   ;;  %vm1247_vm12 = vcmask 57344  }
  0x10   : > { %v7265_v3 = vld [vmem:[%s7414_s20 + $0x40] sm:$0xff]   ;;  %v7266_v5 = vld [vmem:[%s7414_s20 + $0x48] sm:$0xff]   ;;  %v7267_v7 = vld [vmem:[%s7414_s20 + $0x50] sm:$0xff]   ;;  %s7442_s29 = scalar_lea.vmem %s10829_s1, %s6525_s17  ;;  %vm1805_vm14 = vcmask 126016   ;;  %s7337_s18 = smov 16   ;;  %vm374_vm4 = vcmask 191488  }
  0x11   : > { %6826 = vmatprep.mubr.msk.bf16.mxu1 %vm612_vm1, %v7265_v3  ;;  %v7268_v8 = vld [vmem:[%s7414_s20 + $0x58] sm:$0xff]   ;;  %v7269_v9 = vld [vmem:[%s7414_s20 + $0x60] sm:$0xff]   ;;  %v1359_v11 = vld [vmem:[%s7442_s29 + $0x8] sm:$0xf]  ;;  %s6528_s17 = sshll.u32 %s11287_s10, 8 }
  0x12   : > { %6827 = vmatmul.mubr.msk.bf16.vlgmr.msra.gmra.mxu1 %vm612_vm1, %v7266_v5  ;;  %v1357_v10 = vld [vmem:[%s7442_s29] sm:$0xf]  ;;  %v7270_v12 = vld [vmem:[%s7414_s20 + $0x68] sm:$0xff]   ;;  %v1407_v15 = vshrl.u32 %v1359_v11, 16  ;;  %v7271_v16 = vld [vmem:[%s7414_s20 + $0x70] sm:$0xff]   ;;  %v1410_v19 = vshll.u32 %v1359_v11, 16  ;;  %s10608_s10 = scalar_lea.vmem %s10837_s9, %s6528_s17 }
  0x13   : > { %6843 = vmatpush3.bf16.msra.mxu1 %v2035_v6  ;;  %6830 = vmatprep.mubr.msk.bf16.mxu1 %vm612_vm1, %v7267_v7  ;;  %v1390_v13 = vshrl.u32 %v1357_v10, 16  ;;  %v1393_v14 = vshll.u32 %v1357_v10, 16  ;;  %v1363_v20 = vld [vmem:[%s7442_s29 + $0x18] sm:$0xf]  ;;  %v7281_v21 = vld [vmem:[%s7414_s20] sm:$0xff]   ;;  %v7282_v24 = vld [vmem:[%s7414_s20 + $0x8] sm:$0xff]  }
  0x14   : > { %7241 = vmatprep.subr.msk.bf16.mxu1 %vm2033_vm0, %v7420_v4  ;;  %v1409_v18 = vrot.slane %v1407_v15, 7  ;;  %v1441_v22 = vshrl.u32 %v1363_v20, 16  ;;  %6810 = vmatprep.mubr.msk.bf16.mxu0 %vm612_vm1, %v7281_v21  ;;  %v1444_v26 = vshll.u32 %v1363_v20, 16  ;;  %v1360_v27 = vld [vmem:[%s7442_s29 + $0xc] sm:$0xf]  ;;  %v7283_v33 = vld [vmem:[%s7414_s20 + $0x10] sm:$0xff]   ;;  %vm7544_vm7 = vmand %vm377_vm6, %vm385_vm2 }
  0x15   : > { %v7449_v17 = vrot.slane %v1390_v13, 7  ;;  %6811 = vmatmul.mubr.msk.bf16.vlgmr.msra.gmra.mxu0 %vm612_vm1, %v7282_v24  ;;  %v1415_v30 = vshrl.u32 %v1360_v27, 16  ;;  %v1365_v31 = vld [vmem:[%s7442_s29 + $0x20] sm:$0xf]  ;;  %v1418_v32 = vshll.u32 %v1360_v27, 16  ;;  %v7272_v34 = vld [vmem:[%s7414_s20 + $0x78] sm:$0xff]   ;;  %vm7637_vm9 = vmand %vm377_vm6, %vm435_vm8 }
  0x16   : > { %v1412_v28 = vor.u32 %v1410_v19, %v1409_v18  ;;  %v7461_v29 = vrot.slane %v1441_v22, 7  ;;  %6879 = vmatpush3.bf16.msra.mxu0 %v2259_v25  ;;  %v7470_v36 = vld [vmem:[%s7435_s26] sm:$0xff]   ;;  %6814 = vmatprep.mubr.msk.bf16.mxu0 %vm612_vm1, %v7283_v33  ;;  %v1458_v38 = vshrl.u32 %v1365_v31, 16  ;;  %v7284_v39 = vld [vmem:[%s7414_s20 + $0x18] sm:$0xff]   ;;  %v1413_v40 = vrot.slane %v1409_v18, 4  ;;  %v7496_v51 = vld [vmem:[%s7435_s26 + $0x8] sm:$0xff]  }
  0x17   : > { %v1395_v23 = vor.u32 %v1393_v14, %v7449_v17  ;;  %v7467_v35 = vrot.slane %v1415_v30, 7  ;;  %v1367_v42 = vld [vmem:[%s7442_s29 + $0x28] sm:$0xf]  ;;  %v7285_v43 = vld [vmem:[%s7414_s20 + $0x20] sm:$0xff]   ;;  %v1364_v45 = vld [vmem:[%s7442_s29 + $0x1c] sm:$0xf] }
  0x18   : > { %v1446_v37 = vor.u32 %v1444_v26, %v7461_v29  ;;  %v1461_v46 = vshll.u32 %v1365_v31, 16  ;;  %v7489_v47 = vrot.slane %v1458_v38, 7  ;;  %v1475_v48 = vshrl.u32 %v1367_v42, 16  ;;  %v7501_v53 = vld [vmem:[%s7435_s26 + $0x10] sm:$0xff]   ;;  %v1371_v60 = vld [vmem:[%s7442_s29 + $0x38] sm:$0xf]  ;;  %vm7814_vm11 = vmand %vm1240_vm10, %vm435_vm8 }
  0x19   : > { %1661 = vrot.lane.b32.xlu0 %v1395_v23, %s7336_s11  ;;  %10922 = vst [vmem:[#allocation3_spill] sm:$0xff] %v7467_v35  ;;  %v1420_v41 = vor.u32 %v1418_v32, %v7467_v35  ;;  %v1449_v50 = vshrl.u32 %v1364_v45, 16  ;;  %v1369_v55 = vld [vmem:[%s7442_s29 + $0x30] sm:$0xf]  ;;  %v1478_v58 = vshll.u32 %v1367_v42, 16  ;;  %v1452_v59 = vshll.u32 %v1364_v45, 16  ;;  %vm7828_vm13 = vmand %vm1247_vm12, %vm385_vm2 }
  0x1a   : > { %6831 = vmatmul.mubr.msk.bf16.gmra.mxu1 %vm612_vm1, %v7268_v8  ;;  %v1463_v56 = vor.u32 %v1461_v46, %v7489_v47  ;;  %v7511_v57 = vrot.slane %v1475_v48, 7  ;;  %v7286_v62 = vld [vmem:[%s7414_s20 + $0x28] sm:$0xff]   ;;  %v1361_v0 = vld [vmem:[%s7442_s29 + $0x10] sm:$0xf]  ;;  %v1492_v1 = vshrl.u32 %v1369_v55, 16  ;;  %v1509_v3 = vshrl.u32 %v1371_v60, 16  ;;  %vm7847_vm15 = vmand %vm1805_vm14, %vm435_vm8 }
  0x1b   : > { %6834 = vmatprep.mubr.msk.bf16.mxu1 %vm612_vm1, %v7269_v9  ;;  %v1421_v49 = vsel %vm7481_vm5, %v1413_v40, %v1420_v41  ;;  %v7514_v61 = vrot.slane %v1449_v50, 7  ;;  %v1368_v63 = vld [vmem:[%s7442_s29 + $0x2c] sm:$0xf]  ;;  %v7287_v2 = vld [vmem:[%s7414_s20 + $0x30] sm:$0xff]   ;;  %v414_v4 = vld [vmem:[#allocation2 + $0x78] sm:$0x1] }
  0x1c   : > { %v7525_v5 = vld [vmem:[%s7435_s26 + $0x18] sm:$0xff]   ;;  %v1480_v6 = vor.u32 %v1478_v58, %v7511_v57  ;;  %v1483_v7 = vshrl.u32 %v1368_v63, 16  ;;  %v1424_v8 = vshrl.u32 %v1361_v0, 16  ;;  %v7532_v9 = vld [vmem:[%s7435_s26 + $0x20] sm:$0xff]   ;;  %v1447_v10 = vrot.slane %v7461_v29, 4  ;;  %v7572_v29 = vld [vmem:[%s7435_s26 + $0x30] sm:$0xff]  }
  0x1d   : > { %1667 = vrot.lane.b32.xlu0 %v1412_v28, %s7336_s11  ;;  %6815 = vmatmul.mubr.msk.bf16.gmra.mxu0 %vm612_vm1, %v7284_v39  ;;  %10925 = vst [vmem:[#allocation4_spill] sm:$0xff] %v7514_v61  ;;  %v1454_v11 = vor.u32 %v1452_v59, %v7514_v61  ;;  %v7537_v13 = vrot.slane %v1492_v1, 7  ;;  %v1495_v14 = vshll.u32 %v1369_v55, 16  ;;  %v1512_v15 = vshll.u32 %v1371_v60, 16  ;;  %v7288_v20 = vld [vmem:[%s7414_s20 + $0x38] sm:$0xff]   ;;  %v7567_v28 = vld [vmem:[%s7435_s26 + $0x28] sm:$0xff]  }
  0x1e   : > { %6818 = vmatprep.mubr.msk.bf16.mxu0 %vm612_vm1, %v7285_v43  ;;  %v1511_v19 = vrot.slane %v1509_v3, 7  ;;  %v415_v21 = vsel %vm7544_vm7, 0, %v414_v4  ;;  %v7552_v22 = vrot.slane %v1483_v7, 7  ;;  %v1486_v23 = vshll.u32 %v1368_v63, 16  ;;  %v1373_v26 = vld [vmem:[%s7442_s29 + $0x40] sm:$0xf] }
  0x1f   : > { %416 = vst [vmem:[#allocation2 + $0x78] sm:$0x1] %v415_v21  ;;  %v1455_v25 = vsel %vm7481_vm5, %v1447_v10, %v1454_v11  ;;  %v1497_v27 = vor.u32 %v1495_v14, %v7537_v13  ;;  %v1526_v31 = vshrl.u32 %v1373_v26, 16  ;;  %v1481_v32 = vrot.slane %v7511_v57, 4  ;;  %v7591_v43 = vld [vmem:[%s7435_s26 + $0x38] sm:$0xff]  }
  0x20   : > { %10928 = vst [vmem:[#allocation5_spill] sm:$0xff] %v7552_v22  ;;  %v1514_v30 = vor.u32 %v1512_v15, %v1511_v19  ;;  %v1488_v33 = vor.u32 %v1486_v23, %v7552_v22  ;;  %v1529_v39 = vshll.u32 %v1373_v26, 16  ;;  %v1515_v57 = vrot.slane %v1511_v19, 4  ;;  %v1379_v59 = vld [vmem:[%s7442_s29 + $0x58] sm:$0xf] }
  0x21   : > { %1679 = vrot.lane.b32.xlu0 %v1446_v37, %s7336_s11  ;;  %v1372_v37 = vld [vmem:[%s7442_s29 + $0x3c] sm:$0xf]  ;;  %v7584_v38 = vrot.slane %v1526_v31, 7  ;;  %v2361_v60 = vsel %vm2033_vm0, %v7506_v54, 0  ;;  %v1580_v3 = vshll.u32 %v1379_v59, 16  ;;  %vm5093_vm12 = vcmask 1046532  }
  0x22   : > { %6835 = vmatmul.mubr.msk.bf16.gmra.mxu1 %vm612_vm1, %v7270_v12  ;;  %v1427_v12 = vshll.u32 %v1361_v0, 16  ;;  %v1489_v41 = vsel %vm7481_vm5, %v1481_v32, %v1488_v33  ;;  %v1517_v42 = vshrl.u32 %v1372_v37, 16  ;;  %v1520_v50 = vshll.u32 %v1372_v37, 16  ;;  %v411_v4 = vld [vmem:[#allocation2 + $0x6c] sm:$0x1] }
  0x23   : > { %6838 = vmatprep.mubr.msk.bf16.mxu1 %vm612_vm1, %v7271_v16  ;;  %v7540_v16 = vrot.slane %v1424_v8, 7  ;;  %v1531_v45 = vor.u32 %v1529_v39, %v7584_v38  ;;  %v1577_v0 = vshrl.u32 %v1379_v59, 16  ;;  %v464_v8 = vld [vmem:[#allocation2 + $0x80] sm:$0x1]  ;;  %v420_v15 = vld [vmem:[#allocation2 + $0x90] sm:$0x1] }
  0x24   : > { %v465_v11 = vsel %vm7637_vm9, 0, %v464_v8  ;;  %v421_v19 = vsel %vm7544_vm7, 0, %v420_v15  ;;  %v470_v23 = vld [vmem:[#allocation2 + $0x98] sm:$0x1]  ;;  %v423_v31 = vld [vmem:[#allocation2 + $0x9c] sm:$0x1] }
  0x25   : > { %1669 = vrot.lane.b32.xlu0 %v1421_v49, %s7336_s11  ;;  %6819 = vmatmul.mubr.msk.bf16.gmra.mxu0 %vm612_vm1, %v7286_v62  ;;  %v1429_v24 = vor.u32 %v1427_v12, %v7540_v16  ;;  %v7599_v49 = vrot.slane %v1517_v42, 7  ;;  %466 = vst [vmem:[#allocation2 + $0x80] sm:$0x1] %v465_v11  ;;  %v461_v12 = vld [vmem:[#allocation2 + $0x74] sm:$0x1]  ;;  %v424_v32 = vsel %vm7544_vm7, 0, %v423_v31 }
  0x26   : > { %6822 = vmatprep.mubr.msk.bf16.mxu0 %vm612_vm1, %v7287_v2  ;;  %v7627_v2 = vrot.slane %v1577_v0, 7  ;;  %v462_v14 = vsel %vm7637_vm9, 0, %v461_v12  ;;  %422 = vst [vmem:[#allocation2 + $0x90] sm:$0x1] %v421_v19  ;;  %425 = vst [vmem:[#allocation2 + $0x9c] sm:$0x1] %v424_v32 }
  0x27   : > { %1673 = vrot.lane.b32.xlu1 %v1429_v24, %s7336_s11  ;;  %10929 = vst [vmem:[#allocation6_spill] sm:$0xff] %v7599_v49  ;;  %v1522_v58 = vor.u32 %v1520_v50, %v7599_v49  ;;  %463 = vst [vmem:[#allocation2 + $0x74] sm:$0x1] %v462_v14  ;;  %v471_v24 = vsel %vm7637_vm9, 0, %v470_v23  ;;  %v476_v33 = vld [vmem:[#allocation2 + $0xb0] sm:$0x1] }
  0x28   : > { %v1582_v10 = vor.u32 %v1580_v3, %v7627_v2  ;;  %472 = vst [vmem:[#allocation2 + $0x98] sm:$0x1] %v471_v24  ;;  %v473_v37 = vld [vmem:[#allocation2 + $0xa4] sm:$0x1]  ;;  %v429_v42 = vld [vmem:[#allocation2 + $0xb4] sm:$0x1] }
  0x29   : > { %1685 = vrot.lane.b32.xlu0 %v1463_v56, %s7336_s11  ;;  %v1523_v1 = vsel %vm7481_vm5, %v1515_v57, %v1522_v58  ;;  %v474_v39 = vsel %vm7637_vm9, 0, %v473_v37  ;;  %v479_v50 = vld [vmem:[#allocation2 + $0xbc] sm:$0x1]  ;;  %v390_v58 = vld [vmem:[#allocation2 + $0x18] sm:$0x1]  ;;  %v1498_v24 = vrot.slane %v7537_v13, 4 }
  0x2a   : > { %6839 = vmatmul.mubr.msk.bf16.gmra.mxu1 %vm612_vm1, %v7272_v34  ;;  %v1375_v34 = vld [vmem:[%s7442_s29 + $0x48] sm:$0xf]  ;;  %475 = vst [vmem:[#allocation2 + $0xa4] sm:$0x1] %v474_v39  ;;  %v440_v3 = vld [vmem:[#allocation2 + $0x20] sm:$0x1] }
  0x2b   : > { %6844 = vmatprep.mubr.msk.bf16.mxu1 %vm2008_vm3, %v7470_v36  ;;  %v1543_v40 = vshrl.u32 %v1375_v34, 16  ;;  %v1546_v48 = vshll.u32 %v1375_v34, 16  ;;  %v477_v34 = vsel %vm7637_vm9, 0, %v476_v33  ;;  %v1370_v12 = vld [vmem:[%s7442_s29 + $0x34] sm:$0xf]  ;;  %v1532_v13 = vrot.slane %v7584_v38, 4 }
  0x2c   : > { %478 = vst [vmem:[#allocation2 + $0xb0] sm:$0x1] %v477_v34  ;;  %v1500_v15 = vshrl.u32 %v1370_v12, 16  ;;  %v1374_v23 = vld [vmem:[%s7442_s29 + $0x44] sm:$0xf] }
  0x2d   : > { %1691 = vrot.lane.b32.xlu0 %v1480_v6, %s7336_s11  ;;  %6823 = vmatmul.mubr.msk.bf16.gmra.mxu0 %vm612_vm1, %v7288_v20  ;;  %v7597_v46 = vrot.slane %v1543_v40, 7  ;;  %v412_v6 = vsel %vm7544_vm7, 0, %v411_v4  ;;  %v417_v20 = vld [vmem:[#allocation2 + $0x84] sm:$0x1]  ;;  %v432_v40 = vld [vmem:[#allocation2 + $0xc0] sm:$0x1] }
  0x2e   : > { %6880 = vmatprep.mubr.msk.bf16.mxu0 %vm2008_vm3, %v7470_v36  ;;  %413 = vst [vmem:[#allocation2 + $0x6c] sm:$0x1] %v412_v6  ;;  %v418_v21 = vsel %vm7544_vm7, 0, %v417_v20  ;;  %v441_v6 = vsel %vm7637_vm9, 0, %v440_v3  ;;  %v7730_v20 = vrot.slane %v1500_v15, 7  ;;  %v1537_v31 = vshll.u32 %v1374_v23, 16 }
  0x2f   : > { %v1548_v55 = vor.u32 %v1546_v48, %v7597_v46  ;;  %419 = vst [vmem:[#allocation2 + $0x84] sm:$0x1] %v418_v21  ;;  %442 = vst [vmem:[#allocation2 + $0x20] sm:$0x1] %v441_v6  ;;  %v1503_v21 = vshll.u32 %v1370_v12, 16 }
  0x30   : > { %10935 = vst [vmem:[#allocation10_spill] sm:$0xff] %v7730_v20  ;;  %v396_v34 = vld [vmem:[#allocation2 + $0x30] sm:$0x1]  ;;  %v1376_v6 = vld [vmem:[%s7442_s29 + $0x4c] sm:$0xf] }
  0x31   : > { %1681 = vrot.lane.b32.xlu0 %v1455_v25, %s7336_s11  ;;  %v467_v25 = vld [vmem:[#allocation2 + $0x8c] sm:$0x1]  ;;  %v397_v39 = vsel %vm7544_vm7, 0, %v396_v34  ;;  %v1554_v12 = vshll.u32 %v1376_v6, 16 }
  0x32   : > { %6845 = vmatmul.mubr.msk.bf16.vlgmr.msra.gmra.mxu1 %vm2008_vm3, %v7496_v51  ;;  %v468_v26 = vsel %vm7637_vm9, 0, %v467_v25  ;;  %v1534_v25 = vshrl.u32 %v1374_v23, 16  ;;  %398 = vst [vmem:[#allocation2 + $0x30] sm:$0x1] %v397_v39  ;;  %v7801_v23 = vld [vmem:[%s10832_s4] ss:$0 sm:$0xff] }
  0x33   : > { %6861 = vmatpush3.bf16.msra.mxu1 %v2137_v52  ;;  %6848 = vmatprep.mubr.msk.bf16.mxu1 %vm2008_vm3, %v7501_v53  ;;  %v1377_v52 = vld [vmem:[%s7442_s29 + $0x50] sm:$0xf]  ;;  %469 = vst [vmem:[#allocation2 + $0x8c] sm:$0x1] %v468_v26  ;;  %v437_v26 = vld [vmem:[#allocation2 + $0x14] sm:$0x1] }
  0x34   : > { %7243 = vmatprep.subr.msk.bf16.mxu1 %vm2033_vm0, %v7506_v54  ;;  %v1560_v56 = vshrl.u32 %v1377_v52, 16  ;;  %v1563_v63 = vshll.u32 %v1377_v52, 16  ;;  %v480_v52 = vsel %vm7637_vm9, 0, %v479_v50  ;;  %v438_v33 = vsel %vm7637_vm9, 0, %v437_v26 }
  0x35   : > { %1697 = vrot.lane.b32.xlu0 %v1497_v27, %s7336_s11  ;;  %6881 = vmatmul.mubr.msk.bf16.vlgmr.msra.gmra.mxu0 %vm2008_vm3, %v7496_v51  ;;  %v426_v27 = vld [vmem:[#allocation2 + $0xa8] sm:$0x1]  ;;  %481 = vst [vmem:[#allocation2 + $0xbc] sm:$0x1] %v480_v52  ;;  %439 = vst [vmem:[#allocation2 + $0x14] sm:$0x1] %v438_v33 }
  0x36   : > { %6884 = vmatprep.mubr.msk.bf16.mxu0 %vm2008_vm3, %v7501_v53  ;;  %v7617_v62 = vrot.slane %v1560_v56, 7  ;;  %v1396_v56 = vrot.slane %v7449_v17, 4  ;;  %v402_v52 = vld [vmem:[#allocation2 + $0x48] sm:$0x1] }
  0x38   : > { %v1565_v54 = vor.u32 %v1563_v63, %v7617_v62 }
  0x39   : > { %1703 = vrot.lane.b32.xlu0 %v1514_v30, %s7336_s11  ;;  %v427_v30 = vsel %vm7544_vm7, 0, %v426_v27 }
  0x3a   : > { %6849 = vmatmul.mubr.msk.bf16.gmra.mxu1 %vm2008_vm3, %v7525_v5  ;;  %428 = vst [vmem:[#allocation2 + $0xa8] sm:$0x1] %v427_v30  ;;  %v7738_v30 = vrot.slane %v1534_v25, 7 }
  0x3b   : > { %6852 = vmatprep.mubr.msk.bf16.mxu1 %vm2008_vm3, %v7532_v9 }
  0x3c   : > { %10936 = vst [vmem:[#allocation11_spill] sm:$0xff] %v7738_v30  ;;  %v1539_v37 = vor.u32 %v1537_v31, %v7738_v30 }
  0x3d   : > { %1693 = vrot.lane.b32.xlu0 %v1489_v41, %s7336_s11  ;;  %6885 = vmatmul.mubr.msk.bf16.gmra.mxu0 %vm2008_vm3, %v7525_v5  ;;  %v433_v41 = vsel %vm7544_vm7, 0, %v432_v40  ;;  %v393_v40 = vld [vmem:[#allocation2 + $0x24] sm:$0x1] }
  0x3e   : > { %6888 = vmatprep.mubr.msk.bf16.mxu0 %vm2008_vm3, %v7532_v9  ;;  %434 = vst [vmem:[#allocation2 + $0xc0] sm:$0x1] %v433_v41  ;;  %v1540_v41 = vsel %vm7481_vm5, %v1532_v13, %v1539_v37 }
  0x41   : > { %1709 = vrot.lane.b32.xlu0 %v1531_v45, %s7336_s11  ;;  %v430_v45 = vsel %vm7544_vm7, 0, %v429_v42  ;;  %v394_v42 = vsel %vm7544_vm7, 0, %v393_v40 }
  0x42   : > { %6853 = vmatmul.mubr.msk.bf16.gmra.mxu1 %vm2008_vm3, %v7567_v28  ;;  %431 = vst [vmem:[#allocation2 + $0xb4] sm:$0x1] %v430_v45  ;;  %395 = vst [vmem:[#allocation2 + $0x24] sm:$0x1] %v394_v42 }
  0x43   : > { %6856 = vmatprep.mubr.msk.bf16.mxu1 %vm2008_vm3, %v7572_v29 }
  0x45   : > { %1715 = vrot.lane.b32.xlu0 %v1548_v55, %s7336_s11  ;;  %6889 = vmatmul.mubr.msk.bf16.gmra.mxu0 %vm2008_vm3, %v7567_v28 }
  0x46   : > { %6892 = vmatprep.mubr.msk.bf16.mxu0 %vm2008_vm3, %v7572_v29 }
  0x49   : > { %1705 = vrot.lane.b32.xlu0 %v1523_v1, %s7336_s11  ;;  %v1366_v1 = vld [vmem:[%s7442_s29 + $0x24] sm:$0xf] }
  0x4a   : > { %6857 = vmatmul.mubr.msk.bf16.gmra.mxu1 %vm2008_vm3, %v7591_v43  ;;  %v1469_v4 = vshll.u32 %v1366_v1, 16 }
  0x4b   : > { %6862 = vmatprep.mubr.msk.bf16.mxu1 %vm2008_vm3, %v7470_v36 }
  0x4d   : > { %1721 = vrot.lane.b32.xlu0 %v1565_v54, %s7336_s11  ;;  %6893 = vmatmul.mubr.msk.bf16.gmra.mxu0 %vm2008_vm3, %v7591_v43 }
  0x51   : > { %1727 = vrot.lane.b32.xlu0 %v1582_v10, %s7336_s11  ;;  %v1464_v10 = vrot.slane %v7489_v47, 4  ;;  %v1505_v47 = vor.u32 %v1503_v21, %v7730_v20 }
  0x52   : > { %6863 = vmatmul.mubr.msk.bf16.vlgmr.msra.gmra.mxu1 %vm2008_vm3, %v7496_v51 }
  0x53   : > { %6897 = vmatpush3.bf16.msra.mxu1 %v2361_v60  ;;  %6866 = vmatprep.mubr.msk.bf16.mxu1 %vm2008_vm3, %v7501_v53  ;;  %v1430_v60 = vrot.slane %v7540_v16, 4  ;;  %v1466_v16 = vshrl.u32 %v1366_v1, 16  ;;  %v1506_v27 = vsel %vm7481_vm5, %v1498_v24, %v1505_v47 }
  0x55   : > { %v7723_v11 = vrot.slane %v1466_v16, 7 }
  0x57   : > { %10934 = vst [vmem:[#allocation9_spill] sm:$0xff] %v7723_v11  ;;  %v1471_v14 = vor.u32 %v1469_v4, %v7723_v11 }
  0x59   : > { %v1472_v19 = vsel %vm7481_vm5, %v1464_v10, %v1471_v14  ;;  %v1549_v14 = vrot.slane %v7597_v46, 4 }
  0x5a   : > { %6867 = vmatmul.mubr.msk.bf16.gmra.mxu1 %vm2008_vm3, %v7525_v5 }
  0x5b   : > { %6870 = vmatprep.mubr.msk.bf16.mxu1 %vm2008_vm3, %v7532_v9 }
  0x62   : > { %6871 = vmatmul.mubr.msk.bf16.gmra.mxu1 %vm2008_vm3, %v7567_v28 }
  0x63   : > { %6874 = vmatprep.mubr.msk.bf16.mxu1 %vm2008_vm3, %v7572_v29 }
  0x6a   : > { %6875 = vmatmul.mubr.msk.bf16.gmra.mxu1 %vm2008_vm3, %v7591_v43 }
  0x6b   : > { %6898 = vmatprep.mubr.msk.bf16.mxu1 %vm2008_vm3, %v7470_v36  ;;  %v482_v36 = vld [vmem:[#allocation2 + $0xc8] sm:$0x1] }
  0x6c   : > { %v483_v48 = vsel %vm7637_vm9, 0, %v482_v36  ;;  %v446_v36 = vld [vmem:[#allocation2 + $0x38] sm:$0x1] }
  0x6d   : > { %484 = vst [vmem:[#allocation2 + $0xc8] sm:$0x1] %v483_v48  ;;  %v447_v38 = vsel %vm7637_vm9, 0, %v446_v36  ;;  %v443_v48 = vld [vmem:[#allocation2 + $0x2c] sm:$0x1] }
  0x6e   : > { %448 = vst [vmem:[#allocation2 + $0x38] sm:$0x1] %v447_v38  ;;  %v444_v50 = vsel %vm7637_vm9, 0, %v443_v48  ;;  %v1308_v48 = vld [vmem:[#allocation2 + $0x78] sm:$0xf] }
  0x6f   : > { %445 = vst [vmem:[#allocation2 + $0x2c] sm:$0x1] %v444_v50 }
  0x72   : > { %6899 = vmatmul.mubr.msk.bf16.vlgmr.msra.gmra.mxu1 %vm2008_vm3, %v7496_v51  ;;  %v1358_v51 = vld [vmem:[%s7442_s29 + $0x4] sm:$0xf] }
  0x73   : > { %6902 = vmatprep.mubr.msk.bf16.mxu1 %vm2008_vm3, %v7501_v53  ;;  %v1398_v53 = vshrl.u32 %v1358_v51, 16  ;;  %v1401_v55 = vshll.u32 %v1358_v51, 16  ;;  %v403_v51 = vsel %vm7544_vm7, 0, %v402_v52 }
  0x74   : > { %404 = vst [vmem:[#allocation2 + $0x48] sm:$0x1] %v403_v51 }
  0x75   : > { %v7702_v57 = vrot.slane %v1398_v53, 7  ;;  %v399_v53 = vld [vmem:[#allocation2 + $0x3c] sm:$0x1] }
  0x77   : > { %10932 = vst [vmem:[#allocation7_spill] sm:$0xff] %v7702_v57 }
  0x7a   : > { %6903 = vmatmul.mubr.msk.bf16.gmra.mxu1 %vm2008_vm3, %v7525_v5  ;;  %v1362_v5 = vld [vmem:[%s7442_s29 + $0x14] sm:$0xf] }
  0x7b   : > { %6906 = vmatprep.mubr.msk.bf16.mxu1 %vm2008_vm3, %v7532_v9  ;;  %v1403_v9 = vor.u32 %v1401_v55, %v7702_v57  ;;  %v1432_v59 = vshrl.u32 %v1362_v5, 16 }
  0x7d   : > { %v1404_v17 = vsel %vm7481_vm5, %v1396_v56, %v1403_v9  ;;  %v7711_v63 = vrot.slane %v1432_v59, 7  ;;  %v400_v56 = vsel %vm7544_vm7, 0, %v399_v53 }
  0x7e   : > { %1663 = vrot.lane.b32.xlu1 %v1404_v17, %s7336_s11  ;;  %401 = vst [vmem:[#allocation2 + $0x3c] sm:$0x1] %v400_v56  ;;  %v405_v17 = vld [vmem:[#allocation2 + $0x54] sm:$0x1] }
  0x7f   : > { %10933 = vst [vmem:[#allocation8_spill] sm:$0xff] %v7711_v63 }
  0x82   : > { %6907 = vmatmul.mubr.msk.bf16.gmra.mxu1 %vm2008_vm3, %v7567_v28  ;;  %v1435_v28 = vshll.u32 %v1362_v5, 16  ;;  %v452_v5 = vld [vmem:[#allocation2 + $0x50] sm:$0x1] }
  0x83   : > { %6910 = vmatprep.mubr.msk.bf16.mxu1 %vm2008_vm3, %v7572_v29  ;;  %v391_v29 = vsel %vm7544_vm7, 0, %v390_v58  ;;  %v453_v9 = vsel %vm7637_vm9, 0, %v452_v5  ;;  %v449_v58 = vld [vmem:[#allocation2 + $0x44] sm:$0x1] }
  0x84   : > { %392 = vst [vmem:[#allocation2 + $0x18] sm:$0x1] %v391_v29  ;;  %v1437_v54 = vor.u32 %v1435_v28, %v7711_v63  ;;  %454 = vst [vmem:[#allocation2 + $0x50] sm:$0x1] %v453_v9  ;;  %v450_v59 = vsel %vm7637_vm9, 0, %v449_v58 }
  0x85   : > { %451 = vst [vmem:[#allocation2 + $0x44] sm:$0x1] %v450_v59  ;;  %v408_v28 = vld [vmem:[#allocation2 + $0x60] sm:$0x1]  ;;  %v1301_v9 = vld [vmem:[#allocation2 + $0x6c] sm:$0xf] }
  0x86   : > { %v1438_v8 = vsel %vm7481_vm5, %v1430_v60, %v1437_v54  ;;  %v409_v60 = vsel %vm7544_vm7, 0, %v408_v28  ;;  %v455_v54 = vld [vmem:[#allocation2 + $0x5c] sm:$0x1] }
  0x87   : > { %1675 = vrot.lane.b32.xlu1 %v1438_v8, %s7336_s11  ;;  %410 = vst [vmem:[#allocation2 + $0x60] sm:$0x1] %v409_v60  ;;  %v456_v16 = vsel %vm7637_vm9, 0, %v455_v54  ;;  %v1551_v8 = vshrl.u32 %v1376_v6, 16 }
  0x88   : > { %457 = vst [vmem:[#allocation2 + $0x5c] sm:$0x1] %v456_v16  ;;  %v1312_v16 = vld [vmem:[#allocation2 + $0x80] sm:$0x1] }
  0x89   : > { %v7787_v18 = vrot.slane %v1551_v8, 7 }
  0x8a   : > { %6911 = vmatmul.mubr.msk.bf16.gmra.mxu1 %vm2008_vm3, %v7591_v43  ;;  %v387_v43 = vld [vmem:[#allocation2 + $0xc] sm:$0x1]  ;;  %vm3343_vm3 = vcmask 1043456  }
  0x8b   : > { %v388_v0 = vsel %vm7544_vm7, 0, %v387_v43  ;;  %1687 = vrot.lane.b32.xlu1 %v1472_v19, %s7336_s11  ;;  %v7740_v32 = vpop.permute.xlu0 %1661  ;;  %v406_v43 = vsel %vm7544_vm7, 0, %v405_v17  ;;  %10943 = vst [vmem:[#allocation18_spill] sm:$0xff] %v7787_v18  ;;  %v1556_v15 = vor.u32 %v1554_v12, %v7787_v18  ;;  %v1340_v18 = vld [vmem:[#allocation2 + $0xb0] sm:$0x1] }
  0x8c   : > { %389 = vst [vmem:[#allocation2 + $0xc] sm:$0x1] %v388_v0  ;;  %407 = vst [vmem:[#allocation2 + $0x54] sm:$0x1] %v406_v43  ;;  %v458_v0 = vld [vmem:[#allocation2 + $0x68] sm:$0x1] }
  0x8d   : > { %v459_v1 = vsel %vm7637_vm9, 0, %v458_v0  ;;  %v1557_v19 = vsel %vm7481_vm5, %v1549_v14, %v1556_v15  ;;  %vm3907_vm9 = vsmask.f32 7440 }
  0x8e   : > { %460 = vst [vmem:[#allocation2 + $0x68] sm:$0x1] %v459_v1  ;;  %1717 = vrot.lane.b32.xlu0 %v1557_v19, %s7336_s11 }
  0x8f   : > { %1699 = vrot.lane.b32.xlu1 %v1506_v27, %s7336_s11  ;;  %v7754_v45 = vpop.permute.xlu0 %1667 }
  0x90   : > { %10937 = vst [vmem:[#allocation12_spill] sm:$0xff] %v7754_v45  ;;  %v8029_v45 = vld [vmem:[%s7442_s29 + $0x60] sm:$0xf] }
  0x93   : > { %1711 = vrot.lane.b32.xlu1 %v1540_v41, %s7336_s11  ;;  %v7762_v55 = vpop.permute.xlu0 %1679 }
  0x94   : > { %10938 = vst [vmem:[#allocation13_spill] sm:$0xff] %v7762_v55 }
  0x97   : > { %v7770_v29 = vpop.permute.xlu0 %1669 }
  0x98   : > { %10939 = vst [vmem:[#allocation14_spill] sm:$0xff] %v7770_v29 }
  0x9b   : > { %v7778_v3 = vpop.permute.xlu0 %1685 }
  0x9c   : > { %10940 = vst [vmem:[#allocation15_spill] sm:$0xff] %v7778_v3 }
  0x9f   : > { %v7782_v4 = vpop.permute.xlu0 %1691 }
  0xa0   : > { %10941 = vst [vmem:[#allocation16_spill] sm:$0xff] %v7782_v4  ;;  %v1266_v4 = vld [vmem:[#allocation2 + $0x30] sm:$0xf] }
  0xa3   : > { %v7785_v10 = vpop.permute.xlu0 %1681 }
  0xa4   : > { %10942 = vst [vmem:[#allocation17_spill] sm:$0xff] %v7785_v10 }
  0xa7   : > { %v7794_v7 = vpop.permute.xlu0 %1697 }
  0xa8   : > { %10944 = vst [vmem:[#allocation19_spill] sm:$0xff] %v7794_v7 }
  0xab   : > { %v7796_v21 = vpop.permute.xlu0 %1703 }
  0xac   : > { %10945 = vst [vmem:[#allocation20_spill] sm:$0xff] %v7796_v21 }
  0xaf   : > { %v7803_v24 = vpop.permute.xlu0 %1693 }
  0xb0   : > { %10946 = vst [vmem:[#allocation21_spill] sm:$0xff] %v7803_v24  ;;  %v1354_v24 = vld [vmem:[#allocation2 + $0xc8] sm:$0x1] }
  0xb3   : > { %v7808_v37 = vpop.permute.xlu0 %1709 }
  0xb7   : > { %v1716_v1 = vpop.permute.xlu0 %1715 }
  0xd2   : > { %v6828_v47 = vpop.f32.mrf.mxu1 }
  0xd3   : > { %v768_v46 = vadd.f32 %v6828_v47, %v7801_v23 }
  0xd4   : > { %v759_v25 = vpop.f32.mrf.mxu1 }
  0xd5   : > { %v6547_v26 = vpack.c.bf16 %v768_v46, %v768_v46  ;;  %v760_v27 = vadd.f32 %v7801_v23, %v759_v25 }
  0xd6   : > { %v6829_v31 = vpop.f32.mrf.mxu1 }
  0xd7   : > { %v1074_v33 = vshrl.u32 %v6547_v26, 16  ;;  %v6545_v34 = vpack.c.bf16 %v760_v27, %v760_v27  ;;  %v771_v13 = vadd.f32 %v6829_v31, %v7801_v23  ;;  %v1077_v41 = vshll.u32 %v6547_v26, 16 }
  0xd8   : > { %v762_v39 = vpop.f32.mrf.mxu1 }
  0xd9   : > { %v7810_v40 = vrot.slane %v1074_v33, 7  ;;  %v1057_v42 = vshrl.u32 %v6545_v34, 16  ;;  %v6548_v36 = vpack.c.bf16 %v771_v13, %v771_v13  ;;  %v763_v50 = vadd.f32 %v7801_v23, %v762_v39  ;;  %v1305_v13 = vld [vmem:[#allocation2 + $0x74] sm:$0x1] }
  0xda   : > { %v6832_v52 = vpop.f32.mrf.mxu1  ;;  %v1060_v56 = vshll.u32 %v6545_v34, 16 }
  0xdb   : > { %v1079_v51 = vor.u32 %v1077_v41, %v7810_v40  ;;  %v7820_v53 = vrot.slane %v1057_v42, 7  ;;  %v1082_v5 = vshrl.u32 %v6548_v36, 16  ;;  %v6546_v58 = vpack.c.bf16 %v763_v50, %v763_v50 }
  0xdc   : > { %v784_v59 = vadd.f32 %v6832_v52, %v7801_v23  ;;  %v775_v28 = vpop.f32.mrf.mxu1  ;;  %v1085_v0 = vshll.u32 %v6548_v36, 16 }
  0xdd   : > { %v1309_v60 = vsel %vm7814_vm11, %v1079_v51, %v1308_v48  ;;  %v1062_v17 = vor.u32 %v1060_v56, %v7820_v53  ;;  %v1084_v43 = vrot.slane %v1082_v5, 7  ;;  %v1065_v6 = vshrl.u32 %v6546_v58, 16  ;;  %v1322_v56 = vld [vmem:[#allocation2 + $0x90] sm:$0xf] }
  0xde   : > { %1310 = vst [vmem:[#allocation2 + $0x78] sm:$0xf] %v1309_v60  ;;  %v6551_v8 = vpack.c.bf16 %v784_v59, %v784_v59  ;;  %v776_v12 = vadd.f32 %v7801_v23, %v775_v28  ;;  %v6833_v14 = vpop.f32.mrf.mxu1  ;;  %v1068_v26 = vshll.u32 %v6546_v58, 16  ;;  %v7851_v59 = vpop.permute.xlu0 %1705 }
  0xdf   : > { %v1302_v15 = vsel %vm7814_vm11, %v1062_v17, %v1301_v9  ;;  %v7835_v19 = vor.u32 %v1085_v0, %v1084_v43  ;;  %v1089_v47 = vrot.slane %v1084_v43, 4  ;;  %v787_v46 = vadd.f32 %v6833_v14, %v7801_v23  ;;  %10954 = vst [vmem:[#allocation23_spill] sm:$0xff] %v7851_v59  ;;  %v1315_v0 = vld [vmem:[#allocation2 + $0x84] sm:$0xf] }
  0xe0   : > { %1303 = vst [vmem:[#allocation2 + $0x6c] sm:$0xf] %v1302_v15  ;;  %v1067_v25 = vrot.slane %v1065_v6, 7  ;;  %v1108_v27 = vshrl.u32 %v6551_v8, 16  ;;  %v6549_v31 = vpack.c.bf16 %v776_v12, %v776_v12  ;;  %v778_v33 = vpop.f32.mrf.mxu1  ;;  %v1111_v39 = vshll.u32 %v6551_v8, 16  ;;  %v6812_v6 = vpop.f32.mrf.mxu0 }
  0xe1   : > { %10951 = vst [vmem:[#allocation22_spill] sm:$0xff] %v7835_v19  ;;  %v1313_v34 = vsel %vm7828_vm13, %v1089_v47, %v1312_v16  ;;  %v6552_v41 = vpack.c.bf16 %v787_v46, %v787_v46  ;;  %v779_v42 = vadd.f32 %v7801_v23, %v778_v33  ;;  %v1284_v19 = vld [vmem:[#allocation2 + $0x50] sm:$0x1] }
  0xe2   : > { %1314 = vst [vmem:[#allocation2 + $0x80] sm:$0x1] %v1313_v34  ;;  %v7841_v36 = vor.u32 %v1068_v26, %v1067_v25  ;;  %v1072_v48 = vrot.slane %v1067_v25, 4  ;;  %v7843_v50 = vrot.slane %v1108_v27, 7  ;;  %v1091_v52 = vshrl.u32 %v6549_v31, 16  ;;  %v6836_v51 = vpop.f32.mrf.mxu1  ;;  %v7864_v34 = vpop.f32.mrf.mxu0 }
  0xe3   : > { %v1116_v9 = vshrl.u32 %v6552_v41, 16  ;;  %v6550_v58 = vpack.c.bf16 %v779_v42, %v779_v42  ;;  %v1094_v43 = vshll.u32 %v6549_v31, 16  ;;  %v1119_v12 = vshll.u32 %v6552_v41, 16  ;;  %v1326_v26 = vld [vmem:[#allocation2 + $0x98] sm:$0x1] }
  0xe4   : > { %v1306_v28 = vsel %vm7828_vm13, %v1072_v48, %v1305_v13  ;;  %v1113_v60 = vor.u32 %v1111_v39, %v7843_v50  ;;  %v7856_v17 = vrot.slane %v1091_v52, 7  ;;  %v791_v16 = vpop.f32.mrf.mxu1  ;;  %v800_v47 = vadd.f32 %v6836_v51, %v7801_v23 }
  0xe5   : > { %1307 = vst [vmem:[#allocation2 + $0x74] sm:$0x1] %v1306_v28  ;;  %v1118_v8 = vrot.slane %v1116_v9, 7  ;;  %v1099_v14 = vshrl.u32 %v6550_v58, 16  ;;  %v1873_v15 = vld [vmem:[#allocation2 + $0x78] sm:$0xf]  ;;  %v7875_v28 = vpop.f32.mrf.mxu0 }
  0xe6   : > { %10955 = vst [vmem:[#allocation24_spill] sm:$0xff] %v7856_v17  ;;  %v1323_v46 = vsel %vm7814_vm11, %v1113_v60, %v1322_v56  ;;  %v1096_v25 = vor.u32 %v1094_v43, %v7856_v17  ;;  %v1102_v27 = vshll.u32 %v6550_v58, 16  ;;  %v1874_v31 = vsel %vm7847_vm15, %v1716_v1, %v1873_v15  ;;  %v6837_v33 = vpop.f32.mrf.mxu1  ;;  %v1319_v56 = vld [vmem:[#allocation2 + $0x8c] sm:$0x1] }
  0xe7   : > { %1324 = vst [vmem:[#allocation2 + $0x90] sm:$0xf] %v1323_v46  ;;  %v1866_v13 = vld [vmem:[#allocation2 + $0x6c] sm:$0xf]  ;;  %v7866_v39 = vor.u32 %v1119_v12, %v1118_v8  ;;  %v1123_v41 = vrot.slane %v1118_v8, 4  ;;  %v1101_v42 = vrot.slane %v1099_v14, 7  ;;  %v6555_v48 = vpack.c.bf16 %v800_v47, %v800_v47  ;;  %v1722_v12 = vpop.permute.xlu0 %1721  ;;  %v7882_v46 = vpop.f32.mrf.mxu0 }
  0xe8   : > { %1875 = vst [vmem:[#allocation2 + $0x78] sm:$0xf] %v1874_v31  ;;  %v1316_v52 = vsel %vm7814_vm11, %v1096_v25, %v1315_v0  ;;  %v1867_v51 = vsel %vm7847_vm15, %v7808_v37, %v1866_v13  ;;  %v792_v1 = vadd.f32 %v7801_v23, %v791_v16  ;;  %v803_v9 = vadd.f32 %v6837_v33, %v7801_v23  ;;  %v794_v58 = vpop.f32.mrf.mxu1  ;;  %v1336_v33 = vld [vmem:[#allocation2 + $0xa8] sm:$0xf] }
  0xe9   : > { %10956 = vst [vmem:[#allocation25_spill] sm:$0xff] %v7866_v39  ;;  %1317 = vst [vmem:[#allocation2 + $0x84] sm:$0xf] %v1316_v52  ;;  %v1327_v60 = vsel %vm7828_vm13, %v1123_v41, %v1326_v26  ;;  %v7879_v43 = vor.u32 %v1102_v27, %v1101_v42  ;;  %v1106_v0 = vrot.slane %v1101_v42, 4  ;;  %v1142_v8 = vshrl.u32 %v6555_v48, 16 }
  0xea   : > { %1868 = vst [vmem:[#allocation2 + $0x6c] sm:$0xf] %v1867_v51  ;;  %1328 = vst [vmem:[#allocation2 + $0x98] sm:$0x1] %v1327_v60  ;;  %v1145_v37 = vshll.u32 %v6555_v48, 16  ;;  %v6553_v14 = vpack.c.bf16 %v792_v1, %v792_v1  ;;  %v6556_v15 = vpack.c.bf16 %v803_v9, %v803_v9  ;;  %v795_v16 = vadd.f32 %v7801_v23, %v794_v58  ;;  %v6840_v47 = vpop.f32.mrf.mxu1  ;;  %v7890_v48 = vpop.f32.mrf.mxu0 }
  0xeb   : > { %10957 = vst [vmem:[#allocation26_spill] sm:$0xff] %v7879_v43  ;;  %v1320_v25 = vsel %vm7828_vm13, %v1106_v0, %v1319_v56  ;;  %v7886_v31 = vrot.slane %v1142_v8, 7  ;;  %v816_v26 = vadd.f32 %v6840_v47, %v7801_v23  ;;  %v704_v27 = vadd.f32 %v6812_v6, %v7801_v23  ;;  %v1329_v56 = vld [vmem:[#allocation2 + $0x9c] sm:$0xf] }
  0xec   : > { %1321 = vst [vmem:[#allocation2 + $0x8c] sm:$0x1] %v1320_v25  ;;  %v1125_v13 = vshrl.u32 %v6553_v14, 16  ;;  %v1150_v41 = vshrl.u32 %v6556_v15, 16  ;;  %v807_v42 = vpop.f32.mrf.mxu1  ;;  %v1128_v51 = vshll.u32 %v6553_v14, 16  ;;  %v6554_v1 = vpack.c.bf16 %v795_v16, %v795_v16  ;;  %v7896_v47 = vpop.f32.mrf.mxu0 }
  0xed   : > { %10958 = vst [vmem:[#allocation27_spill] sm:$0xff] %v7886_v31  ;;  %v1147_v52 = vor.u32 %v1145_v37, %v7886_v31  ;;  %v6559_v9 = vpack.c.bf16 %v816_v26, %v816_v26  ;;  %v1153_v0 = vshll.u32 %v6556_v15, 16  ;;  %v808_v8 = vadd.f32 %v7801_v23, %v807_v42  ;;  %v1728_v37 = vpop.permute.xlu0 %1727  ;;  %v1294_v31 = vld [vmem:[#allocation2 + $0x60] sm:$0xf] }
  0xee   : > { %v7893_v58 = vrot.slane %v1125_v13, 7  ;;  %v1152_v60 = vrot.slane %v1150_v41, 7  ;;  %v6841_v6 = vpop.f32.mrf.mxu1  ;;  %v1133_v30 = vshrl.u32 %v6554_v1, 16  ;;  %v1887_v14 = vld [vmem:[#allocation2 + $0x90] sm:$0xf]  ;;  %v6531_v16 = vpack.c.bf16 %v704_v27, %v704_v27  ;;  %v7903_v22 = vpop.f32.mrf.mxu0 }
  0xef   : > { %v1337_v25 = vsel %vm7814_vm11, %v1147_v52, %v1336_v33  ;;  %v1176_v49 = vshrl.u32 %v6559_v9, 16  ;;  %v1136_v41 = vshll.u32 %v6554_v1, 16  ;;  %v1179_v35 = vshll.u32 %v6559_v9, 16  ;;  %v1350_v1 = vld [vmem:[#allocation2 + $0xc0] sm:$0xf] }
  0xf0   : > { %10959 = vst [vmem:[#allocation28_spill] sm:$0xff] %v7893_v58  ;;  %1338 = vst [vmem:[#allocation2 + $0xa8] sm:$0xf] %v1337_v25  ;;  %v1130_v26 = vor.u32 %v1128_v51, %v7893_v58  ;;  %v7901_v13 = vor.u32 %v1153_v0, %v1152_v60  ;;  %v1157_v15 = vrot.slane %v1152_v60, 4  ;;  %v1880_v42 = vld [vmem:[#allocation2 + $0x84] sm:$0xf]  ;;  %v810_v20 = vpop.f32.mrf.mxu1  ;;  %v6557_v60 = vpack.c.bf16 %v808_v8, %v808_v8  ;;  %v7917_v61 = vpop.f32.mrf.mxu0 }
  0xf1   : > { %v1135_v11 = vrot.slane %v1133_v30, 7  ;;  %v1881_v33 = vsel %vm7847_vm15, %v1722_v12, %v1880_v42  ;;  %v7907_v52 = vrot.slane %v1176_v49, 7  ;;  %v1333_v0 = vld [vmem:[#allocation2 + $0xa4] sm:$0x1]  ;;  %v1888_v25 = vsel %vm7847_vm15, %v1728_v37, %v1887_v14 }
  0xf2   : > { %10960 = vst [vmem:[#allocation29_spill] sm:$0xff] %v7901_v13  ;;  %v1330_v27 = vsel %vm7814_vm11, %v1130_v26, %v1329_v56  ;;  %v1341_v51 = vsel %vm7828_vm13, %v1157_v15, %v1340_v18  ;;  %1882 = vst [vmem:[#allocation2 + $0x84] sm:$0xf] %v1881_v33  ;;  %v7915_v30 = vpop.f32.mrf.mxu1  ;;  %v1938_v18 = vlaneseq  ;;  %v1159_v56 = vshrl.u32 %v6557_v60, 16 }
  0xf3   : > { %10961 = vst [vmem:[#allocation30_spill] sm:$0xff] %v7907_v52  ;;  %1331 = vst [vmem:[#allocation2 + $0x9c] sm:$0xf] %v1330_v27  ;;  %v7919_v49 = vor.u32 %v1136_v41, %v1135_v11  ;;  %v1140_v12 = vrot.slane %v1135_v11, 4  ;;  %v1181_v9 = vor.u32 %v1179_v35, %v7907_v52  ;;  %v1162_v26 = vshll.u32 %v6557_v60, 16 }
  0xf4   : > { %1342 = vst [vmem:[#allocation2 + $0xb0] sm:$0x1] %v1341_v51  ;;  %1889 = vst [vmem:[#allocation2 + $0x90] sm:$0xf] %v1888_v25  ;;  %v819_v8 = vadd.f32 %v6841_v6, %v7801_v23  ;;  %v811_v15 = vadd.f32 %v7801_v23, %v810_v20  ;;  %v7924_v37 = vpop.f32.mrf.mxu1  ;;  %v938_v42 = vshrl.u32 %v6531_v16, 16  ;;  %v941_v11 = vshll.u32 %v6531_v16, 16  ;;  %v7936_v6 = vpop.f32.mrf.mxu0 }
  0xf5   : > { %10962 = vst [vmem:[#allocation31_spill] sm:$0xff] %v7919_v49  ;;  %v1334_v14 = vsel %vm7828_vm13, %v1140_v12, %v1333_v0  ;;  %v1351_v41 = vsel %vm7814_vm11, %v1181_v9, %v1350_v1  ;;  %v7930_v35 = vrot.slane %v1159_v56, 7  ;;  %v696_v20 = vadd.f32 %v7801_v23, %v7864_v34  ;;  %v1343_v60 = vld [vmem:[#allocation2 + $0xb4] sm:$0xf]  ;;  %v1252_v34 = vld [vmem:[#allocation2 + $0x18] sm:$0xf] }
  0xf6   : > { %1335 = vst [vmem:[#allocation2 + $0xa4] sm:$0x1] %v1334_v14  ;;  %1352 = vst [vmem:[#allocation2 + $0xc0] sm:$0xf] %v1351_v41  ;;  %v6560_v33 = vpack.c.bf16 %v819_v8, %v819_v8  ;;  %v6558_v27 = vpack.c.bf16 %v811_v15, %v811_v15  ;;  %v7932_v51 = vpop.f32.mrf.mxu1  ;;  %v7938_v0 = vrot.slane %v938_v42, 7  ;;  %v707_v1 = vadd.f32 %v7875_v28, %v7801_v23 }
  0xf7   : > { %10963 = vst [vmem:[#allocation32_spill] sm:$0xff] %v7930_v35  ;;  %v699_v16 = vadd.f32 %v7801_v23, %v7882_v46  ;;  %v720_v25 = vadd.f32 %v7890_v48, %v7801_v23  ;;  %v1164_v12 = vor.u32 %v1162_v26, %v7930_v35  ;;  %v7949_v8 = vshrl.u32 %v1938_v18, 7  ;;  %v7956_v26 = vpop.f32.mrf.mxu0  ;;  %v1347_v49 = vld [vmem:[#allocation2 + $0xbc] sm:$0x1] }
  0xf8   : > { %10964 = vst [vmem:[#allocation33_spill] sm:$0xff] %v7938_v0  ;;  %v1184_v9 = vshrl.u32 %v6560_v33, 16  ;;  %v7947_v56 = vpop.f32.mrf.mxu1  ;;  %v1187_v15 = vshll.u32 %v6560_v33, 16  ;;  %v1167_v14 = vshrl.u32 %v6558_v27, 16  ;;  %v1170_v41 = vshll.u32 %v6558_v27, 16 }
  0xf9   : > { %v943_v42 = vor.u32 %v941_v11, %v7938_v0  ;;  %v1344_v28 = vsel %vm7814_vm11, %v1164_v12, %v1343_v60  ;;  %v6529_v48 = vpack.c.bf16 %v696_v20, %v696_v20  ;;  %v6532_v57 = vpack.c.bf16 %v707_v1, %v707_v1 }
  0xfa   : > { %v1186_v46 = vrot.slane %v1184_v9, 7  ;;  %v7954_v63 = vpop.f32.mrf.mxu1  ;;  %1345 = vst [vmem:[#allocation2 + $0xb4] sm:$0xf] %v1344_v28  ;;  %v1169_v59 = vrot.slane %v1167_v14, 7  ;;  %v6530_v33 = vpack.c.bf16 %v699_v16, %v699_v16  ;;  %v6535_v27 = vpack.c.bf16 %v720_v25, %v720_v25 }
  0xfb   : > { %v1253_v18 = vsel %vm7814_vm11, %v943_v42, %v1252_v34  ;;  %v921_v12 = vshrl.u32 %v6529_v48, 16  ;;  %v924_v20 = vshll.u32 %v6529_v48, 16  ;;  %v946_v28 = vshrl.u32 %v6532_v57, 16  ;;  %v6821_v42 = vpop.f32.mrf.mxu0  ;;  %v1242_v48 = vld [vmem:[#allocation2 + $0xc] sm:$0xf] }
  0xfc   : > { %v7960_v13 = vor.u32 %v1187_v15, %v1186_v46  ;;  %v1191_v11 = vrot.slane %v1186_v46, 4  ;;  %v7962_v60 = vpop.f32.mrf.mxu1  ;;  %1254 = vst [vmem:[#allocation2 + $0x18] sm:$0xf] %v1253_v18  ;;  %v7964_v1 = vor.u32 %v1170_v41, %v1169_v59  ;;  %v1174_v9 = vrot.slane %v1169_v59, 4 }
  0xfd   : > { %v949_v39 = vshll.u32 %v6532_v57, 16  ;;  %v7970_v16 = vrot.slane %v921_v12, 7  ;;  %v929_v25 = vshrl.u32 %v6530_v33, 16  ;;  %v932_v15 = vshll.u32 %v6530_v33, 16 }
  0xfe   : > { %10965 = vst [vmem:[#allocation34_spill] sm:$0xff] %v7960_v13  ;;  %10966 = vst [vmem:[#allocation35_spill] sm:$0xff] %v7964_v1  ;;  %v1355_v14 = vsel %vm7828_vm13, %v1191_v11, %v1354_v24  ;;  %v7968_v34 = vpop.f32.mrf.mxu1  ;;  %v1348_v46 = vsel %vm7828_vm13, %v1174_v9, %v1347_v49  ;;  %v948_v41 = vrot.slane %v946_v28, 7  ;;  %v972_v18 = vshrl.u32 %v6535_v27, 16  ;;  %v1256_v11 = vld [vmem:[#allocation2 + $0x20] sm:$0x1] }
  0xff   : > { %1356 = vst [vmem:[#allocation2 + $0xc8] sm:$0x1] %v1355_v14  ;;  %v975_v59 = vshll.u32 %v6535_v27, 16  ;;  %1349 = vst [vmem:[#allocation2 + $0xbc] sm:$0x1] %v1348_v46  ;;  %v926_v24 = vor.u32 %v924_v20, %v7970_v16  ;;  %v1945_v12 = vand.u32 1, %v7949_v8  ;;  %v712_v33 = vadd.f32 %v7801_v23, %v7896_v47  ;;  %v730_v47 = vpop.f32.mrf.mxu0 }
 0x100   : > { %v7974_v57 = vpop.f32.mrf.mxu1  ;;  %v931_v13 = vrot.slane %v929_v25, 7  ;;  %v7980_v14 = vor.u32 %v949_v39, %v948_v41  ;;  %v953_v1 = vrot.slane %v948_v41, 4  ;;  %v1249_v49 = vld [vmem:[#allocation2 + $0x14] sm:$0x1]  ;;  %v7982_v9 = vrot.slane %v972_v18, 7 }
 0x101   : > { %v723_v27 = vadd.f32 %v7903_v22, %v7801_v23  ;;  %v1243_v20 = vsel %vm7814_vm11, %v926_v24, %v1242_v48  ;;  %v6533_v29 = vpack.c.bf16 %v712_v33, %v712_v33  ;;  %v1940_v18 = vadd.s32 8, %v7949_v8 }
 0x102   : > { %10967 = vst [vmem:[#allocation36_spill] sm:$0xff] %v7980_v14  ;;  %10968 = vst [vmem:[#allocation37_spill] sm:$0xff] %v7982_v9  ;;  %v7986_v28 = vpop.f32.mrf.mxu1  ;;  %v7990_v46 = vor.u32 %v932_v15, %v931_v13  ;;  %v936_v25 = vrot.slane %v931_v13, 4  ;;  %v1257_v39 = vsel %vm7828_vm13, %v953_v1, %v1256_v11  ;;  %v977_v41 = vor.u32 %v975_v59, %v7982_v9 }
 0x103   : > { %1244 = vst [vmem:[#allocation2 + $0xc] sm:$0xf] %v1243_v20  ;;  %v6536_v22 = vpack.c.bf16 %v723_v27, %v723_v27  ;;  %1258 = vst [vmem:[#allocation2 + $0x20] sm:$0x1] %v1257_v39  ;;  %v955_v48 = vshrl.u32 %v6533_v29, 16  ;;  %v958_v13 = vshll.u32 %v6533_v29, 16  ;;  %v715_v24 = vadd.f32 %v7801_v23, %v7917_v61  ;;  %v6824_v20 = vpop.f32.mrf.mxu0 }
 0x104   : > { %v7996_v10 = vpop.f32.mrf.mxu1  ;;  %v1250_v15 = vsel %vm7828_vm13, %v936_v25, %v1249_v49  ;;  %v1267_v1 = vsel %vm7814_vm11, %v977_v41, %v1266_v4  ;;  %v736_v8 = vadd.f32 %v7936_v6, %v7801_v23  ;;  %v728_v29 = vadd.f32 %v7801_v23, %v7956_v26  ;;  %v1259_v25 = vld [vmem:[#allocation2 + $0x24] sm:$0xf] }
 0x105   : > { %1251 = vst [vmem:[#allocation2 + $0x14] sm:$0x1] %v1250_v15  ;;  %v980_v11 = vshrl.u32 %v6536_v22, 16  ;;  %v983_v59 = vshll.u32 %v6536_v22, 16  ;;  %1268 = vst [vmem:[#allocation2 + $0x30] sm:$0xf] %v1267_v1  ;;  %v6534_v49 = vpack.c.bf16 %v715_v24, %v715_v24  ;;  %v739_v61 = vadd.f32 %v6821_v42, %v7801_v23 }
 0x106   : > { %v8006_v33 = vpop.f32.mrf.mxu1  ;;  %v8008_v27 = vrot.slane %v955_v48, 7  ;;  %v6539_v4 = vpack.c.bf16 %v736_v8, %v736_v8  ;;  %v731_v41 = vadd.f32 %v7801_v23, %v730_v47  ;;  %v752_v22 = vadd.f32 %v6824_v20, %v7801_v23  ;;  %v1270_v24 = vld [vmem:[#allocation2 + $0x38] sm:$0x1] }
 0x107   : > { %v982_v39 = vrot.slane %v980_v11, 7  ;;  %vm8017_vm0 = vcmp.eq.s32.totalorder %v1945_v12, 0  ;;  %v1952_v48 = vand.u32 1, %v1940_v18  ;;  %v963_v42 = vshrl.u32 %v6534_v49, 16 }
 0x108   : > { %v8015_v6 = vpop.f32.mrf.mxu1  ;;  %v960_v26 = vor.u32 %v958_v13, %v8008_v27  ;;  %v966_v1 = vshll.u32 %v6534_v49, 16  ;;  %v1006_v8 = vshrl.u32 %v6539_v4, 16  ;;  %v1009_v47 = vshll.u32 %v6539_v4, 16  ;;  %v1263_v13 = vld [vmem:[#allocation2 + $0x2c] sm:$0x1] }
 0x109   : > { %v8022_v21 = vor.u32 %v983_v59, %v982_v39  ;;  %v987_v11 = vrot.slane %v982_v39, 4  ;;  %v965_v12 = vrot.slane %v963_v42, 7  ;;  %v6537_v35 = vpack.c.bf16 %v728_v29, %v728_v29 }
 0x10a   : > { %v8024_v43 = vpop.f32.mrf.mxu1  ;;  %v1260_v20 = vsel %vm7814_vm11, %v960_v26, %v1259_v25  ;;  %v6540_v14 = vpack.c.bf16 %v739_v61, %v739_v61  ;;  %v8033_v59 = vrot.slane %v1006_v8, 7  ;;  %v6538_v49 = vpack.c.bf16 %v731_v41, %v731_v41  ;;  %v1280_v25 = vld [vmem:[#allocation2 + $0x48] sm:$0xf] }
 0x10b   : > { %10971 = vst [vmem:[#allocation38_spill] sm:$0xff] %v8022_v21  ;;  %1261 = vst [vmem:[#allocation2 + $0x24] sm:$0xf] %v1260_v20  ;;  %v1271_v18 = vsel %vm7828_vm13, %v987_v11, %v1270_v24  ;;  %v6543_v39 = vpack.c.bf16 %v752_v22, %v752_v22  ;;  %vm8037_vm1 = vcmp.eq.s32.totalorder %v1952_v48, 0  ;;  %v8041_v29 = vor.u32 %v966_v1, %v965_v12  ;;  %v743_v20 = vpop.f32.mrf.mxu0 }
 0x10c   : > { %10972 = vst [vmem:[#allocation39_spill] sm:$0xff] %v8033_v59  ;;  %v8035_v4 = vpop.f32.mrf.mxu1  ;;  %1272 = vst [vmem:[#allocation2 + $0x38] sm:$0x1] %v1271_v18  ;;  %v970_v61 = vrot.slane %v965_v12, 4  ;;  %v989_v26 = vshrl.u32 %v6537_v35, 16  ;;  %v992_v42 = vshll.u32 %v6537_v35, 16  ;;  %v1011_v24 = vor.u32 %v1009_v47, %v8033_v59 }
 0x10d   : > { %v1014_v11 = vshrl.u32 %v6540_v14, 16  ;;  %v1017_v8 = vshll.u32 %v6540_v14, 16  ;;  %v997_v1 = vshrl.u32 %v6538_v49, 16  ;;  %v1000_v12 = vshll.u32 %v6538_v49, 16  ;;  %v1273_v18 = vld [vmem:[#allocation2 + $0x3c] sm:$0xf] }
 0x10e   : > { %v8045_v22 = vpop.f32.mrf.mxu1  ;;  %v1264_v48 = vsel %vm7828_vm13, %v970_v61, %v1263_v13  ;;  %v8049_v55 = vrot.slane %v989_v26, 7  ;;  %v1281_v35 = vsel %vm7814_vm11, %v1011_v24, %v1280_v25  ;;  %v1040_v59 = vshrl.u32 %v6543_v39, 16  ;;  %v6825_v26 = vpop.f32.mrf.mxu0  ;;  %v8064_v25 = vld [vmem:[%s10834_s6] ss:$0 sm:$0xff] }
 0x10f   : > { %1265 = vst [vmem:[#allocation2 + $0x2c] sm:$0x1] %v1264_v48  ;;  %v1016_v47 = vrot.slane %v1014_v11, 7  ;;  %v1043_v14 = vshll.u32 %v6543_v39, 16  ;;  %1282 = vst [vmem:[#allocation2 + $0x48] sm:$0xf] %v1281_v35  ;;  %v744_v61 = vadd.f32 %v7801_v23, %v743_v20 }
 0x110   : > { %v8053_v52 = vpop.f32.mrf.mxu1  ;;  %v994_v41 = vor.u32 %v992_v42, %v8049_v55  ;;  %v999_v13 = vrot.slane %v997_v1, 7  ;;  %v8059_v48 = vld [vmem:[%s7442_s29 + $0x68] sm:$0xf]  ;;  %v1277_v11 = vld [vmem:[#allocation2 + $0x44] sm:$0x1]  ;;  %v8068_v35 = vrot.slane %v1040_v59, 7  ;;  %v755_v42 = vadd.f32 %v6825_v26, %v7801_v23  ;;  %v1674_v26 = vpop.permute.xlu1 %1673 }
 0x111   : > { %v8066_v39 = vor.u32 %v1017_v8, %v1016_v47  ;;  %v1021_v24 = vrot.slane %v1016_v47, 4  ;;  %v6541_v3 = vpack.c.bf16 %v744_v61, %v744_v61 }
 0x112   : > { %10976 = vst [vmem:[#allocation41_spill] sm:$0xff] %v8068_v35  ;;  %v6864_v1 = vpop.f32.mrf.mxu1  ;;  %v1274_v20 = vsel %vm7814_vm11, %v994_v41, %v1273_v18  ;;  %v8073_v49 = vor.u32 %v1000_v12, %v999_v13  ;;  %v1004_v58 = vrot.slane %v999_v13, 4  ;;  %v1045_v47 = vor.u32 %v1043_v14, %v8068_v35 }
 0x113   : > { %10975 = vst [vmem:[#allocation40_spill] sm:$0xff] %v8066_v39  ;;  %v2242_v8 = vsel %vm8017_vm0, %v7915_v30, %v6864_v1  ;;  %1275 = vst [vmem:[#allocation2 + $0x3c] sm:$0xf] %v1274_v20  ;;  %v1285_v59 = vsel %vm7828_vm13, %v1021_v24, %v1284_v19  ;;  %v1824_v39 = vld [vmem:[#allocation2 + $0x24] sm:$0xf]  ;;  %v1023_v13 = vshrl.u32 %v6541_v3, 16  ;;  %v6544_v24 = vpack.c.bf16 %v755_v42, %v755_v42 }
 0x114   : > { %v2487_v41 = vadd.f32 %v8064_v25, %v2242_v8  ;;  %v2173_v12 = vpop.f32.mrf.mxu1  ;;  %1286 = vst [vmem:[#allocation2 + $0x50] sm:$0x1] %v1285_v59  ;;  %v1278_v18 = vsel %vm7828_vm13, %v1004_v58, %v1277_v11  ;;  %v1295_v14 = vsel %vm7814_vm11, %v1045_v47, %v1294_v31  ;;  %v1026_v61 = vshll.u32 %v6541_v3, 16  ;;  %v8097_v11 = vld [vmem:[%s7442_s29 + $0x54] sm:$0xf]  ;;  %v746_v31 = vpop.f32.mrf.mxu0 }
 0x115   : > { %v2240_v19 = vsel %vm8017_vm0, %v7924_v37, %v2173_v12  ;;  %1279 = vst [vmem:[#allocation2 + $0x44] sm:$0x1] %v1278_v18  ;;  %1296 = vst [vmem:[#allocation2 + $0x60] sm:$0xf] %v1295_v14  ;;  %v8092_v59 = vrot.slane %v1023_v13, 7  ;;  %v1825_v58 = vsel %vm7847_vm15, %v1674_v26, %v1824_v39  ;;  %v1048_v12 = vshrl.u32 %v6544_v24, 16 }
 0x116   : > { %v6565_v1 = vpack.c.bf16 %v2487_v41, %v2487_v41  ;;  %v2483_v20 = vadd.f32 %v8064_v25, %v2240_v19  ;;  %v6865_v8 = vpop.f32.mrf.mxu1  ;;  %v1051_v3 = vshll.u32 %v6544_v24, 16  ;;  %1826 = vst [vmem:[#allocation2 + $0x24] sm:$0xf] %v1825_v58  ;;  %v1287_v19 = vld [vmem:[#allocation2 + $0x54] sm:$0xf]  ;;  %v10977_v39 = vshrl.u32 %v8029_v45, 16 }
 0x117   : > { %v2243_v37 = vsel %vm8037_vm1, %v7932_v51, %v6865_v8  ;;  %v1028_v14 = vor.u32 %v1026_v61, %v8092_v59  ;;  %v1050_v24 = vrot.slane %v1048_v12, 7  ;;  %v8112_v8 = vpop.f32.mrf.mxu0  ;;  %v1568_v58 = vshrl.u32 %v8097_v11, 16 }
 0x118   : > { %v2646_v47 = vshrl.u32 %v6565_v1, 16  ;;  %v6561_v41 = vpack.c.bf16 %v2483_v20, %v2483_v20  ;;  %v2488_v18 = vadd.f32 %v8064_v25, %v2243_v37  ;;  %v2176_v13 = vpop.f32.mrf.mxu1  ;;  %v8106_v26 = vrot.slane %v10977_v39, 7  ;;  %v8116_v20 = vld [vmem:[%s7442_s29 + $0x5c] sm:$0xf] }
 0x119   : > { %v2241_v51 = vsel %vm8037_vm1, %v7947_v56, %v2176_v13  ;;  %v2649_v42 = vshll.u32 %v6565_v1, 16  ;;  %v1288_v61 = vsel %vm7814_vm11, %v1028_v14, %v1287_v19  ;;  %v8126_v12 = vor.u32 %v1051_v3, %v1050_v24  ;;  %v8137_v3 = vpop.f32.mrf.mxu0 }
 0x11a   : > { %v8118_v37 = vrot.slane %v2646_v47, 7  ;;  %v2612_v30 = vshrl.u32 %v6561_v41, 16  ;;  %v6566_v7 = vpack.c.bf16 %v2488_v18, %v2488_v18  ;;  %v6868_v39 = vpop.f32.mrf.mxu1  ;;  %v2484_v35 = vadd.f32 %v8064_v25, %v2241_v51  ;;  %1289 = vst [vmem:[#allocation2 + $0x54] sm:$0xf] %v1288_v61 }
 0x11b   : > { %v2246_v56 = vsel %vm8017_vm0, %v7954_v63, %v6868_v39  ;;  %10978 = vst [vmem:[#allocation42_spill] sm:$0xff] %v8126_v12  ;;  %v747_v1 = vadd.f32 %v7801_v23, %v746_v31  ;;  %v1585_v18 = vshrl.u32 %v8116_v20, 16  ;;  %v1298_v39 = vld [vmem:[#allocation2 + $0x68] sm:$0x1]  ;;  %v8141_v23 = vrot.slane %v1568_v58, 7 }
 0x11c   : > { %v8128_v13 = vrot.slane %v2612_v30, 7  ;;  %v2654_v9 = vshrl.u32 %v6566_v7, 16  ;;  %v2189_v47 = vpop.f32.mrf.mxu1  ;;  %v6562_v0 = vpack.c.bf16 %v2484_v35, %v2484_v35  ;;  %v2495_v51 = vadd.f32 %v8064_v25, %v2246_v56  ;;  %v8157_v12 = vld [vmem:[%s7442_s29 + $0x70] sm:$0xf] }
 0x11d   : > { %v2244_v63 = vsel %vm8017_vm0, %v7962_v60, %v2189_v47  ;;  %v2651_v38 = vor.u32 %v2649_v42, %v8118_v37  ;;  %v2615_v30 = vshll.u32 %v6561_v41, 16  ;;  %10980 = vst [vmem:[#allocation44_spill] sm:$0xff] %v8141_v23  ;;  %v1571_v35 = vshll.u32 %v8097_v11, 16 }
 0x11e   : > { %v8139_v19 = vrot.slane %v2654_v9, 7  ;;  %v6869_v14 = vpop.f32.mrf.mxu1  ;;  %v2620_v31 = vshrl.u32 %v6562_v0, 16  ;;  %v2491_v56 = vadd.f32 %v8064_v25, %v2244_v63  ;;  %v1055_v42 = vrot.slane %v1050_v24, 4 }
 0x11f   : > { %2895 = vrot.lane.b32.xlu1 %v2651_v38, %s7337_s18  ;;  %v2247_v60 = vsel %vm8037_vm1, %v7968_v34, %v6869_v14  ;;  %v2657_v9 = vshll.u32 %v6566_v7, 16  ;;  %v10981_v61 = vshrl.u32 %v8059_v48, 16  ;;  %v8153_v58 = vrot.slane %v1585_v18, 7  ;;  %v8166_v7 = vpop.f32.mrf.mxu0 }
 0x120   : > { %10979 = vst [vmem:[#allocation43_spill] sm:$0xff] %v8139_v19  ;;  %v2192_v41 = vpop.f32.mrf.mxu1  ;;  %v1588_v11 = vshll.u32 %v8116_v20, 16  ;;  %v8159_v63 = vpack.c.bf16 %v2495_v51, %v2495_v51  ;;  %v2617_v38 = vor.u32 %v2615_v30, %v8128_v13  ;;  %v1299_v34 = vsel %vm7828_vm13, %v1055_v42, %v1298_v39 }
 0x121   : > { %v8151_v47 = vrot.slane %v10981_v61, 7  ;;  %10982 = vst [vmem:[#allocation45_spill] sm:$0xff] %v8153_v58  ;;  %v8164_v24 = vpack.c.bf16 %v747_v1, %v747_v1  ;;  %v8168_v14 = vrot.slane %v2620_v31, 7  ;;  %v2496_v18 = vadd.f32 %v8064_v25, %v2247_v60  ;;  %1300 = vst [vmem:[#allocation2 + $0x68] sm:$0x1] %v1299_v34 }
 0x122   : > { %v6872_v61 = vpop.f32.mrf.mxu1  ;;  %v2659_v20 = vor.u32 %v2657_v9, %v8139_v19  ;;  %v10984_v51 = vshll.u32 %v8029_v45, 16  ;;  %v8177_v30 = vpack.c.bf16 %v2491_v56, %v2491_v56  ;;  %v2245_v1 = vsel %vm8037_vm1, %v7974_v57, %v2192_v41  ;;  %v8197_v41 = vpop.f32.mrf.mxu0 }
 0x123   : > { %10983 = vst [vmem:[#allocation46_spill] sm:$0xff] %v8168_v14  ;;  %2883 = vrot.lane.b32.xlu1 %v2617_v38, %s7337_s18  ;;  %v1573_v39 = vor.u32 %v1571_v35, %v8141_v23  ;;  %v1628_v31 = vshrl.u32 %v8157_v12, 16  ;;  %v2623_v60 = vshll.u32 %v6562_v0, 16  ;;  %v2652_v9 = vrot.slane %v8118_v37, 4 }
 0x124   : > { %v8175_v17 = vor.u32 %v10984_v51, %v8106_v26  ;;  %v2205_v42 = vpop.f32.mrf.mxu1  ;;  %v10985_v45 = vshll.u32 %v8059_v48, 16  ;;  %v1583_v56 = vrot.slane %v7627_v2, 4  ;;  %v2714_v51 = vshrl.u32 %v8159_v63, 16 }
 0x125   : > { %v2250_v57 = vsel %vm8017_vm0, %v7986_v28, %v6872_v61  ;;  %v1031_v35 = vshrl.u32 %v8164_v24, 16  ;;  %v1590_v0 = vor.u32 %v1588_v11, %v8153_v58  ;;  %v8200_v37 = vpack.c.bf16 %v2496_v18, %v2496_v18  ;;  %v8208_v28 = vpop.f32.mrf.mxu0 }
 0x126   : > { %v8189_v34 = vor.u32 %v10985_v45, %v8151_v47  ;;  %v2492_v48 = vadd.f32 %v8064_v25, %v2245_v1  ;;  %v2660_v38 = vsel %vm7481_vm5, %v2652_v9, %v2659_v20  ;;  %v6873_v2 = vpop.f32.mrf.mxu1  ;;  %v2625_v45 = vor.u32 %v2623_v60, %v8168_v14 }
 0x127   : > { %v2680_v23 = vshrl.u32 %v8177_v30, 16  ;;  %2897 = vrot.lane.b32.xlu1 %v2660_v38, %s7337_s18  ;;  %v10986_v61 = vrot.slane %v7617_v62, 4  ;;  %v8216_v18 = vrot.slane %v1628_v31, 7  ;;  %v1631_v1 = vshll.u32 %v8157_v12, 16 }
 0x128   : > { %v2503_v20 = vadd.f32 %v8064_v25, %v2250_v57  ;;  %v2248_v60 = vsel %vm8017_vm0, %v7996_v10, %v2205_v42  ;;  %v2251_v9 = vsel %vm8037_vm1, %v8006_v33, %v6873_v2  ;;  %v2208_v38 = vpop.f32.mrf.mxu1  ;;  %v2618_v62 = vrot.slane %v8128_v13, 4 }
 0x129   : > { %v8214_v11 = vsel %vm7481_vm5, %v10986_v61, %v1573_v39  ;;  %v8227_v58 = vrot.slane %v2714_v51, 7  ;;  %v2717_v39 = vshll.u32 %v8159_v63, 16  ;;  %v8230_v31 = vrot.slane %v1031_v35, 7  ;;  %v1291_v51 = vld [vmem:[#allocation2 + $0x5c] sm:$0x1] }
 0x12a   : > { %v8234_v12 = vsel %vm7481_vm5, %v1583_v56, %v1590_v0  ;;  %v2722_v57 = vshrl.u32 %v8200_v37, 16  ;;  %v8237_v10 = vpack.c.bf16 %v2492_v48, %v2492_v48  ;;  %v2249_v33 = vsel %vm8037_vm1, %v8015_v6, %v2208_v38  ;;  %v6876_v42 = vpop.f32.mrf.mxu1  ;;  %v8251_v48 = vpop.f32.mrf.mxu0 }
 0x12b   : > { %v2626_v13 = vsel %vm7481_vm5, %v2618_v62, %v2625_v45  ;;  %v2499_v63 = vadd.f32 %v8064_v25, %v2248_v60  ;;  %v2504_v35 = vadd.f32 %v8064_v25, %v2251_v9  ;;  %v2254_v56 = vsel %vm8017_vm0, %v8024_v43, %v6876_v42 }
 0x12c   : > { %2885 = vrot.lane.b32.xlu1 %v2626_v13, %s7337_s18  ;;  %v1038_v0 = vrot.slane %v8230_v31, 4  ;;  %v8253_v6 = vrot.slane %v2680_v23, 7  ;;  %v8255_v2 = vpack.c.bf16 %v2503_v20, %v2503_v20  ;;  %v8258_v45 = vadd.f32 %v8064_v25, %v2254_v56  ;;  %v2221_v61 = vpop.f32.mrf.mxu1 }
 0x12d   : > { %v8261_v60 = vor.u32 %v1631_v1, %v8216_v18  ;;  %v2500_v9 = vadd.f32 %v8064_v25, %v2249_v33  ;;  %v2252_v38 = vsel %vm8017_vm0, %v8035_v4, %v2221_v61  ;;  %v2719_v23 = vor.u32 %v2717_v39, %v8227_v58  ;;  %v8286_v39 = vpop.f32.mrf.mxu0 }
 0x12e   : > { %v1292_v43 = vsel %vm7828_vm13, %v1038_v0, %v1291_v51  ;;  %v8270_v20 = vrot.slane %v2722_v57, 7  ;;  %v2688_v62 = vshrl.u32 %v8237_v10, 16  ;;  %v8274_v13 = vadd.f32 %v8064_v25, %v2252_v38  ;;  %v6877_v1 = vpop.f32.mrf.mxu1 }
 0x12f   : > { %1293 = vst [vmem:[#allocation2 + $0x5c] sm:$0x1] %v1292_v43  ;;  %v2683_v54 = vshll.u32 %v8177_v30, 16  ;;  %v8278_v42 = vpack.c.bf16 %v2499_v63, %v2499_v63  ;;  %v8280_v51 = vpack.c.bf16 %v2504_v35, %v2504_v35  ;;  %v2255_v4 = vsel %vm8037_vm1, %v8045_v22, %v6877_v1 }
 0x130   : > { %10987 = vst [vmem:[#allocation47_spill] sm:$0xff] %v8270_v20  ;;  %2919 = vrot.lane.b32.xlu1 %v2719_v23, %s7337_s18  ;;  %v2725_v0 = vshll.u32 %v8200_v37, 16  ;;  %v8292_v30 = vadd.f32 %v8064_v25, %v2255_v4  ;;  %v2224_v63 = vpop.f32.mrf.mxu1  ;;  %v2782_v35 = vshrl.u32 %v8255_v2, 16  ;;  %v8295_v61 = vpack.c.bf16 %v2500_v9, %v2500_v9 }
 0x131   : > { %v2253_v22 = vsel %vm8037_vm1, %v8053_v52, %v2224_v63  ;;  %v2685_v43 = vor.u32 %v2683_v54, %v8253_v6  ;;  %v8302_v23 = vrot.slane %v2688_v62, 7  ;;  %v2748_v56 = vshrl.u32 %v8278_v42, 16  ;;  %v8315_v62 = vpop.f32.mrf.mxu0 }
 0x132   : > { %v6900_v1 = vpop.f32.mrf.mxu1  ;;  %v2727_v4 = vor.u32 %v2725_v0, %v8270_v20  ;;  %v2790_v9 = vshrl.u32 %v8280_v51, 16  ;;  %v8309_v57 = vadd.f32 %v8064_v25, %v2253_v22  ;;  %v2691_v54 = vshll.u32 %v8237_v10, 16 }
 0x133   : > { %10988 = vst [vmem:[#allocation48_spill] sm:$0xff] %v8302_v23  ;;  %v2462_v52 = vsel %vm8017_vm0, %v8112_v8, %v6900_v1  ;;  %v2720_v38 = vrot.slane %v8227_v58, 4  ;;  %v8321_v33 = vrot.slane %v2782_v35, 7  ;;  %v2751_v22 = vshll.u32 %v8278_v42, 16  ;;  %v8328_v1 = vpop.f32.mrf.mxu0 }
 0x134   : > { %2907 = vrot.lane.b32.xlu1 %v2685_v43, %s7337_s18  ;;  %v2489_v0 = vadd.f32 %v8064_v25, %v2462_v52  ;;  %v2397_v37 = vpop.f32.mrf.mxu1  ;;  %v2756_v43 = vshrl.u32 %v8295_v61, 16  ;;  %v2693_v58 = vor.u32 %v2691_v54, %v8302_v23  ;;  %v2750_v35 = vrot.slane %v2748_v56, 7 }
 0x135   : > { %v2460_v8 = vsel %vm8017_vm0, %v8137_v3, %v2397_v37  ;;  %v2728_v52 = vsel %vm7481_vm5, %v2720_v38, %v2727_v4  ;;  %v8334_v19 = vrot.slane %v2790_v9, 7  ;;  %v2793_v42 = vshll.u32 %v8280_v51, 16  ;;  %v8352_v54 = vpop.f32.mrf.mxu0 }
 0x136   : > { %v6567_v10 = vpack.c.bf16 %v2489_v0, %v2489_v0  ;;  %v2485_v63 = vadd.f32 %v8064_v25, %v2460_v8  ;;  %v6901_v20 = vpop.f32.mrf.mxu1  ;;  %v2686_v38 = vrot.slane %v8253_v6, 4  ;;  %v8343_v4 = vrot.slane %v2756_v43, 7 }
 0x137   : > { %10989 = vst [vmem:[#allocation49_spill] sm:$0xff] %v8334_v19  ;;  %v2463_v3 = vsel %vm8037_vm1, %v8166_v7, %v6901_v20  ;;  %v8347_v56 = vpack.c.bf16 %v8258_v45, %v8258_v45  ;;  %vm5092_vm11 = vcmask 1042432  }
 0x138   : > { %2921 = vrot.lane.b32.xlu1 %v2728_v52, %s7337_s18  ;;  %v2663_v37 = vshrl.u32 %v6567_v10, 16  ;;  %v6563_v0 = vpack.c.bf16 %v2485_v63, %v2485_v63  ;;  %v2490_v8 = vadd.f32 %v8064_v25, %v2463_v3  ;;  %v2400_v14 = vpop.f32.mrf.mxu1  ;;  %10990 = vst [vmem:[#allocation50_spill] sm:$0xff] %v8343_v4  ;;  %v2666_v51 = vshll.u32 %v6567_v10, 16  ;;  %vm8959_vm13 = vmor %vm5092_vm11, %vm5093_vm12 }
 0x139   : > { %v2461_v9 = vsel %vm8037_vm1, %v8197_v41, %v2400_v14  ;;  %v2694_v6 = vsel %vm7481_vm5, %v2686_v38, %v2693_v58  ;;  %v2759_v52 = vshll.u32 %v8295_v61, 16  ;;  %v2753_v41 = vor.u32 %v2751_v22, %v2750_v35 }
 0x13a   : > { %v8354_v7 = vrot.slane %v2663_v37, 7  ;;  %v2629_v20 = vshrl.u32 %v6563_v0, 16  ;;  %v6568_v63 = vpack.c.bf16 %v2490_v8, %v2490_v8  ;;  %v6904_v43 = vpop.f32.mrf.mxu1  ;;  %v2486_v45 = vadd.f32 %v8064_v25, %v2461_v9  ;;  %v8371_v9 = vpop.f32.mrf.mxu0 }
 0x13b   : > { %v2466_v14 = vsel %vm8017_vm0, %v8208_v28, %v6904_v43  ;;  %v2632_v3 = vshll.u32 %v6563_v0, 16  ;;  %v2850_v28 = vshrl.u32 %v8347_v56, 16  ;;  %v2761_v43 = vor.u32 %v2759_v52, %v8343_v4 }
 0x13c   : > { %2909 = vrot.lane.b32.xlu1 %v2694_v6, %s7337_s18  ;;  %v8364_v10 = vrot.slane %v2629_v20, 7  ;;  %v2671_v37 = vshrl.u32 %v6568_v63, 16  ;;  %v2497_v8 = vadd.f32 %v8064_v25, %v2466_v14  ;;  %v2413_v23 = vpop.f32.mrf.mxu1  ;;  %v6564_v58 = vpack.c.bf16 %v2486_v45, %v2486_v45 }
 0x13d   : > { %v2668_v38 = vor.u32 %v2666_v51, %v8354_v7  ;;  %v2464_v61 = vsel %vm8017_vm0, %v8251_v48, %v2413_v23  ;;  %v2795_v6 = vor.u32 %v2793_v42, %v8334_v19  ;;  %v2788_v23 = vrot.slane %v8321_v33, 4 }
 0x13e   : > { %v8375_v22 = vrot.slane %v2671_v37, 7  ;;  %v2493_v0 = vadd.f32 %v8064_v25, %v2464_v61  ;;  %v6905_v20 = vpop.f32.mrf.mxu1  ;;  %v2637_v45 = vshrl.u32 %v6564_v58, 16  ;;  %v8379_v14 = vpack.c.bf16 %v2497_v8, %v2497_v8 }
 0x13f   : > { %2901 = vrot.lane.b32.xlu0 %v2668_v38, %s7337_s18  ;;  %v2467_v48 = vsel %vm8037_vm1, %v8286_v39, %v6905_v20  ;;  %v8389_v42 = vpack.c.bf16 %v8274_v13, %v8274_v13  ;;  %v2674_v51 = vshll.u32 %v6568_v63, 16  ;;  %v2754_v37 = vrot.slane %v2750_v35, 4  ;;  %v2330_v39 = vpop.f32.mrf.mxu0 }
 0x140   : > { %10991 = vst [vmem:[#allocation51_spill] sm:$0xff] %v8375_v22  ;;  %2931 = vrot.lane.b32.xlu1 %v2753_v41, %s7337_s18  ;;  %v2634_v52 = vor.u32 %v2632_v3, %v8364_v10  ;;  %v2416_v8 = vpop.f32.mrf.mxu1  ;;  %v8392_v61 = vpack.c.bf16 %v2493_v0, %v2493_v0  ;;  %v2498_v41 = vadd.f32 %v8064_v25, %v2467_v48  ;;  %v8402_v13 = vrot.slane %v2637_v45, 7 }
 0x141   : > { %v2465_v38 = vsel %vm8037_vm1, %v8315_v62, %v2416_v8  ;;  %v8400_v20 = vsel %vm7481_vm5, %v2788_v23, %v2795_v6  ;;  %v2762_v35 = vsel %vm7481_vm5, %v2754_v37, %v2761_v43  ;;  %v2669_v63 = vrot.slane %v8354_v7, 4  ;;  %v6894_v7 = vpop.f32.mrf.mxu0  ;;  %v8472_v23 = vpop.permute.xlu1 %1663 }
 0x142   : > { %v2676_v3 = vor.u32 %v2674_v51, %v8375_v22  ;;  %v6908_v0 = vpop.f32.mrf.mxu1  ;;  %v2785_v48 = vshll.u32 %v8255_v2, 16  ;;  %v10992_v62 = vshll.u32 %v8164_v24, 16  ;;  %v2731_v6 = vshrl.u32 %v8379_v14, 16 }
 0x143   : > { %2889 = vrot.lane.b32.xlu0 %v2634_v52, %s7337_s18  ;;  %v2494_v43 = vadd.f32 %v8064_v25, %v2465_v38  ;;  %v8418_v45 = vrot.slane %v2850_v28, 7  ;;  %v2640_v2 = vshll.u32 %v6564_v58, 16  ;;  %v2470_v24 = vsel %vm8017_vm0, %v8328_v1, %v6908_v0  ;;  %v8433_v28 = vld [vmem:[%s7442_s29 + $0x64] sm:$0xf] }
 0x144   : > { %v8412_v8 = vor.u32 %v10992_v62, %v8230_v31  ;;  %2933 = vrot.lane.b32.xlu1 %v2762_v35, %s7337_s18  ;;  %v2429_v31 = vpop.f32.mrf.mxu1  ;;  %v8426_v51 = vpack.c.bf16 %v8309_v57, %v8309_v57  ;;  %v2697_v37 = vshrl.u32 %v8392_v61, 16  ;;  %v8429_v52 = vpack.c.bf16 %v2498_v41, %v2498_v41 }
 0x145   : > { %v2505_v38 = vadd.f32 %v8064_v25, %v2470_v24  ;;  %v8435_v35 = vpack.c.bf16 %v2494_v43, %v2494_v43  ;;  %v2677_v58 = vsel %vm7481_vm5, %v2669_v63, %v2676_v3  ;;  %v2642_v1 = vor.u32 %v2640_v2, %v8402_v13  ;;  %v2343_v3 = vpop.f32.mrf.mxu0 }
 0x146   : > { %v2468_v57 = vsel %vm8017_vm0, %v8352_v54, %v2429_v31  ;;  %v6909_v0 = vpop.f32.mrf.mxu1  ;;  %v8443_v62 = vrot.slane %v2731_v6, 7  ;;  %v2734_v41 = vshll.u32 %v8379_v14, 16  ;;  %v8454_v2 = vpack.c.bf16 %v8292_v30, %v8292_v30 }
 0x147   : > { %1733 = vrot.lane.b32.xlu0 %v8175_v17, %s7336_s11  ;;  %v8449_v43 = vpack.c.bf16 %v2505_v38, %v2505_v38  ;;  %v2501_v63 = vadd.f32 %v8064_v25, %v2468_v57  ;;  %v2635_v54 = vrot.slane %v8364_v10, 4  ;;  %v2471_v14 = vsel %vm8037_vm1, %v8371_v9, %v6909_v0 }
 0x148   : > { %2903 = vrot.lane.b32.xlu1 %v2677_v58, %s7337_s18  ;;  %v2432_v6 = vpop.f32.mrf.mxu1  ;;  %v1602_v17 = vshrl.u32 %v8433_v28, 16  ;;  %v8462_v31 = vrot.slane %v2697_v37, 7  ;;  %v2700_v38 = vshll.u32 %v8392_v61, 16  ;;  %v2739_v58 = vshrl.u32 %v8429_v52, 16 }
 0x149   : > { %v2705_v30 = vshrl.u32 %v8435_v35, 16  ;;  %v2643_v10 = vsel %vm7481_vm5, %v2635_v54, %v2642_v1  ;;  %v2506_v57 = vadd.f32 %v8064_v25, %v2471_v14  ;;  %v2469_v9 = vsel %vm8037_vm1, %v2330_v39, %v2432_v6  ;;  %v6895_v54 = vpop.f32.mrf.mxu0 }
 0x14a   : > { %v6912_v0 = vpop.f32.mrf.mxu1  ;;  %v2799_v61 = vshrl.u32 %v8449_v43, 16  ;;  %v2736_v37 = vor.u32 %v2734_v41, %v8443_v62  ;;  %v8479_v24 = vpack.c.bf16 %v2501_v63, %v2501_v63  ;;  %v2502_v1 = vadd.f32 %v8064_v25, %v2469_v9 }
 0x14b   : > { %1739 = vrot.lane.b32.xlu0 %v8189_v34, %s7336_s11  ;;  %v6584_v14 = vpack.c.bf16 %v2506_v57, %v2506_v57  ;;  %v2787_v39 = vor.u32 %v2785_v48, %v8321_v33  ;;  %v2474_v6 = vsel %vm8017_vm0, %v6894_v7, %v6912_v0  ;;  %v8485_v4 = vrot.slane %v1602_v17, 7 }
 0x14c   : > { %2891 = vrot.lane.b32.xlu1 %v2643_v10, %s7337_s18  ;;  %v2445_v19 = vpop.f32.mrf.mxu1  ;;  %v8487_v34 = vrot.slane %v2739_v58, 7  ;;  %v2742_v10 = vshll.u32 %v8429_v52, 16  ;;  %v6580_v22 = vpack.c.bf16 %v2502_v1, %v2502_v1  ;;  %v2513_v41 = vadd.f32 %v8064_v25, %v2474_v6 }
 0x14d   : > { %10993 = vst [vmem:[#allocation52_spill] sm:$0xff] %v8485_v4  ;;  %v8491_v63 = vrot.slane %v2705_v30, 7  ;;  %v2708_v9 = vshll.u32 %v8435_v35, 16  ;;  %v2807_v57 = vshrl.u32 %v6584_v14, 16  ;;  %v2472_v33 = vsel %vm8017_vm0, %v2343_v3, %v2445_v19  ;;  %v2346_v30 = vpop.f32.mrf.mxu0 }
 0x14e   : > { %v6913_v48 = vpop.f32.mrf.mxu1  ;;  %v8496_v7 = vrot.slane %v2799_v61, 7  ;;  %v2765_v52 = vshrl.u32 %v8479_v24, 16  ;;  %v2702_v17 = vor.u32 %v2700_v38, %v8462_v31  ;;  %v2509_v58 = vadd.f32 %v8064_v25, %v2472_v33  ;;  %v8508_v61 = vpop.permute.xlu1 %1675 }
 0x14f   : > { %2925 = vrot.lane.b32.xlu0 %v2736_v37, %s7337_s18  ;;  %v8504_v35 = vrot.slane %v2807_v57, 7  ;;  %v2810_v0 = vshll.u32 %v6584_v14, 16  ;;  %v2773_v15 = vshrl.u32 %v6580_v22, 16  ;;  %v2475_v19 = vsel %vm8037_vm1, %v6895_v54, %v6913_v48 }
 0x150   : > { %1723 = vrot.lane.b32.xlu1 %v8214_v11, %s7336_s11  ;;  %v2448_v3 = vpop.f32.mrf.mxu1  ;;  %v2737_v11 = vrot.slane %v8443_v62, 4  ;;  %v2744_v37 = vor.u32 %v2742_v10, %v8487_v34  ;;  %v2703_v1 = vrot.slane %v8462_v31, 4  ;;  %v8513_v38 = vpack.c.bf16 %v2509_v58, %v2509_v58 }
 0x151   : > { %10994 = vst [vmem:[#allocation53_spill] sm:$0xff] %v8504_v35  ;;  %v2710_v6 = vor.u32 %v2708_v9, %v8491_v63  ;;  %v1605_v57 = vshll.u32 %v8433_v28, 16  ;;  %v2514_v14 = vadd.f32 %v8064_v25, %v2475_v19  ;;  %v2473_v54 = vsel %vm8037_vm1, %v2346_v30, %v2448_v3 }
 0x152   : > { %v8520_v33 = vrot.slane %v2765_v52, 7  ;;  %v2776_v62 = vshll.u32 %v6580_v22, 16  ;;  %v8524_v31 = vpack.c.bf16 %v2513_v41, %v2513_v41  ;;  %v2510_v10 = vadd.f32 %v8064_v25, %v2473_v54  ;;  %v1688_v3 = vpop.permute.xlu1 %1687 }
 0x153   : > { %2913 = vrot.lane.b32.xlu0 %v2702_v17, %s7337_s18  ;;  %v8527_v9 = vrot.slane %v2773_v15, 7  ;;  %v8529_v28 = vpack.c.bf16 %v2514_v14, %v2514_v14  ;;  %v2805_v48 = vrot.slane %v8496_v7, 4  ;;  %v2812_v21 = vor.u32 %v2810_v0, %v8504_v35  ;;  %v8547_v0 = vld [vmem:[%s7442_s29 + $0x78] sm:$0xf] }
 0x154   : > { %2943 = vrot.lane.b32.xlu1 %v2787_v39, %s7337_s18  ;;  %v10995_v52 = vshrl.u32 %v8389_v42, 16  ;;  %v2858_v17 = vshrl.u32 %v8454_v2, 16  ;;  %v2833_v22 = vshrl.u32 %v8513_v38, 16  ;;  %v6588_v41 = vpack.c.bf16 %v2510_v10, %v2510_v10  ;;  %v8559_v10 = vld [vmem:[%s7442_s29 + $0x6c] sm:$0xf] }
 0x155   : > { %v10996_v25 = vshrl.u32 %v8426_v51, 16  ;;  %v2827_v30 = vshll.u32 %v8426_v51, 16  ;;  %v2745_v15 = vsel %vm7481_vm5, %v2737_v11, %v2744_v37  ;;  %v8551_v19 = vsel %vm7481_vm5, %v2805_v48, %v2812_v21 }
 0x156   : > { %v8535_v39 = vrot.slane %v10995_v52, 7  ;;  %v2802_v14 = vshll.u32 %v8449_v43, 16  ;;  %v1607_v54 = vor.u32 %v1605_v57, %v8485_v4  ;;  %v2841_v51 = vshrl.u32 %v6588_v41, 16 }
 0x157   : > { %v8541_v58 = vrot.slane %v10996_v25, 7  ;;  %1729 = vrot.lane.b32.xlu0 %v8234_v12, %s7336_s11  ;;  %v2771_v11 = vrot.slane %v8520_v33, 4  ;;  %v2711_v37 = vsel %vm7481_vm5, %v2703_v1, %v2710_v6  ;;  %v2867_v48 = vshrl.u32 %v8524_v31, 16 }
 0x158   : > { %2927 = vrot.lane.b32.xlu1 %v2745_v15, %s7337_s18  ;;  %v2875_v21 = vshrl.u32 %v8529_v28, 16  ;;  %v2778_v43 = vor.u32 %v2776_v62, %v8527_v9  ;;  %v8567_v52 = vrot.slane %v2833_v22, 7  ;;  %v8569_v12 = vrot.slane %v2841_v51, 7 }
 0x159   : > { %v2844_v25 = vshll.u32 %v6588_v41, 16  ;;  %v1645_v57 = vshrl.u32 %v8547_v0, 16  ;;  %v1619_v15 = vshrl.u32 %v8559_v10, 16  ;;  %v2822_v1 = vrot.slane %v8535_v39, 4 }
 0x15a   : > { %v8575_v35 = vsel %vm7481_vm5, %v2771_v11, %v2778_v43  ;;  %v2829_v6 = vor.u32 %v2827_v30, %v8541_v58  ;;  %v8579_v4 = vrot.slane %v2858_v17, 7  ;;  %v2861_v62 = vshll.u32 %v8454_v2, 16  ;;  %v1700_v2 = vpop.permute.xlu1 %1699  ;;  %v8601_v30 = vld [vmem:[%s7442_s29 + $0x74] sm:$0xf] }
 0x15b   : > { %v2768_v22 = vshll.u32 %v8479_v24, 16  ;;  %1745 = vrot.lane.b32.xlu0 %v8261_v60, %s7336_s11  ;;  %v2804_v41 = vor.u32 %v2802_v14, %v8496_v7  ;;  %v8587_v51 = vrot.slane %v2867_v48, 7  ;;  %v8589_v11 = vrot.slane %v2875_v21, 7 }
 0x15c   : > { %2915 = vrot.lane.b32.xlu1 %v2711_v37, %s7337_s18  ;;  %v2878_v43 = vshll.u32 %v8529_v28, 16  ;;  %v8594_v17 = vsel %vm7481_vm5, %v2822_v1, %v2829_v6  ;;  %v10997_v24 = vrot.slane %v8106_v26, 4  ;;  %v2839_v7 = vrot.slane %v8567_v52, 4 }
 0x15d   : > { %v2846_v14 = vor.u32 %v2844_v25, %v8569_v12  ;;  %v10998_v37 = vrot.slane %v7970_v16, 4  ;;  %v8610_v48 = vrot.slane %v1645_v57, 7  ;;  %v1648_v21 = vshll.u32 %v8547_v0, 16 }
 0x15e   : > { %v1608_v60 = vsel %vm7481_vm5, %v10997_v24, %v1607_v54  ;;  %v8613_v26 = vrot.slane %v1619_v15, 7  ;;  %v1622_v54 = vshll.u32 %v8559_v10, 16  ;;  %v2863_v0 = vor.u32 %v2861_v62, %v8579_v4 }
 0x15f   : > { %v935_v28 = vsel %vm7481_vm5, %v10998_v37, %v7990_v46  ;;  %2949 = vrot.lane.b32.xlu0 %v2804_v41, %s7337_s18  ;;  %v8622_v16 = vsel %vm7481_vm5, %v2839_v7, %v2846_v14  ;;  %v2856_v46 = vrot.slane %v8418_v45, 4  ;;  %v10999_v10 = vrot.slane %v8008_v27, 4  ;;  %v11002_v14 = vld [vmem:[#allocation24_spill] sm:$0xff] }
 0x160   : > { %1246 = vst.msk [vmem:[#allocation2 + $0x10] sm:$0xf] %vm1240_vm10, %v935_v28  ;;  %2945 = vrot.lane.b32.xlu1 %v8400_v20, %s7337_s18  ;;  %v1636_v20 = vshrl.u32 %v8601_v30, 16  ;;  %v2873_v57 = vrot.slane %v8587_v51, 4  ;;  %v2880_v15 = vor.u32 %v2878_v43, %v8589_v11  ;;  %v1063_v6 = vrot.slane %v7820_v53, 4 }
 0x161   : > { %1811 = vst.msk [vmem:[#allocation2 + $0x10] sm:$0xf] %vm1805_vm14, %v8472_v23  ;;  %v969_v25 = vsel %vm7481_vm5, %v10999_v10, %v8041_v29  ;;  %v11000_v23 = vrot.slane %v8049_v55, 4  ;;  %v2770_v27 = vor.u32 %v2768_v22, %v8520_v33  ;;  %v8646_v29 = vsel %vm7481_vm5, %v2856_v46, %v2863_v0  ;;  %v1712_v33 = vpop.permute.xlu1 %1711  ;;  %v1852_v22 = vld [vmem:[#allocation2 + $0x54] sm:$0xf]  ;;  %v11005_v46 = vld [vmem:[#allocation19_spill] sm:$0xff] }
 0x162   : > { %1262 = vst.msk [vmem:[#allocation2 + $0x28] sm:$0xf] %vm1240_vm10, %v969_v25  ;;  %v11001_v62 = vrot.slane %v8092_v59, 4  ;;  %v8658_v53 = vsel %vm7481_vm5, %v2873_v57, %v2880_v15  ;;  %v1617_v59 = vrot.slane %v8151_v47, 4  ;;  %v1624_v41 = vor.u32 %v1622_v54, %v8613_v26  ;;  %v8688_v28 = vld [vmem:[%s7442_s29 + $0x7c] sm:$0xf] }
 0x163   : > { %v1003_v1 = vsel %vm7481_vm5, %v11000_v23, %v8073_v49  ;;  %1827 = vst.msk [vmem:[#allocation2 + $0x28] sm:$0xf] %vm1805_vm14, %v8508_v61  ;;  %v1807_v49 = vld [vmem:[#allocation2 + $0xc] sm:$0xf]  ;;  %2937 = vrot.lane.b32.xlu0 %v2770_v27, %s7337_s18  ;;  %v1650_v61 = vor.u32 %v1648_v21, %v8610_v48  ;;  %v8674_v43 = vrot.slane %v1636_v20, 7  ;;  %v1639_v24 = vshll.u32 %v8601_v30, 16 }
 0x164   : > { %1276 = vst.msk [vmem:[#allocation2 + $0x40] sm:$0xf] %vm1240_vm10, %v1003_v1  ;;  %v1037_v55 = vsel %vm7481_vm5, %v11001_v62, %v8412_v8  ;;  %1735 = vrot.lane.b32.xlu1 %v1608_v60, %s7336_s11  ;;  %v1071_v8 = vsel %vm7481_vm5, %v1063_v6, %v7841_v36  ;;  %v1808_v47 = vsel %vm7847_vm15, %v7740_v32, %v1807_v49  ;;  %v7291_v36 = vld [vmem:[%s10835_s7 + $0x2c] ss:$0 sps:$4 sm:$0xff]   ;;  %v1080_v60 = vrot.slane %v7810_v40, 4  ;;  %v7290_v40 = vld [vmem:[%s10835_s7] sm:$0xff]  }
 0x165   : > { %1841 = vst.msk [vmem:[#allocation2 + $0x40] sm:$0xf] %vm1805_vm14, %v1688_v3  ;;  %v7289_v3 = vld [vmem:[%s10835_s7 + $0x8] ss:$0 sps:$4 sm:$0xff]   ;;  %v1114_v7 = vrot.slane %v7843_v50, 4  ;;  %v1097_v37 = vrot.slane %v11002_v14, 4  ;;  %v1853_v0 = vsel %vm7847_vm15, %v11005_v46, %v1852_v22  ;;  %v1625_v23 = vsel %vm7481_vm5, %v1617_v59, %v1624_v41  ;;  %7244 = vmatprep.subr.msk.bf16.mxu0 %vm3343_vm3, %v7291_v36 }
 0x166   : > { %1290 = vst.msk [vmem:[#allocation2 + $0x58] sm:$0xf] %vm1240_vm10, %v1037_v55  ;;  %1304 = vst.msk [vmem:[#allocation2 + $0x70] sm:$0xf] %vm1240_vm10, %v1071_v8  ;;  %v11003_v30 = vld [vmem:[#allocation33_spill] sm:$0xff]  ;;  %v1634_v10 = vrot.slane %v8216_v18, 4  ;;  %v1641_v1 = vor.u32 %v1639_v24, %v8674_v43  ;;  %7245 = vmatprep.subr.msk.bf16.mxu1 %vm3343_vm3, %v7289_v3 }
 0x167   : > { %1855 = vst.msk [vmem:[#allocation2 + $0x58] sm:$0xf] %vm1805_vm14, %v1700_v2  ;;  %v1838_v2 = vld [vmem:[#allocation2 + $0x3c] sm:$0xf]  ;;  %1869 = vst.msk [vmem:[#allocation2 + $0x70] sm:$0xf] %vm1805_vm14, %v1712_v33  ;;  %1751 = vrot.lane.b32.xlu0 %v1650_v61, %s7336_s11 }
 0x168   : > { %1809 = vst [vmem:[#allocation2 + $0xc] sm:$0xf] %v1808_v47  ;;  %v944_v21 = vrot.slane %v11003_v30, 4  ;;  %v11004_v54 = vld [vmem:[#allocation37_spill] sm:$0xff]  ;;  %2951 = vrot.lane.b32.xlu1 %v8551_v19, %s7337_s18  ;;  %v3526_v25 = vsel %vm3343_vm3, %v7289_v3, 0  ;;  %v11006_v20 = vld [vmem:[#allocation15_spill] sm:$0xff] }
 0x169   : > { %v978_v32 = vrot.slane %v11004_v54, 4  ;;  %1854 = vst [vmem:[#allocation2 + $0x54] sm:$0xf] %v1853_v0  ;;  %v1839_v57 = vsel %vm7847_vm15, %v11006_v20, %v1838_v2  ;;  %v1831_v15 = vld [vmem:[#allocation2 + $0x30] sm:$0xf]  ;;  %v1653_v6 = vshrl.u32 %v8688_v28, 16  ;;  %6951 = vmatpush3.bf16.msra.mxu1 %v3526_v25  ;;  %v1718_v2 = vpop.permute.xlu0 %1717 }
 0x16a   : > { %1840 = vst [vmem:[#allocation2 + $0x3c] sm:$0xf] %v1839_v57  ;;  %v1817_v18 = vld [vmem:[#allocation2 + $0x18] sm:$0xf]  ;;  %v7294_v19 = vld [vmem:[%s10835_s7 + $0x24] sm:$0xff]   ;;  %v7338_v33 = vmov 0   ;;  %6952 = vmatprep.subr.bf16.mxu1 %v7290_v40 }
 0x16b   : > { %v11007_v27 = vld [vmem:[#allocation27_spill] sm:$0xff]  ;;  %v11008_v55 = vld [vmem:[#allocation28_spill] sm:$0xff]  ;;  %375 = vst.msk [vmem:[#allocation2] sm:$0xf] %vm374_vm4, %v7338_v33  ;;  %376 = vst.msk [vmem:[#allocation2 + $0x4] sm:$0xf] %vm374_vm4, %v7338_v33  ;;  %1741 = vrot.lane.b32.xlu0 %v1625_v23, %s7336_s11 }
 0x16c   : > { %v1148_v62 = vrot.slane %v11007_v27, 4  ;;  %v1131_v49 = vrot.slane %v11008_v55, 4  ;;  %378 = vst.msk [vmem:[#allocation2 + $0x8] sm:$0x1] %vm377_vm6, %v7338_v33  ;;  %382 = vst.msk [vmem:[#allocation2 + $0xd4] sm:$0x1] %vm377_vm6, %v7338_v33  ;;  %2939 = vrot.lane.b32.xlu1 %v8575_v35, %s7337_s18 }
 0x16d   : > { %380 = vst.msk [vmem:[#allocation2 + $0xcc] sm:$0xf] %vm374_vm4, %v7338_v33  ;;  %381 = vst.msk [vmem:[#allocation2 + $0xd0] sm:$0xf] %vm374_vm4, %v7338_v33  ;;  %v3345_v61 = vsel %vm3343_vm3, %v7291_v36, 0  ;;  %v11009_v59 = vld [vmem:[#allocation22_spill] sm:$0xff]  ;;  %6953 = vmatpush3.bf16.msra.mxu1 %v7290_v40 }
 0x16e   : > { %v1088_v8 = vsel %vm7481_vm5, %v1080_v60, %v11009_v59  ;;  %v11010_v3 = vld [vmem:[#allocation30_spill] sm:$0xff]  ;;  %v11011_v41 = vld [vmem:[#allocation41_spill] sm:$0xff]  ;;  %v2836_v47 = vshll.u32 %v8513_v38, 16  ;;  %6915 = vmatpush3.bf16.msra.mxu0 %v3345_v61  ;;  %v1859_v36 = vld [vmem:[#allocation2 + $0x60] sm:$0xf]  ;;  %v2819_v60 = vshll.u32 %v8389_v42, 16 }
 0x16f   : > { %v1182_v22 = vrot.slane %v11010_v3, 4  ;;  %v1046_v24 = vrot.slane %v11011_v41, 4  ;;  %1311 = vst.msk [vmem:[#allocation2 + $0x7c] sm:$0xf] %vm1240_vm10, %v1088_v8  ;;  %v11012_v30 = vld [vmem:[#allocation13_spill] sm:$0xff]  ;;  %v11013_v46 = vld [vmem:[#allocation39_spill] sm:$0xff]  ;;  %6916 = vmatprep.subr.bf16.mxu0 %v7294_v19 }
 0x170   : > { %v1832_v54 = vsel %vm7847_vm15, %v11012_v30, %v1831_v15  ;;  %v1012_v0 = vrot.slane %v11013_v46, 4  ;;  %v1656_v38 = vshll.u32 %v8688_v28, 16  ;;  %1876 = vst.msk [vmem:[#allocation2 + $0x7c] sm:$0xf] %vm1805_vm14, %v1718_v2  ;;  %v11014_v25 = vld [vmem:[#allocation12_spill] sm:$0xff]  ;;  %v1642_v15 = vsel %vm7481_vm5, %v1634_v10, %v1641_v1  ;;  %v11015_v42 = vld [vmem:[#allocation38_spill] sm:$0xff] }
 0x171   : > { %1833 = vst [vmem:[#allocation2 + $0x30] sm:$0xf] %v1832_v54  ;;  %v1818_v20 = vsel %vm7847_vm15, %v11014_v25, %v1817_v18  ;;  %v1845_v57 = vld [vmem:[#allocation2 + $0x48] sm:$0xf]  ;;  %v8747_v27 = vrot.slane %v1653_v6, 7  ;;  %v986_v35 = vsel %vm7481_vm5, %v978_v32, %v11015_v42  ;;  %v11016_v28 = vld [vmem:[#allocation36_spill] sm:$0xff]  ;;  %v2821_v10 = vor.u32 %v2819_v60, %v8535_v39  ;;  %1747 = vrot.lane.b32.xlu0 %v1642_v15, %s7336_s11 }
 0x172   : > { %1819 = vst [vmem:[#allocation2 + $0x18] sm:$0xf] %v1818_v20  ;;  %v952_v23 = vsel %vm7481_vm5, %v944_v21, %v11016_v28  ;;  %v8758_v18 = vld [vmem:[%s10835_s7 + $0x50] ss:$0 sps:$4 sm:$0xff]   ;;  %v11017_v55 = vld [vmem:[#allocation32_spill] sm:$0xff]  ;;  %v2838_v61 = vor.u32 %v2836_v47, %v8567_v52  ;;  %6917 = vmatpush3.bf16.msra.mxu0 %v7294_v19  ;;  %v11020_v59 = vld [vmem:[#allocation17_spill] sm:$0xff] }
 0x173   : > { %v1165_v33 = vrot.slane %v11017_v55, 4  ;;  %1269 = vst.msk [vmem:[#allocation2 + $0x34] sm:$0xf] %vm1240_vm10, %v986_v35  ;;  %1255 = vst.msk [vmem:[#allocation2 + $0x1c] sm:$0xf] %vm1240_vm10, %v952_v23  ;;  %v11018_v1 = vld [vmem:[#allocation26_spill] sm:$0xff]  ;;  %2955 = vrot.lane.b32.xlu1 %v2821_v10, %s7337_s18  ;;  %v1658_v30 = vor.u32 %v1656_v38, %v8747_v27  ;;  %7246 = vmatprep.subr.msk.bf16.mxu0 %vm3343_vm3, %v8758_v18 }
 0x174   : > { %v1105_v21 = vsel %vm7481_vm5, %v1097_v37, %v11018_v1  ;;  %v11019_v32 = vld [vmem:[#allocation20_spill] sm:$0xff]  ;;  %1834 = vst.msk [vmem:[#allocation2 + $0x34] sm:$0xf] %vm1805_vm14, %v11020_v59  ;;  %v11021_v39 = vld [vmem:[#allocation14_spill] sm:$0xff]  ;;  %v11023_v40 = vld [vmem:[#allocation25_spill] sm:$0xff]  ;;  %v1651_v2 = vrot.slane %v8610_v48, 4 }
 0x175   : > { %v1860_v6 = vsel %vm7847_vm15, %v11019_v32, %v1859_v36  ;;  %1820 = vst.msk [vmem:[#allocation2 + $0x1c] sm:$0xf] %vm1805_vm14, %v11021_v39  ;;  %v11022_v14 = vld [vmem:[#allocation16_spill] sm:$0xff]  ;;  %v1122_v52 = vsel %vm7481_vm5, %v1114_v7, %v11023_v40  ;;  %v11024_v19 = vld [vmem:[#allocation42_spill] sm:$0xff]  ;;  %v11026_v41 = vld [vmem:[#allocation31_spill] sm:$0xff]  ;;  %vm3294_vm6 = vcmask 195584   ;;  %2961 = vrot.lane.b32.xlu0 %v2838_v61, %s7337_s18 }
 0x176   : > { %1318 = vst.msk [vmem:[#allocation2 + $0x88] sm:$0xf] %vm1240_vm10, %v1105_v21  ;;  %1861 = vst [vmem:[#allocation2 + $0x60] sm:$0xf] %v1860_v6  ;;  %v1846_v37 = vsel %vm7847_vm15, %v11022_v14, %v1845_v57  ;;  %v1054_v8 = vsel %vm7481_vm5, %v1046_v24, %v11024_v19  ;;  %v11025_v3 = vld [vmem:[#allocation40_spill] sm:$0xff]  ;;  %v1139_v7 = vsel %vm7481_vm5, %v1131_v49, %v11026_v41  ;;  %v11027_v47 = vld [vmem:[#allocation29_spill] sm:$0xff] }
 0x177   : > { %1847 = vst [vmem:[#allocation2 + $0x48] sm:$0xf] %v1846_v37  ;;  %1325 = vst.msk [vmem:[#allocation2 + $0x94] sm:$0xf] %vm1240_vm10, %v1122_v52  ;;  %v1020_v50 = vsel %vm7481_vm5, %v1012_v0, %v11025_v3  ;;  %v1156_v24 = vsel %vm7481_vm5, %v1148_v62, %v11027_v47  ;;  %v8804_v54 = vld [vmem:[#allocation2] sm:$0xf]  ;;  %2957 = vrot.lane.b32.xlu1 %v8594_v17, %s7337_s18 }
 0x178   : > { %1297 = vst.msk [vmem:[#allocation2 + $0x64] sm:$0xf] %vm1240_vm10, %v1054_v8  ;;  %v8806_v36 = vld [vmem:[#allocation2 + $0x4] sm:$0xf]  ;;  %v11028_v46 = vld [vmem:[#allocation23_spill] sm:$0xff]  ;;  %v11030_v49 = vld [vmem:[#allocation34_spill] sm:$0xff] }
 0x179   : > { %1862 = vst.msk [vmem:[#allocation2 + $0x64] sm:$0xf] %vm1805_vm14, %v11028_v46  ;;  %v11029_v62 = vld [vmem:[#allocation35_spill] sm:$0xff]  ;;  %v1190_v0 = vsel %vm7481_vm5, %v1182_v22, %v11030_v49  ;;  %v6301_v60 = vcombine.low %v8804_v54, %v8806_v36  ;;  %v11031_v38 = vld [vmem:[#allocation21_spill] sm:$0xff]  ;;  %v2853_v25 = vshll.u32 %v8347_v56, 16  ;;  %v1659_v22 = vsel %vm7481_vm5, %v1651_v2, %v1658_v30  ;;  %v11037_v23 = vld [vmem:[#allocation46_spill] sm:$0xff] }
 0x17a   : > { %1283 = vst.msk [vmem:[#allocation2 + $0x4c] sm:$0xf] %vm1240_vm10, %v1020_v50  ;;  %1332 = vst.msk [vmem:[#allocation2 + $0xa0] sm:$0xf] %vm1240_vm10, %v1139_v7  ;;  %v1173_v48 = vsel %vm7481_vm5, %v1165_v33, %v11029_v62  ;;  %v2870_v20 = vshll.u32 %v8524_v31, 16  ;;  %1753 = vrot.lane.b32.xlu0 %v1659_v22, %s7336_s11  ;;  %v11032_v17 = vld [vmem:[#allocation7_spill] sm:$0xff] }
 0x17b   : > { %1339 = vst.msk [vmem:[#allocation2 + $0xac] sm:$0xf] %vm1240_vm10, %v1156_v24  ;;  %1346 = vst.msk [vmem:[#allocation2 + $0xb8] sm:$0xf] %vm1240_vm10, %v1173_v48  ;;  %6954 = vmatprep.mubr.msk.bf16.mxu1 %vm3294_vm6, %v6301_v60  ;;  %v2855_v57 = vor.u32 %v2853_v25, %v8418_v45  ;;  %v1405_v44 = vrot.slane %v11032_v17, 4  ;;  %v11033_v31 = vld [vmem:[#allocation8_spill] sm:$0xff] }
 0x17c   : > { %1848 = vst.msk [vmem:[#allocation2 + $0x4c] sm:$0xf] %vm1805_vm14, %v11031_v38  ;;  %v2872_v56 = vor.u32 %v2870_v20, %v8587_v51  ;;  %v1439_v45 = vrot.slane %v11033_v31, 4  ;;  %v11034_v51 = vld [vmem:[#allocation4_spill] sm:$0xff]  ;;  %v11035_v42 = vld [vmem:[#allocation3_spill] sm:$0xff]  ;;  %v11038_v55 = vld [vmem:[#allocation5_spill] sm:$0xff] }
 0x17d   : > { %1353 = vst.msk [vmem:[#allocation2 + $0xc4] sm:$0xf] %vm1240_vm10, %v1190_v0  ;;  %2967 = vrot.lane.b32.xlu1 %v2855_v57, %s7337_s18  ;;  %v1456_v15 = vrot.slane %v11034_v51, 4  ;;  %v1422_v35 = vrot.slane %v11035_v42, 4  ;;  %v1490_v33 = vrot.slane %v11038_v55, 4  ;;  %vm3027_vm5 = vcmask 191616  }
 0x17e   : > { %2973 = vrot.lane.b32.xlu0 %v2872_v56, %s7337_s18  ;;  %v2644_v10 = vrot.slane %v8402_v13, 4  ;;  %vm8871_vm7 = vmand %vm3027_vm5, %vm435_vm8  ;;  %v11041_v21 = vld [vmem:[#allocation10_spill] sm:$0xff]  ;;  %v3046_v61 = vld [vmem:[#allocation2 + $0x24] sm:$0xf]  ;;  %v2712_v0 = vrot.slane %v8491_v63, 4  ;;  %vm3034_vm0 = vcmask 188544  }
 0x17f   : > { %v1507_v32 = vrot.slane %v11041_v21, 4  ;;  %v11042_v59 = vld [vmem:[#allocation43_spill] sm:$0xff]  ;;  %v11043_v13 = vld [vmem:[#allocation6_spill] sm:$0xff]  ;;  %v3029_v52 = vld [vmem:[#allocation2 + $0xc] sm:$0xf] }
 0x180   : > { %v2661_v39 = vrot.slane %v11042_v59, 4  ;;  %v1524_v37 = vrot.slane %v11043_v13, 4  ;;  %v11044_v19 = vld [vmem:[#allocation51_spill] sm:$0xff]  ;;  %v11046_v47 = vld [vmem:[#allocation48_spill] sm:$0xff]  ;;  %v11047_v30 = vld [vmem:[#allocation18_spill] sm:$0xff] }
 0x181   : > { %2963 = vrot.lane.b32.xlu1 %v8622_v16, %s7337_s18  ;;  %v8855_v16 = vld [vmem:[%s10835_s7 + $0x14] ss:$0 sps:$4 sm:$0xff]   ;;  %v2678_v8 = vrot.slane %v11044_v19, 4  ;;  %v11045_v50 = vld [vmem:[#allocation11_spill] sm:$0xff]  ;;  %v2695_v24 = vrot.slane %v11046_v47, 4  ;;  %v1558_v46 = vrot.slane %v11047_v30, 4  ;;  %vm9476_vm1 = vmand %vm3034_vm0, %vm385_vm2 }
 0x182   : > { %1665 = vrot.lane.b32.xlu0 %v1405_v44, %s7336_s11  ;;  %7247 = vmatprep.subr.msk.bf16.mxu1 %vm3343_vm3, %v8855_v16  ;;  %v1541_v41 = vrot.slane %v11045_v50, 4  ;;  %v11048_v22 = vld [vmem:[#allocation44_spill] sm:$0xff]  ;;  %v3074_v17 = vld [vmem:[#allocation2 + $0x54] sm:$0xf]  ;;  %v11049_v44 = vld [vmem:[#allocation47_spill] sm:$0xff]  ;;  %v4403_v13 = vsel %vm3343_vm3, %v8855_v16, 0 }
 0x183   : > { %v1575_v20 = vrot.slane %v11048_v22, 4  ;;  %v2729_v31 = vrot.slane %v11049_v44, 4  ;;  %vm3906_vm8 = vsmask.f32 3328  ;;  %v3060_v21 = vld [vmem:[#allocation2 + $0x3c] sm:$0xf] }
 0x184   : > { %vm8915_vm10 = vmor %vm3906_vm8, %vm3907_vm9  ;;  %v3088_v44 = vld [vmem:[#allocation2 + $0x6c] sm:$0xf] }
 0x185   : > { %2969 = vrot.lane.b32.xlu1 %v8646_v29, %s7337_s18  ;;  %v11036_v29 = vld [vmem:[#allocation9_spill] sm:$0xff] }
 0x186   : > { %1677 = vrot.lane.b32.xlu0 %v1439_v45, %s7336_s11  ;;  %v1473_v28 = vrot.slane %v11036_v29, 4 }
 0x189   : > { %2975 = vrot.lane.b32.xlu1 %v8658_v53, %s7337_s18  ;;  %v2627_v53 = vrot.slane %v11037_v23, 4 }
 0x18a   : > { %1683 = vrot.lane.b32.xlu0 %v1456_v15, %s7336_s11 }
 0x18d   : > { %1671 = vrot.lane.b32.xlu1 %v1422_v35, %s7336_s11 }
 0x18e   : > { %1689 = vrot.lane.b32.xlu0 %v1473_v28, %s7336_s11  ;;  %v11050_v28 = vld [vmem:[#allocation45_spill] sm:$0xff] }
 0x18f   : > { %v1592_v23 = vrot.slane %v11050_v28, 4 }
 0x191   : > { %2887 = vrot.lane.b32.xlu1 %v2627_v53, %s7337_s18  ;;  %v2896_v6 = vpop.permute.xlu1 %2895 }
 0x192   : > { %1695 = vrot.lane.b32.xlu0 %v1490_v33, %s7336_s11  ;;  %v3047_v14 = vsel %vm8871_vm7, %v2896_v6, %v3046_v61 }
 0x193   : > { %3048 = vst [vmem:[#allocation2 + $0x24] sm:$0xf] %v3047_v14 }
 0x195   : > { %2893 = vrot.lane.b32.xlu1 %v2644_v10, %s7337_s18  ;;  %v2884_v40 = vpop.permute.xlu1 %2883 }
 0x196   : > { %1701 = vrot.lane.b32.xlu0 %v1507_v32, %s7336_s11  ;;  %v3030_v3 = vsel %vm8871_vm7, %v2884_v40, %v3029_v52  ;;  %v2746_v32 = vrot.slane %v8487_v34, 4  ;;  %v11053_v34 = vld [vmem:[#allocation52_spill] sm:$0xff] }
 0x197   : > { %3031 = vst [vmem:[#allocation2 + $0xc] sm:$0xf] %v3030_v3  ;;  %v1609_v40 = vrot.slane %v11053_v34, 4 }
 0x199   : > { %2899 = vrot.lane.b32.xlu1 %v2661_v39, %s7337_s18  ;;  %v2898_v7 = vpop.permute.xlu1 %2897 }
 0x19a   : > { %1707 = vrot.lane.b32.xlu0 %v1524_v37, %s7336_s11  ;;  %3049 = vst.msk [vmem:[#allocation2 + $0x28] sm:$0xf] %vm3027_vm5, %v2898_v7  ;;  %v8890_v2 = vld [vmem:[#allocation2 + $0x24] sm:$0xf]  ;;  %v7314_v37 = vld [vmem:[%s10835_s7 + $0xc] sm:$0xff]  }
 0x19b   : > { %v3982_v62 = vshrl.u32 %v8890_v2, 16  ;;  %v3985_v48 = vshll.u32 %v8890_v2, 16 }
 0x19d   : > { %2905 = vrot.lane.b32.xlu1 %v2678_v8, %s7337_s18  ;;  %v3984_v60 = vrot.slane %v3982_v62, 4  ;;  %v3987_v38 = vrot.slane %v3985_v48, 5  ;;  %v11054_v8 = vld [vmem:[#allocation50_spill] sm:$0xff] }
 0x19e   : > { %1713 = vrot.lane.b32.xlu0 %v1541_v41, %s7336_s11  ;;  %v2886_v49 = vpop.permute.xlu1 %2885  ;;  %v8899_v25 = vld [vmem:[#allocation2 + $0xc] sm:$0xf]  ;;  %v2763_v3 = vrot.slane %v11054_v8, 4  ;;  %v6426_v41 = vrot.slane %v8890_v2, 9 }
 0x19f   : > { %3033 = vst.msk [vmem:[#allocation2 + $0x10] sm:$0xf] %vm3027_vm5, %v2886_v49  ;;  %v3934_v57 = vshrl.u32 %v8899_v25, 16  ;;  %v3937_v56 = vshll.u32 %v8899_v25, 16  ;;  %v3988_v42 = vor.u32 %v3987_v38, %v3984_v60 }
 0x1a1   : > { %2911 = vrot.lane.b32.xlu1 %v2695_v24, %s7337_s18  ;;  %v3936_v45 = vrot.slane %v3934_v57, 4  ;;  %v3939_v51 = vrot.slane %v3937_v56, 5  ;;  %v8907_v15 = vld [vmem:[#allocation2 + $0x28] sm:$0xf]  ;;  %v8924_v61 = vrot.slane %v3988_v42, 4  ;;  %v1643_v56 = vrot.slane %v8674_v43, 4 }
 0x1a2   : > { %1719 = vrot.lane.b32.xlu0 %v1558_v46, %s7336_s11  ;;  %v2920_v63 = vpop.permute.xlu1 %2919  ;;  %v3991_v29 = vshll.u32 %v8907_v15, 16  ;;  %v10873_v7 = vrot.slane %v8907_v15, 5  ;;  %v1626_v46 = vrot.slane %v8613_v26, 4 }
 0x1a3   : > { %v3075_v35 = vsel %vm8871_vm7, %v2920_v63, %v3074_v17  ;;  %v3940_v53 = vor.u32 %v3939_v51, %v3936_v45  ;;  %v3053_v51 = vld [vmem:[#allocation2 + $0x30] sm:$0xf] }
 0x1a4   : > { %3076 = vst [vmem:[#allocation2 + $0x54] sm:$0xf] %v3075_v35  ;;  %v8919_v33 = vrot.slane %v3991_v29, 5  ;;  %v8972_v49 = vsel %vm8959_vm13, %v6426_v41, %v10873_v7 }
 0x1a5   : > { %2917 = vrot.lane.b32.xlu1 %v2712_v0, %s7337_s18  ;;  %v8944_v19 = vrot.slane %v3940_v53, 4  ;;  %v2780_v0 = vrot.slane %v8527_v9, 4 }
 0x1a6   : > { %1725 = vrot.lane.b32.xlu0 %v1575_v20, %s7336_s11  ;;  %v2908_v10 = vpop.permute.xlu1 %2907  ;;  %v8922_v6 = vld [vmem:[#allocation2 + $0x10] sm:$0xf]  ;;  %v6424_v20 = vrot.slane %v8899_v25, 9 }
 0x1a7   : > { %v3061_v59 = vsel %vm8871_vm7, %v2908_v10, %v3060_v21  ;;  %v6267_v39 = vcombine.low %v8899_v25, %v8922_v6  ;;  %v3943_v14 = vshll.u32 %v8922_v6, 16  ;;  %v10875_v26 = vrot.slane %v8922_v6, 5 }
 0x1a8   : > { %3062 = vst [vmem:[#allocation2 + $0x3c] sm:$0xf] %v3061_v59  ;;  %v1660_v10 = vrot.slane %v8747_v27, 4 }
 0x1a9   : > { %2923 = vrot.lane.b32.xlu1 %v2729_v31, %s7337_s18  ;;  %6918 = vmatprep.mubr.msk.bf16.mxu0 %vm3294_vm6, %v6267_v39  ;;  %v8946_v16 = vrot.slane %v3943_v14, 5  ;;  %v8989_v25 = vsel %vm8959_vm13, %v6424_v20, %v10875_v26  ;;  %v11057_v31 = vld [vmem:[#allocation49_spill] sm:$0xff]  ;;  %v3095_v26 = vld [vmem:[#allocation2 + $0x78] sm:$0xf] }
 0x1aa   : > { %1731 = vrot.lane.b32.xlu0 %v1592_v23, %s7336_s11  ;;  %6955 = vmatmul.mubr.msk.bf16.vlgmr.msra.gmra.mxu1 %vm3294_vm6, %v6267_v39  ;;  %v2922_v50 = vpop.permute.xlu1 %2921  ;;  %v2797_v63 = vrot.slane %v11057_v31, 4 }
 0x1ab   : > { %7023 = vmatpush3.bf16.msra.mxu1 %v4403_v13  ;;  %3077 = vst.msk [vmem:[#allocation2 + $0x58] sm:$0xf] %vm3027_vm5, %v2922_v50  ;;  %v8953_v47 = vld [vmem:[#allocation2 + $0x54] sm:$0xf]  ;;  %v3039_v13 = vld [vmem:[#allocation2 + $0x18] sm:$0xf] }
 0x1ac   : > { %7024 = vmatprep.subr.bf16.mxu1 %v7314_v37  ;;  %v4078_v62 = vshrl.u32 %v8953_v47, 16  ;;  %v4081_v48 = vshll.u32 %v8953_v47, 16 }
 0x1ad   : > { %2929 = vrot.lane.b32.xlu1 %v2746_v32, %s7337_s18  ;;  %v11058_v32 = vld [vmem:[#allocation53_spill] sm:$0xff] }
 0x1ae   : > { %1737 = vrot.lane.b32.xlu0 %v1609_v40, %s7336_s11  ;;  %v2910_v60 = vpop.permute.xlu1 %2909  ;;  %v4080_v38 = vrot.slane %v4078_v62, 4  ;;  %v4083_v22 = vrot.slane %v4081_v48, 5  ;;  %v2814_v59 = vrot.slane %v11058_v32, 4  ;;  %v1894_v62 = vld [vmem:[#allocation2 + $0x9c] sm:$0xf] }
 0x1af   : > { %7025 = vmatpush3.bf16.msra.mxu1 %v7314_v37  ;;  %3063 = vst.msk [vmem:[#allocation2 + $0x40] sm:$0xf] %vm3027_vm5, %v2910_v60  ;;  %v8978_v57 = vld [vmem:[#allocation2 + $0x3c] sm:$0xf]  ;;  %v2865_v60 = vrot.slane %v8579_v4, 4  ;;  %v6430_v4 = vrot.slane %v8953_v47, 9 }
 0x1b0   : > { %v4030_v9 = vshrl.u32 %v8978_v57, 16  ;;  %v4033_v17 = vshll.u32 %v8978_v57, 16  ;;  %v4084_v28 = vor.u32 %v4083_v22, %v4080_v38  ;;  %v2831_v38 = vrot.slane %v8541_v58, 4 }
 0x1b1   : > { %2935 = vrot.lane.b32.xlu1 %v2763_v3, %s7337_s18  ;;  %v2902_v42 = vpop.permute.xlu0 %2901 }
 0x1b2   : > { %1743 = vrot.lane.b32.xlu0 %v1626_v46, %s7336_s11  ;;  %v2932_v45 = vpop.permute.xlu1 %2931  ;;  %v8992_v35 = vld [vmem:[#allocation2 + $0x58] sm:$0xf]  ;;  %v4032_v29 = vrot.slane %v4030_v9, 4  ;;  %v4035_v43 = vrot.slane %v4033_v17, 5  ;;  %v3054_v53 = vsel %vm8871_vm7, %v2902_v42, %v3053_v51  ;;  %v9005_v40 = vrot.slane %v4084_v28, 4 }
 0x1b3   : > { %v3089_v23 = vsel %vm8871_vm7, %v2932_v45, %v3088_v44  ;;  %3055 = vst [vmem:[#allocation2 + $0x30] sm:$0xf] %v3054_v53  ;;  %v4087_v21 = vshll.u32 %v8992_v35, 16  ;;  %v10869_v22 = vrot.slane %v8992_v35, 5  ;;  %v1901_v45 = vld [vmem:[#allocation2 + $0xa8] sm:$0xf] }
 0x1b4   : > { %3090 = vst [vmem:[#allocation2 + $0x6c] sm:$0xf] %v3089_v23  ;;  %v4036_v39 = vor.u32 %v4035_v43, %v4032_v29  ;;  %11059 = vst [vmem:[#allocation24_spill] sm:$0xff] %v9005_v40  ;;  %v2848_v51 = vrot.slane %v8569_v12, 4 }
 0x1b5   : > { %2941 = vrot.lane.b32.xlu1 %v2780_v0, %s7337_s18  ;;  %v2890_v37 = vpop.permute.xlu0 %2889  ;;  %v9007_v8 = vrot.slane %v4087_v21, 5  ;;  %v9049_v42 = vsel %vm8959_vm13, %v6430_v4, %v10869_v22 }
 0x1b6   : > { %1749 = vrot.lane.b32.xlu0 %v1643_v56, %s7336_s11  ;;  %v2934_v14 = vpop.permute.xlu1 %2933  ;;  %v9003_v34 = vld [vmem:[#allocation2 + $0x40] sm:$0xf]  ;;  %v3040_v3 = vsel %vm8871_vm7, %v2890_v37, %v3039_v13  ;;  %v9019_v41 = vrot.slane %v4036_v39, 4  ;;  %11060 = vst [vmem:[#allocation33_spill] sm:$0xff] %v9049_v42  ;;  %v3910_v42 = vshrl.u32 %v8804_v54, 16 }
 0x1b7   : > { %3091 = vst.msk [vmem:[#allocation2 + $0x70] sm:$0xf] %vm3027_vm5, %v2934_v14  ;;  %v4039_v27 = vshll.u32 %v9003_v34, 16  ;;  %3041 = vst [vmem:[#allocation2 + $0x18] sm:$0xf] %v3040_v3  ;;  %v2882_v3 = vrot.slane %v8589_v11, 4 }
 0x1b8   : > { %v3081_v37 = vld [vmem:[#allocation2 + $0x60] sm:$0xf]  ;;  %v9076_v11 = vld [vmem:[%s10835_s7 + $0x5c] ss:$0 sps:$4 sm:$0xff]  }
 0x1b9   : > { %2947 = vrot.lane.b32.xlu1 %v2797_v63, %s7337_s18  ;;  %v9021_v46 = vrot.slane %v4039_v27, 5  ;;  %v1734_v48 = vpop.permute.xlu0 %1733  ;;  %7249 = vmatprep.subr.msk.bf16.mxu1 %vm3343_vm3, %v9076_v11 }
 0x1ba   : > { %1755 = vrot.lane.b32.xlu0 %v1660_v10, %s7336_s11  ;;  %v2904_v0 = vpop.permute.xlu1 %2903  ;;  %v1895_v20 = vsel %vm7847_vm15, %v1734_v48, %v1894_v62  ;;  %v9029_v56 = vld [vmem:[#allocation2 + $0x30] sm:$0xf] }
 0x1bb   : > { %3056 = vst.msk [vmem:[#allocation2 + $0x34] sm:$0xf] %vm3027_vm5, %v2904_v0  ;;  %v9031_v9 = vld [vmem:[#allocation2 + $0x6c] sm:$0xf]  ;;  %1896 = vst [vmem:[#allocation2 + $0x9c] sm:$0xf] %v1895_v20 }
 0x1bc   : > { %v4006_v58 = vshrl.u32 %v9029_v56, 16  ;;  %v4009_v44 = vshll.u32 %v9029_v56, 16  ;;  %v4126_v31 = vshrl.u32 %v9031_v9, 16  ;;  %v4129_v63 = vshll.u32 %v9031_v9, 16 }
 0x1bd   : > { %2953 = vrot.lane.b32.xlu1 %v2814_v59, %s7337_s18  ;;  %v1740_v29 = vpop.permute.xlu0 %1739 }
 0x1be   : > { %2971 = vrot.lane.b32.xlu0 %v2865_v60, %s7337_s18  ;;  %v2892_v43 = vpop.permute.xlu1 %2891  ;;  %v9051_v28 = vld [vmem:[#allocation2 + $0x70] sm:$0xf]  ;;  %v4128_v23 = vrot.slane %v4126_v31, 4  ;;  %v4131_v53 = vrot.slane %v4129_v63, 5  ;;  %v4008_v10 = vrot.slane %v4006_v58, 4  ;;  %v4011_v21 = vrot.slane %v4009_v44, 5 }
 0x1bf   : > { %v1902_v32 = vsel %vm7847_vm15, %v1740_v29, %v1901_v45  ;;  %3042 = vst.msk [vmem:[#allocation2 + $0x1c] sm:$0xf] %vm3027_vm5, %v2892_v43  ;;  %v9056_v12 = vld [vmem:[#allocation2 + $0x18] sm:$0xf]  ;;  %v4135_v59 = vshll.u32 %v9051_v28, 16 }
 0x1c0   : > { %1903 = vst [vmem:[#allocation2 + $0xa8] sm:$0xf] %v1902_v32  ;;  %v3958_v39 = vshrl.u32 %v9056_v12, 16  ;;  %v3961_v14 = vshll.u32 %v9056_v12, 16  ;;  %v4132_v13 = vor.u32 %v4131_v53, %v4128_v23  ;;  %v4012_v20 = vor.u32 %v4011_v21, %v4008_v10  ;;  %v3102_v63 = vld [vmem:[#allocation2 + $0x84] sm:$0xf] }
 0x1c1   : > { %2959 = vrot.lane.b32.xlu1 %v2831_v38, %s7337_s18  ;;  %v9063_v27 = vrot.slane %v4135_v59, 5  ;;  %v2926_v48 = vpop.permute.xlu0 %2925  ;;  %v3067_v43 = vld [vmem:[#allocation2 + $0x48] sm:$0xf]  ;;  %v3711_v10 = vsel %vm3343_vm3, %v8758_v18, 0  ;;  %v9107_v18 = vcombine.low %v8890_v2, %v8907_v15 }
 0x1c2   : > { %v1724_v62 = vpop.permute.xlu1 %1723  ;;  %v9065_v0 = vld [vmem:[#allocation2 + $0x34] sm:$0xf]  ;;  %v3960_v60 = vrot.slane %v3958_v39, 4  ;;  %v3963_v38 = vrot.slane %v3961_v14, 5  ;;  %v9067_v4 = vrot.slane %v4132_v13, 4  ;;  %v3082_v58 = vsel %vm8871_vm7, %v2926_v48, %v3081_v37  ;;  %v7304_v14 = vld [vmem:[%s10835_s7 + $0x48] sm:$0xff]  }
 0x1c3   : > { %11061 = vst [vmem:[#allocation37_spill] sm:$0xff] %v9063_v27  ;;  %1883 = vst.msk [vmem:[#allocation2 + $0x88] sm:$0xf] %vm1805_vm14, %v1724_v62  ;;  %v4015_v44 = vshll.u32 %v9065_v0, 16  ;;  %v9091_v21 = vrot.slane %v4012_v20, 4  ;;  %v9125_v2 = vcombine.low %v9029_v56, %v9065_v0  ;;  %v6425_v37 = vrot.slane %v9056_v12, 9 }
 0x1c4   : > { %11062 = vst [vmem:[#allocation19_spill] sm:$0xff] %v9067_v4  ;;  %3083 = vst [vmem:[#allocation2 + $0x60] sm:$0xf] %v3082_v58  ;;  %v3964_v45 = vor.u32 %v3963_v38, %v3960_v60  ;;  %v9136_v20 = vld [vmem:[%s10835_s7 + $0x38] ss:$0 sps:$4 sm:$0xff]  }
 0x1c5   : > { %2965 = vrot.lane.b32.xlu1 %v2848_v51, %s7337_s18  ;;  %v9083_v51 = vrot.slane %v4015_v44, 5  ;;  %v2914_v23 = vpop.permute.xlu0 %2913  ;;  %v6427_v44 = vrot.slane %v9029_v56, 9  ;;  %v6432_v56 = vrot.slane %v9031_v9, 9 }
 0x1c6   : > { %v2944_v29 = vpop.permute.xlu1 %2943  ;;  %v9087_v53 = vld [vmem:[#allocation2 + $0x1c] sm:$0xf]  ;;  %v3068_v59 = vsel %vm8871_vm7, %v2914_v23, %v3067_v43  ;;  %v10871_v43 = vrot.slane %v9003_v34, 5 }
 0x1c7   : > { %v3103_v32 = vsel %vm8871_vm7, %v2944_v29, %v3102_v63  ;;  %v9099_v39 = vcombine.low %v9056_v12, %v9087_v53  ;;  %v3967_v13 = vshll.u32 %v9087_v53, 16  ;;  %3069 = vst [vmem:[#allocation2 + $0x48] sm:$0xf] %v3068_v59  ;;  %v10872_v63 = vrot.slane %v9065_v0, 5  ;;  %v1908_v59 = vld [vmem:[#allocation2 + $0xb4] sm:$0xf] }
 0x1c8   : > { %3104 = vst [vmem:[#allocation2 + $0x84] sm:$0xf] %v3103_v32  ;;  %v10870_v32 = vrot.slane %v9051_v28, 5  ;;  %v10874_v50 = vrot.slane %v9087_v53, 5 }
 0x1c9   : > { %2977 = vrot.lane.b32.xlu1 %v2882_v3, %s7337_s18  ;;  %6919 = vmatmul.mubr.msk.bf16.vlgmr.msra.gmra.mxu0 %vm3294_vm6, %v9099_v39  ;;  %v9117_v3 = vrot.slane %v3964_v45, 4  ;;  %v9119_v62 = vrot.slane %v3967_v13, 5  ;;  %v1730_v48 = vpop.permute.xlu0 %1729  ;;  %v9153_v23 = vsel %vm8959_vm13, %v6427_v44, %v10872_v63 }
 0x1ca   : > { %6958 = vmatprep.mubr.msk.bf16.mxu1 %vm3294_vm6, %v9099_v39  ;;  %6987 = vmatpush3.bf16.msra.mxu0 %v3711_v10  ;;  %v2928_v60 = vpop.permute.xlu1 %2927  ;;  %1890 = vst.msk [vmem:[#allocation2 + $0x94] sm:$0xf] %vm1805_vm14, %v1730_v48  ;;  %v6428_v10 = vrot.slane %v8978_v57, 9 }
 0x1cb   : > { %6922 = vmatprep.mubr.msk.bf16.mxu0 %vm3294_vm6, %v9107_v18  ;;  %3084 = vst.msk [vmem:[#allocation2 + $0x64] sm:$0xf] %vm3027_vm5, %v2928_v60  ;;  %6959 = vmatmul.mubr.msk.bf16.gmra.mxu1 %vm3294_vm6, %v9107_v18  ;;  %v9131_v38 = vld [vmem:[#allocation2 + $0x60] sm:$0xf] }
 0x1cc   : > { %6988 = vmatprep.subr.bf16.mxu0 %v7304_v14  ;;  %6962 = vmatprep.mubr.msk.bf16.mxu1 %vm3294_vm6, %v9125_v2  ;;  %v4102_v45 = vshrl.u32 %v9131_v38, 16  ;;  %v4105_v29 = vshll.u32 %v9131_v38, 16 }
 0x1cd   : > { %v1746_v13 = vpop.permute.xlu0 %1745 }
 0x1ce   : > { %v2916_v48 = vpop.permute.xlu1 %2915  ;;  %6989 = vmatpush3.bf16.msra.mxu0 %v7304_v14  ;;  %v4104_v60 = vrot.slane %v4102_v45, 4  ;;  %v4107_v31 = vrot.slane %v4105_v29, 5  ;;  %v1909_v22 = vsel %vm7847_vm15, %v1746_v13, %v1908_v59  ;;  %v9162_v44 = vld [vmem:[#allocation2 + $0x48] sm:$0xf]  ;;  %v9173_v14 = vsel %vm8959_vm13, %v6428_v10, %v10871_v43 }
 0x1cf   : > { %3070 = vst.msk [vmem:[#allocation2 + $0x4c] sm:$0xf] %vm3027_vm5, %v2916_v48  ;;  %v9164_v17 = vld [vmem:[#allocation2 + $0x84] sm:$0xf]  ;;  %7248 = vmatprep.subr.msk.bf16.mxu0 %vm3343_vm3, %v9136_v20  ;;  %v9179_v45 = vsel %vm8959_vm13, %v6432_v56, %v10870_v32  ;;  %1910 = vst [vmem:[#allocation2 + $0xb4] sm:$0xf] %v1909_v22  ;;  %v9183_v29 = vcombine.low %v8978_v57, %v9003_v34  ;;  %v9195_v22 = vsel %vm8959_vm13, %v6425_v37, %v10874_v50 }
 0x1d0   : > { %11063 = vst [vmem:[#allocation15_spill] sm:$0xff] %v9179_v45  ;;  %v4054_v59 = vshrl.u32 %v9162_v44, 16  ;;  %v4057_v12 = vshll.u32 %v9162_v44, 16  ;;  %v4174_v10 = vshrl.u32 %v9164_v17, 16  ;;  %v4177_v13 = vshll.u32 %v9164_v17, 16 }
 0x1d1   : > { %6923 = vmatmul.mubr.msk.bf16.gmra.mxu0 %vm3294_vm6, %v9125_v2  ;;  %v3109_v57 = vld [vmem:[#allocation2 + $0x90] sm:$0xf]  ;;  %v2950_v48 = vpop.permute.xlu0 %2949  ;;  %v4108_v63 = vor.u32 %v4107_v31, %v4104_v60  ;;  %v6429_v27 = vrot.slane %v9162_v44, 9 }
 0x1d2   : > { %v2946_v56 = vpop.permute.xlu1 %2945  ;;  %6926 = vmatprep.mubr.msk.bf16.mxu0 %vm3294_vm6, %v9183_v29  ;;  %v9199_v32 = vld [vmem:[#allocation2 + $0x64] sm:$0xf]  ;;  %v4056_v43 = vrot.slane %v4054_v59, 4  ;;  %v4059_v52 = vrot.slane %v4057_v12, 5  ;;  %v3110_v58 = vsel %vm8871_vm7, %v2950_v48, %v3109_v57  ;;  %v4176_v7 = vrot.slane %v4174_v10, 4 }
 0x1d3   : > { %3105 = vst.msk [vmem:[#allocation2 + $0x88] sm:$0xf] %vm3027_vm5, %v2946_v56  ;;  %6963 = vmatmul.mubr.msk.bf16.gmra.mxu1 %vm3294_vm6, %v9183_v29  ;;  %3111 = vst [vmem:[#allocation2 + $0x90] sm:$0xf] %v3110_v58  ;;  %v4111_v37 = vshll.u32 %v9199_v32, 16  ;;  %v4179_v50 = vrot.slane %v4177_v13, 5  ;;  %v9223_v13 = vcombine.low %v8953_v47, %v8992_v35  ;;  %v9239_v47 = vcombine.low %v9131_v38, %v9199_v32 }
 0x1d4   : > { %v4060_v59 = vor.u32 %v4059_v52, %v4056_v43  ;;  %v9209_v31 = vrot.slane %v4108_v63, 4  ;;  %v10881_v48 = vrot.slane %v9199_v32, 5 }
 0x1d5   : > { %v2938_v4 = vpop.permute.xlu0 %2937  ;;  %v9211_v60 = vrot.slane %v4111_v37, 5 }
 0x1d6   : > { %v1736_v24 = vpop.permute.xlu1 %1735  ;;  %v9207_v45 = vld [vmem:[#allocation2 + $0x4c] sm:$0xf]  ;;  %11064 = vst [vmem:[#allocation27_spill] sm:$0xff] %v9209_v31  ;;  %v3096_v12 = vsel %vm8871_vm7, %v2938_v4, %v3095_v26  ;;  %v4180_v26 = vor.u32 %v4179_v50, %v4176_v7  ;;  %v1915_v4 = vld [vmem:[#allocation2 + $0xc0] sm:$0xf]  ;;  %v9243_v57 = vrot.slane %v4060_v59, 4 }
 0x1d7   : > { %11065 = vst [vmem:[#allocation28_spill] sm:$0xff] %v9211_v60  ;;  %1897 = vst.msk [vmem:[#allocation2 + $0xa0] sm:$0xf] %vm1805_vm14, %v1736_v24  ;;  %v9218_v58 = vcombine.low %v9162_v44, %v9207_v45  ;;  %v4063_v10 = vshll.u32 %v9207_v45, 16  ;;  %v10885_v40 = vrot.slane %v9207_v45, 5  ;;  %v3913_v60 = vshll.u32 %v8804_v54, 16 }
 0x1d8   : > { %3097 = vst [vmem:[#allocation2 + $0x78] sm:$0xf] %v3096_v12  ;;  %11067 = vst [vmem:[#allocation30_spill] sm:$0xff] %v9243_v57  ;;  %v6431_v12 = vrot.slane %v9131_v38, 9 }
 0x1d9   : > { %6927 = vmatmul.mubr.msk.bf16.gmra.mxu0 %vm3294_vm6, %v9218_v58  ;;  %6966 = vmatprep.mubr.msk.bf16.mxu1 %vm3294_vm6, %v9218_v58  ;;  %v9233_v24 = vrot.slane %v4063_v10, 5  ;;  %v1752_v63 = vpop.permute.xlu0 %1751 }
 0x1da   : > { %v2952_v43 = vpop.permute.xlu1 %2951  ;;  %6930 = vmatprep.mubr.msk.bf16.mxu0 %vm3294_vm6, %v9223_v13  ;;  %v9241_v56 = vld [vmem:[#allocation2 + $0x88] sm:$0xf]  ;;  %v1916_v37 = vsel %vm7847_vm15, %v1752_v63, %v1915_v4  ;;  %v9252_v50 = vld [vmem:[#allocation2 + $0x90] sm:$0xf]  ;;  %v9265_v63 = vrot.slane %v4180_v26, 4  ;;  %v9271_v38 = vsel %vm8959_vm13, %v6431_v12, %v10881_v48  ;;  %v9285_v12 = vcombine.low %v9031_v9, %v9051_v28 }
 0x1db   : > { %11066 = vst [vmem:[#allocation22_spill] sm:$0xff] %v9241_v56  ;;  %3112 = vst.msk [vmem:[#allocation2 + $0x94] sm:$0xf] %vm3027_vm5, %v2952_v43  ;;  %6967 = vmatmul.mubr.msk.bf16.gmra.mxu1 %vm3294_vm6, %v9223_v13  ;;  %v4183_v7 = vshll.u32 %v9241_v56, 16  ;;  %v4198_v59 = vshrl.u32 %v9252_v50, 16  ;;  %v4201_v5 = vshll.u32 %v9252_v50, 16 }
 0x1dc   : > { %1917 = vst [vmem:[#allocation2 + $0xc0] sm:$0xf] %v1916_v37  ;;  %6970 = vmatprep.mubr.msk.bf16.mxu1 %vm3294_vm6, %v9239_v47  ;;  %11069 = vst [vmem:[#allocation13_spill] sm:$0xff] %v9265_v63 }
 0x1dd   : > { %v9263_v4 = vrot.slane %v4183_v7, 5  ;;  %11070 = vst [vmem:[#allocation39_spill] sm:$0xff] %v9271_v38  ;;  %v1742_v43 = vpop.permute.xlu0 %1741  ;;  %v4200_v52 = vrot.slane %v4198_v59, 4  ;;  %v4203_v31 = vrot.slane %v4201_v5, 5  ;;  %11071 = vst [vmem:[#allocation12_spill] sm:$0xff] %v9285_v12  ;;  %v9293_v5 = vsel %vm8959_vm13, %v6429_v27, %v10885_v40 }
 0x1de   : > { %v2940_v37 = vpop.permute.xlu1 %2939  ;;  %1904 = vst.msk [vmem:[#allocation2 + $0xac] sm:$0xf] %vm1805_vm14, %v1742_v43  ;;  %11072 = vst [vmem:[#allocation38_spill] sm:$0xff] %v9293_v5  ;;  %v3116_v43 = vld [vmem:[#allocation2 + $0x9c] sm:$0xf]  ;;  %v10890_v38 = vrot.slane %v9241_v56, 5 }
 0x1df   : > { %11068 = vst [vmem:[#allocation41_spill] sm:$0xff] %v9263_v4  ;;  %3098 = vst.msk [vmem:[#allocation2 + $0x7c] sm:$0xf] %vm3027_vm5, %v2940_v37  ;;  %v9277_v26 = vld [vmem:[#allocation2 + $0x78] sm:$0xf]  ;;  %v6434_v37 = vrot.slane %v9164_v17, 9  ;;  %v4204_v4 = vor.u32 %v4203_v31, %v4200_v52 }
 0x1e0   : > { %v4150_v59 = vshrl.u32 %v9277_v26, 16  ;;  %v4153_v44 = vshll.u32 %v9277_v26, 16  ;;  %v3923_v52 = vshrl.u32 %v8806_v36, 16 }
 0x1e1   : > { %6931 = vmatmul.mubr.msk.bf16.gmra.mxu0 %vm3294_vm6, %v9239_v47  ;;  %v9315_v31 = vsel %vm8959_vm13, %v6434_v37, %v10890_v38  ;;  %v9323_v54 = vrot.slane %v4204_v4, 4  ;;  %v3146_v38 = vld [vmem:[#allocation2 + $0x8] sm:$0x1] }
 0x1e2   : > { %6934 = vmatprep.mubr.msk.bf16.mxu0 %vm3294_vm6, %v9285_v12  ;;  %v9300_v9 = vld [vmem:[#allocation2 + $0x94] sm:$0xf]  ;;  %v4152_v10 = vrot.slane %v4150_v59, 4  ;;  %v4155_v63 = vrot.slane %v4153_v44, 5  ;;  %11074 = vst [vmem:[#allocation32_spill] sm:$0xff] %v9315_v31 }
 0x1e3   : > { %v1748_v7 = vpop.permute.xlu0 %1747  ;;  %11073 = vst [vmem:[#allocation36_spill] sm:$0xff] %v9300_v9  ;;  %6971 = vmatmul.mubr.msk.bf16.gmra.mxu1 %vm3294_vm6, %v9285_v12  ;;  %v4207_v40 = vshll.u32 %v9300_v9, 16  ;;  %11077 = vst [vmem:[#allocation17_spill] sm:$0xff] %v9323_v54  ;;  %v9355_v4 = vcombine.low %v9252_v50, %v9300_v9  ;;  %v6435_v54 = vrot.slane %v9252_v50, 9 }
 0x1e4   : > { %1911 = vst.msk [vmem:[#allocation2 + $0xb8] sm:$0xf] %vm1805_vm14, %v1748_v7  ;;  %v4156_v7 = vor.u32 %v4155_v63, %v4152_v10  ;;  %v3912_v10 = vrot.slane %v3910_v42, 4  ;;  %v3915_v63 = vrot.slane %v3913_v60, 5  ;;  %v3130_v42 = vld [vmem:[#allocation2 + $0xb4] sm:$0xf] }
 0x1e5   : > { %v2956_v48 = vpop.permute.xlu1 %2955  ;;  %v9319_v59 = vrot.slane %v4207_v40, 5  ;;  %v9335_v40 = vcombine.low %v9164_v17, %v9241_v56 }
 0x1e6   : > { %v3117_v27 = vsel %vm8871_vm7, %v2956_v48, %v3116_v43  ;;  %v3919_v48 = vshll.u32 %v8806_v36, 16  ;;  %v3123_v43 = vld [vmem:[#allocation2 + $0xa8] sm:$0xf]  ;;  %v9321_v12 = vld [vmem:[#allocation2 + $0x7c] sm:$0xf]  ;;  %v3916_v31 = vor.u32 %v3915_v63, %v3912_v10 }
 0x1e7   : > { %3118 = vst [vmem:[#allocation2 + $0x9c] sm:$0xf] %v3117_v27  ;;  %11075 = vst [vmem:[#allocation26_spill] sm:$0xff] %v9319_v59  ;;  %v2962_v57 = vpop.permute.xlu0 %2961  ;;  %v9330_v27 = vcombine.low %v9277_v26, %v9321_v12  ;;  %v4159_v36 = vshll.u32 %v9321_v12, 16 }
 0x1e8   : > { %11076 = vst [vmem:[#allocation20_spill] sm:$0xff] %v9321_v12  ;;  %v3124_v37 = vsel %vm8871_vm7, %v2962_v57, %v3123_v43  ;;  %11079 = vst [vmem:[#allocation16_spill] sm:$0xff] %v9335_v40  ;;  %v9345_v57 = vrot.slane %v3919_v48, 5  ;;  %v9347_v43 = vrot.slane %v4156_v7, 4  ;;  %v10903_v48 = vrot.slane %v9300_v9, 5 }
 0x1e9   : > { %v2958_v44 = vpop.permute.xlu1 %2957  ;;  %11078 = vst [vmem:[#allocation14_spill] sm:$0xff] %v9330_v27  ;;  %3125 = vst [vmem:[#allocation2 + $0xa8] sm:$0xf] %v3124_v37  ;;  %6935 = vmatmul.mubr.msk.bf16.gmra.mxu0 %vm3294_vm6, %v9330_v27  ;;  %6974 = vmatprep.mubr.msk.bf16.mxu1 %vm3294_vm6, %v9330_v27  ;;  %v9349_v17 = vrot.slane %v4159_v36, 5  ;;  %v3929_v36 = vshll.u32 %v3146_v38, 16  ;;  %v6433_v27 = vrot.slane %v9277_v26, 9 }
 0x1ea   : > { %3119 = vst.msk [vmem:[#allocation2 + $0xa0] sm:$0xf] %vm3027_vm5, %v2958_v44  ;;  %v3925_v44 = vrot.slane %v3923_v52, 4  ;;  %11080 = vst [vmem:[#allocation25_spill] sm:$0xff] %v9347_v43  ;;  %6938 = vmatprep.mubr.msk.bf16.mxu0 %vm3294_vm6, %v9335_v40  ;;  %v10906_v9 = vrot.slane %v9321_v12, 5 }
 0x1eb   : > { %11081 = vst [vmem:[#allocation42_spill] sm:$0xff] %v9349_v17  ;;  %6975 = vmatmul.mubr.msk.bf16.gmra.mxu1 %vm3294_vm6, %v9335_v40 }
 0x1ec   : > { %v1754_v37 = vpop.permute.xlu0 %1753  ;;  %6978 = vmatprep.mubr.msk.bf16.mxu1 %vm3294_vm6, %v9355_v4  ;;  %v3926_v59 = vor.u32 %v3925_v44, %v9345_v57 }
 0x1ed   : > { %1918 = vst.msk [vmem:[#allocation2 + $0xc4] sm:$0xf] %vm1805_vm14, %v1754_v37  ;;  %v3137_v37 = vld [vmem:[#allocation2 + $0xc0] sm:$0xf]  ;;  %vm1812_vm14 = vcmask 122944  }
 0x1ee   : > { %v9364_v7 = vld [vmem:[#allocation2 + $0x9c] sm:$0xf]  ;;  %vm9397_vm15 = vmand %vm1812_vm14, %vm385_vm2  ;;  %vm5997_vm2 = vcmask 64512  }
 0x1ef   : > { %v2968_v60 = vpop.permute.xlu1 %2967  ;;  %v4222_v50 = vshrl.u32 %v9364_v7, 16 }
 0x1f0   : > { %v3131_v52 = vsel %vm8871_vm7, %v2968_v60, %v3130_v42  ;;  %v4225_v42 = vshll.u32 %v9364_v7, 16  ;;  %v9378_v60 = vsel %vm8959_vm13, %v6435_v54, %v10903_v48  ;;  %v9393_v63 = vld [vmem:[#allocation2 + $0xa8] sm:$0xf] }
 0x1f1   : > { %3132 = vst [vmem:[#allocation2 + $0xb4] sm:$0xf] %v3131_v52  ;;  %11082 = vst [vmem:[#allocation40_spill] sm:$0xff] %v9378_v60  ;;  %v2974_v52 = vpop.permute.xlu0 %2973  ;;  %v9381_v17 = vld [vmem:[#allocation2 + $0xa0] sm:$0xf]  ;;  %v4224_v40 = vrot.slane %v4222_v50, 4  ;;  %v9407_v50 = vsel %vm8959_vm13, %v6433_v27, %v10906_v9  ;;  %6939 = vmatmul.mubr.msk.bf16.gmra.mxu0 %vm3294_vm6, %v9355_v4 }
 0x1f2   : > { %v4227_v56 = vrot.slane %v4225_v42, 5  ;;  %v3138_v54 = vsel %vm8871_vm7, %v2974_v52, %v3137_v37  ;;  %v9390_v10 = vcombine.low %v9364_v7, %v9381_v17  ;;  %v4231_v38 = vshll.u32 %v9381_v17, 16  ;;  %11086 = vst [vmem:[#allocation29_spill] sm:$0xff] %v9407_v50  ;;  %v1814_v60 = vld [vmem:[#allocation2 + $0x14] sm:$0x1] }
 0x1f3   : > { %v2964_v43 = vpop.permute.xlu1 %2963  ;;  %3139 = vst [vmem:[#allocation2 + $0xc0] sm:$0xf] %v3138_v54  ;;  %v4246_v1 = vshrl.u32 %v9393_v63, 16  ;;  %v4249_v44 = vshll.u32 %v9393_v63, 16  ;;  %v3917_v37 = vrot.slane %v3916_v31, 4  ;;  %v3927_v52 = vrot.slane %v3926_v59, 4 }
 0x1f4   : > { %3126 = vst.msk [vmem:[#allocation2 + $0xac] sm:$0xf] %vm3027_vm5, %v2964_v43  ;;  %11083 = vst [vmem:[#allocation31_spill] sm:$0xff] %v9390_v10  ;;  %v4228_v43 = vor.u32 %v4227_v56, %v4224_v40  ;;  %v9411_v42 = vrot.slane %v4231_v38, 5  ;;  %v3931_v54 = vrot.slane %v3929_v36, 5  ;;  %6942 = vmatprep.mubr.msk.bf16.mxu0 %vm3294_vm6, %v9390_v10  ;;  %6979 = vmatmul.mubr.msk.bf16.gmra.mxu1 %vm3294_vm6, %v9390_v10  ;;  %v10912_v50 = vrot.slane %v9381_v17, 5 }
 0x1f5   : > { %v1666_v48 = vpop.permute.xlu0 %1665  ;;  %v4248_v40 = vrot.slane %v4246_v1, 4  ;;  %v4251_v12 = vrot.slane %v4249_v44, 5  ;;  %v1828_v1 = vld [vmem:[#allocation2 + $0x2c] sm:$0x1] }
 0x1f6   : > { %11087 = vst [vmem:[#allocation23_spill] sm:$0xff] %v9411_v42  ;;  %v9415_v56 = vrot.slane %v4228_v43, 4  ;;  %v1815_v27 = vsel %vm9397_vm15, %v1666_v48, %v1814_v60  ;;  %v3932_v48 = vsel %vm8915_vm10, %v3927_v52, %v3931_v54  ;;  %v6436_v52 = vrot.slane %v9364_v7, 9  ;;  %v1835_v7 = vld [vmem:[#allocation2 + $0x38] sm:$0x1] }
 0x1f7   : > { %v2970_v5 = vpop.permute.xlu1 %2969  ;;  %1816 = vst [vmem:[#allocation2 + $0x14] sm:$0x1] %v1815_v27  ;;  %v4252_v10 = vor.u32 %v4251_v12, %v4248_v40  ;;  %v1821_v12 = vld [vmem:[#allocation2 + $0x20] sm:$0x1] }
 0x1f8   : > { %11088 = vst [vmem:[#allocation35_spill] sm:$0xff] %v9415_v56  ;;  %3133 = vst.msk [vmem:[#allocation2 + $0xb8] sm:$0xf] %vm3027_vm5, %v2970_v5  ;;  %v9422_v31 = vld [vmem:[#allocation2 + $0xb4] sm:$0xf]  ;;  %v3922_v5 = vsel %vm8915_vm10, %v3917_v37, %v9345_v57 }
 0x1f9   : > { %v4270_v59 = vshrl.u32 %v9422_v31, 16  ;;  %v4273_v36 = vshll.u32 %v9422_v31, 16  ;;  %v1678_v60 = vpop.permute.xlu0 %1677 }
 0x1fa   : > { %v1829_v38 = vsel %vm9397_vm15, %v1678_v60, %v1828_v1  ;;  %v9451_v54 = vld [vmem:[#allocation2 + $0xc0] sm:$0xf]  ;;  %v6345_v60 = vcombine.low %v3922_v5, %v3932_v48  ;;  %v3947_v48 = vshrl.u32 %v8922_v6, 16 }
 0x1fb   : > { %v2976_v44 = vpop.permute.xlu1 %2975  ;;  %v9435_v43 = vld [vmem:[#allocation2 + $0xac] sm:$0xf]  ;;  %v4272_v27 = vrot.slane %v4270_v59, 4  ;;  %v4275_v9 = vrot.slane %v4273_v36, 5  ;;  %1830 = vst [vmem:[#allocation2 + $0x2c] sm:$0x1] %v1829_v38  ;;  %v9459_v59 = vsel %vm8959_vm13, %v6436_v52, %v10912_v50 }
 0x1fc   : > { %3140 = vst.msk [vmem:[#allocation2 + $0xc4] sm:$0xf] %vm3027_vm5, %v2976_v44  ;;  %v9443_v57 = vcombine.low %v9393_v63, %v9435_v43  ;;  %v4255_v37 = vshll.u32 %v9435_v43, 16  ;;  %11091 = vst [vmem:[#allocation7_spill] sm:$0xff] %v9459_v59  ;;  %v9463_v44 = vrot.slane %v4252_v10, 4  ;;  %v6437_v50 = vrot.slane %v9393_v63, 9 }
 0x1fd   : > { %v1684_v36 = vpop.permute.xlu0 %1683  ;;  %v4276_v56 = vor.u32 %v4275_v9, %v4272_v27  ;;  %v4599_v9 = vshrl.u32 %v9451_v54, 16  ;;  %v1842_v27 = vld [vmem:[#allocation2 + $0x44] sm:$0x1] }
 0x1fe   : > { %11089 = vst [vmem:[#allocation34_spill] sm:$0xff] %v9443_v57  ;;  %6943 = vmatmul.mubr.msk.bf16.gmra.mxu0 %vm3294_vm6, %v9443_v57  ;;  %6982 = vmatprep.mubr.msk.bf16.mxu1 %vm3294_vm6, %v9443_v57  ;;  %v9453_v40 = vrot.slane %v4255_v37, 5  ;;  %11092 = vst [vmem:[#allocation8_spill] sm:$0xff] %v9463_v44  ;;  %v1836_v42 = vsel %vm9397_vm15, %v1684_v36, %v1835_v7 }
 0x1ff   : > { %v1672_v38 = vpop.permute.xlu1 %1671  ;;  %v9461_v1 = vld [vmem:[#allocation2 + $0xb8] sm:$0xf]  ;;  %1837 = vst [vmem:[#allocation2 + $0x38] sm:$0x1] %v1836_v42  ;;  %v9496_v5 = vrot.slane %v4276_v56, 4 }
 0x200   : > { %11090 = vst [vmem:[#allocation21_spill] sm:$0xff] %v9453_v40  ;;  %v1822_v37 = vsel %vm9397_vm15, %v1672_v38, %v1821_v12  ;;  %v9471_v57 = vcombine.low %v9422_v31, %v9461_v1  ;;  %v4279_v52 = vshll.u32 %v9461_v1, 16  ;;  %v4602_v12 = vshll.u32 %v9451_v54, 16  ;;  %v3036_v38 = vld [vmem:[#allocation2 + $0x14] sm:$0x1] }
 0x201   : > { %1823 = vst [vmem:[#allocation2 + $0x20] sm:$0x1] %v1822_v37  ;;  %v1690_v7 = vpop.permute.xlu0 %1689  ;;  %11097 = vst [vmem:[#allocation9_spill] sm:$0xff] %v9496_v5  ;;  %v3949_v40 = vrot.slane %v3947_v48, 4  ;;  %v3995_v5 = vshrl.u32 %v8907_v15, 16 }
 0x202   : > { %11093 = vst [vmem:[#allocation4_spill] sm:$0xff] %v9471_v57  ;;  %6946 = vmatprep.mubr.msk.bf16.mxu0 %vm3294_vm6, %v9471_v57  ;;  %v9488_v42 = vrot.slane %v4279_v52, 5  ;;  %6983 = vmatmul.mubr.msk.bf16.gmra.mxu1 %vm3294_vm6, %v9471_v57  ;;  %v1843_v52 = vsel %vm9397_vm15, %v1690_v7, %v1842_v27  ;;  %v4604_v27 = vrot.slane %v4602_v12, 5  ;;  %v3971_v12 = vshrl.u32 %v9087_v53, 16 }
 0x203   : > { %v2888_v36 = vpop.permute.xlu1 %2887  ;;  %v9493_v37 = vld [vmem:[#allocation2 + $0xc4] sm:$0xf]  ;;  %7026 = vmatprep.mubr.msk.bf16.mxu1 %vm3294_vm6, %v6345_v60  ;;  %1844 = vst [vmem:[#allocation2 + $0x44] sm:$0x1] %v1843_v52  ;;  %v4601_v60 = vrot.slane %v4599_v9, 4 }
 0x204   : > { %11096 = vst [vmem:[#allocation3_spill] sm:$0xff] %v9488_v42  ;;  %v3037_v44 = vsel %vm9476_vm1, %v2888_v36, %v3036_v38  ;;  %v9505_v59 = vcombine.low %v9451_v54, %v9493_v37  ;;  %v4608_v7 = vshll.u32 %v9493_v37, 16  ;;  %v1849_v36 = vld [vmem:[#allocation2 + $0x50] sm:$0x1] }
 0x205   : > { %3038 = vst [vmem:[#allocation2 + $0x14] sm:$0x1] %v3037_v44  ;;  %v1696_v38 = vpop.permute.xlu0 %1695  ;;  %v11099_v44 = vrot.slane %v9435_v43, 5  ;;  %v4605_v52 = vor.u32 %v4604_v27, %v4601_v60  ;;  %v1856_v27 = vld [vmem:[#allocation2 + $0x5c] sm:$0x1] }
 0x206   : > { %11098 = vst [vmem:[#allocation46_spill] sm:$0xff] %v9505_v59  ;;  %6947 = vmatmul.mubr.msk.bf16.gmra.mxu0 %vm3294_vm6, %v9505_v59  ;;  %v1850_v63 = vsel %vm9397_vm15, %v1696_v38, %v1849_v36  ;;  %v9526_v56 = vrot.slane %v4608_v7, 5  ;;  %v6438_v59 = vrot.slane %v9422_v31, 9 }
 0x207   : > { %v2894_v57 = vpop.permute.xlu1 %2893  ;;  %6990 = vmatprep.mubr.msk.bf16.mxu0 %vm3294_vm6, %v9099_v39  ;;  %v9521_v9 = vsel %vm8959_vm13, %v6437_v50, %v11099_v44  ;;  %1851 = vst [vmem:[#allocation2 + $0x50] sm:$0x1] %v1850_v63  ;;  %v10919_v50 = vrot.slane %v9461_v1, 5  ;;  %v3950_v44 = vor.u32 %v3949_v40, %v8946_v16  ;;  %v9534_v36 = vrot.slane %v4605_v52, 4 }
 0x208   : > { %11100 = vst [vmem:[#allocation5_spill] sm:$0xff] %v9521_v9  ;;  %v3043_v48 = vld [vmem:[#allocation2 + $0x20] sm:$0x1]  ;;  %v3050_v9 = vld [vmem:[#allocation2 + $0x2c] sm:$0x1]  ;;  %v4642_v63 = vsel %vm3343_vm3, %v9136_v20, 0 }
 0x209   : > { %v3044_v39 = vsel %vm9476_vm1, %v2894_v57, %v3043_v48  ;;  %v1702_v60 = vpop.permute.xlu0 %1701  ;;  %v9543_v31 = vsel %vm8959_vm13, %v6438_v59, %v10919_v50  ;;  %v3973_v52 = vrot.slane %v3971_v12, 4  ;;  %v4611_v20 = vsel %vm8915_vm10, %v9534_v36, %v9526_v56  ;;  %v11155_v10 = vld [vmem:[#allocation4_spill] sm:$0xff]  ;;  %v9991_v36 = vld [vmem:[%s10835_s7 + $0x68] ss:$0 sps:$4 sm:$0xff]  }
 0x20a   : > { %3045 = vst [vmem:[#allocation2 + $0x20] sm:$0x1] %v3044_v39  ;;  %11101 = vst [vmem:[#allocation10_spill] sm:$0xff] %v9543_v31  ;;  %v1857_v57 = vsel %vm9397_vm15, %v1702_v60, %v1856_v27  ;;  %v7315_v39 = vld [vmem:[%s10835_s7 + $0x30] sm:$0xff]   ;;  %v6476_v59 = vrot.slane %v9451_v54, 9  ;;  %v3997_v60 = vrot.slane %v3995_v5, 4 }
 0x20b   : > { %v2900_v7 = vpop.permute.xlu1 %2899  ;;  %1858 = vst [vmem:[#allocation2 + $0x5c] sm:$0x1] %v1857_v57  ;;  %v3951_v27 = vrot.slane %v3950_v44, 4  ;;  %v3057_v31 = vld [vmem:[#allocation2 + $0x38] sm:$0x1]  ;;  %v11102_v57 = vrot.slane %v8922_v6, 5 }
 0x20c   : > { %v3051_v40 = vsel %vm9476_vm1, %v2900_v7, %v3050_v9  ;;  %v3149_v48 = vld [vmem:[#allocation2 + $0x14] sm:$0x1]  ;;  %v1863_v9 = vld [vmem:[#allocation2 + $0x68] sm:$0x1]  ;;  %v4019_v7 = vshrl.u32 %v9065_v0, 16  ;;  %v11103_v5 = vrot.slane %v9493_v37, 5 }
 0x20d   : > { %3052 = vst [vmem:[#allocation2 + $0x2c] sm:$0x1] %v3051_v40  ;;  %v3953_v50 = vshll.u32 %v3149_v48, 16  ;;  %v5107_v12 = vrot.slane %v3149_v48, 5  ;;  %v1708_v38 = vpop.permute.xlu0 %1707  ;;  %v5106_v40 = vrot.slane %v11102_v57, 4  ;;  %v3974_v48 = vor.u32 %v3973_v52, %v9119_v62 }
 0x20e   : > { %6991 = vmatmul.mubr.msk.bf16.vlgmr.msra.gmra.mxu0 %vm3294_vm6, %v9107_v18  ;;  %v9568_v18 = vsel %vm8959_vm13, %v6476_v59, %v11103_v5  ;;  %v1864_v44 = vsel %vm9397_vm15, %v1708_v38, %v1863_v9  ;;  %v9578_v6 = vld [vmem:[%s10835_s7 + $0x20] ss:$0 sps:$4 sm:$0xff]   ;;  %v3998_v38 = vor.u32 %v3997_v60, %v8919_v33  ;;  %v11104_v52 = vsel %vm8915_vm10, %v8944_v19, %v8946_v16 }
 0x20f   : > { %7059 = vmatpush3.bf16.msra.mxu0 %v4642_v63  ;;  %v2906_v42 = vpop.permute.xlu1 %2905  ;;  %6994 = vmatprep.mubr.msk.bf16.mxu0 %vm3294_vm6, %v9125_v2  ;;  %v3955_v54 = vrot.slane %v3953_v50, 5  ;;  %v4043_v2 = vshrl.u32 %v9003_v34, 16  ;;  %1865 = vst [vmem:[#allocation2 + $0x68] sm:$0x1] %v1864_v44  ;;  %v4881_v5 = vsel %vm3343_vm3, %v9076_v11, 0  ;;  %v4021_v44 = vrot.slane %v4019_v7, 4 }
 0x210   : > { %v3058_v63 = vsel %vm9476_vm1, %v2906_v42, %v3057_v31  ;;  %7060 = vmatprep.subr.bf16.mxu0 %v7315_v39  ;;  %v5108_v42 = vsel %vm8959_vm13, %v5106_v40, %v5107_v12  ;;  %v1870_v31 = vld [vmem:[#allocation2 + $0x74] sm:$0x1]  ;;  %v3064_v40 = vld [vmem:[#allocation2 + $0x44] sm:$0x1]  ;;  %v11105_v19 = vrot.slane %v9087_v53, 5  ;;  %v3999_v53 = vrot.slane %v3998_v38, 4 }
 0x211   : > { %3059 = vst [vmem:[#allocation2 + $0x38] sm:$0x1] %v3058_v63  ;;  %v3956_v50 = vsel %vm8915_vm10, %v3951_v27, %v3955_v54  ;;  %v3152_v59 = vld [vmem:[#allocation2 + $0x20] sm:$0x1]  ;;  %v7319_v27 = vld [vmem:[%s10835_s7 + $0x54] sm:$0xff]   ;;  %v9599_v60 = vcombine.low %v8989_v25, %v5108_v42  ;;  %v1714_v12 = vpop.permute.xlu0 %1713  ;;  %v3975_v25 = vrot.slane %v3974_v48, 4 }
 0x212   : > { %v9591_v9 = vcombine.low %v11104_v52, %v3956_v50  ;;  %v3977_v57 = vshll.u32 %v3152_v59, 16  ;;  %v5113_v16 = vrot.slane %v11105_v19, 4  ;;  %v5114_v63 = vrot.slane %v3152_v59, 5  ;;  %v9622_v38 = vld [vmem:[%s10835_s7 + $0x44] ss:$0 sps:$4 sm:$0xff]  }
 0x213   : > { %v2912_v54 = vpop.permute.xlu1 %2911  ;;  %7061 = vmatpush3.bf16.msra.mxu0 %v7315_v39  ;;  %v1871_v50 = vsel %vm9397_vm15, %v1714_v12, %v1870_v31  ;;  %v11106_v59 = vrot.slane %v8907_v15, 5  ;;  %v4067_v15 = vshrl.u32 %v9207_v45, 16  ;;  %v3071_v19 = vld [vmem:[#allocation2 + $0x50] sm:$0x1] }
 0x214   : > { %v3065_v11 = vsel %vm9476_vm1, %v2912_v54, %v3064_v40  ;;  %7027 = vmatmul.mubr.msk.bf16.vlgmr.msra.gmra.mxu1 %vm3294_vm6, %v9591_v9  ;;  %v3979_v42 = vrot.slane %v3977_v57, 5  ;;  %v3155_v52 = vld [vmem:[#allocation2 + $0x2c] sm:$0x1]  ;;  %7250 = vmatprep.subr.msk.bf16.mxu0 %vm3343_vm3, %v9578_v6  ;;  %1872 = vst [vmem:[#allocation2 + $0x74] sm:$0x1] %v1871_v50  ;;  %v5115_v7 = vsel %vm8959_vm13, %v5113_v16, %v5114_v63  ;;  %v4045_v57 = vrot.slane %v4043_v2, 4 }
 0x215   : > { %3066 = vst [vmem:[#allocation2 + $0x44] sm:$0x1] %v3065_v11  ;;  %v4001_v39 = vshll.u32 %v3155_v52, 16  ;;  %7095 = vmatpush3.bf16.msra.mxu1 %v4881_v5  ;;  %v5120_v31 = vrot.slane %v11106_v59, 4  ;;  %v9625_v5 = vcombine.low %v9195_v22, %v5115_v7  ;;  %v5121_v12 = vrot.slane %v3155_v52, 5  ;;  %v1720_v40 = vpop.permute.xlu0 %1719 }
 0x216   : > { %6995 = vmatmul.mubr.msk.bf16.gmra.mxu0 %vm3294_vm6, %v9183_v29  ;;  %v3980_v48 = vsel %vm8915_vm10, %v3975_v25, %v3979_v42  ;;  %7096 = vmatprep.subr.bf16.mxu1 %v7319_v27  ;;  %v1877_v54 = vld [vmem:[#allocation2 + $0x80] sm:$0x1]  ;;  %v11107_v2 = vsel %vm8915_vm10, %v9117_v3, %v9119_v62  ;;  %v4022_v22 = vor.u32 %v4021_v44, %v9083_v51  ;;  %v11108_v42 = vrot.slane %v9065_v0, 5  ;;  %v1884_v59 = vld [vmem:[#allocation2 + $0x8c] sm:$0x1] }
 0x217   : > { %v2918_v29 = vpop.permute.xlu1 %2917  ;;  %6998 = vmatprep.mubr.msk.bf16.mxu0 %vm3294_vm6, %v9218_v58  ;;  %v9635_v16 = vcombine.low %v11107_v2, %v3980_v48  ;;  %v4003_v63 = vrot.slane %v4001_v39, 5  ;;  %v1878_v50 = vsel %vm9397_vm15, %v1720_v40, %v1877_v54  ;;  %v5122_v58 = vsel %vm8959_vm13, %v5120_v31, %v5121_v12 }
 0x218   : > { %v3072_v11 = vsel %vm9476_vm1, %v2918_v29, %v3071_v19  ;;  %v3158_v25 = vld [vmem:[#allocation2 + $0x38] sm:$0x1]  ;;  %v5127_v52 = vrot.slane %v11108_v42, 4  ;;  %1879 = vst [vmem:[#allocation2 + $0x80] sm:$0x1] %v1878_v50  ;;  %v9651_v44 = vcombine.low %v8972_v49, %v5122_v58  ;;  %v4091_v7 = vshrl.u32 %v8992_v35, 16 }
 0x219   : > { %3073 = vst [vmem:[#allocation2 + $0x50] sm:$0x1] %v3072_v11  ;;  %7030 = vmatprep.mubr.msk.bf16.mxu1 %vm3294_vm6, %v9635_v16  ;;  %v4004_v3 = vsel %vm8915_vm10, %v3999_v53, %v4003_v63  ;;  %v4025_v62 = vshll.u32 %v3158_v25, 16  ;;  %7097 = vmatpush3.bf16.msra.mxu1 %v7319_v27  ;;  %v5128_v39 = vrot.slane %v3158_v25, 5  ;;  %v11109_v0 = vsel %vm8915_vm10, %v8924_v61, %v8919_v33  ;;  %v1726_v27 = vpop.permute.xlu0 %1725  ;;  %v3078_v49 = vld [vmem:[#allocation2 + $0x5c] sm:$0x1] }
 0x21a   : > { %v9659_v31 = vcombine.low %v11109_v0, %v4004_v3  ;;  %v4046_v48 = vor.u32 %v4045_v57, %v9021_v46  ;;  %7251 = vmatprep.subr.msk.bf16.mxu1 %vm3343_vm3, %v9622_v38  ;;  %v4023_v12 = vrot.slane %v4022_v22, 4  ;;  %v4069_v40 = vrot.slane %v4067_v15, 4  ;;  %v1891_v63 = vld [vmem:[#allocation2 + $0x98] sm:$0x1]  ;;  %v3085_v3 = vld [vmem:[#allocation2 + $0x68] sm:$0x1] }
 0x21b   : > { %v2924_v53 = vpop.permute.xlu1 %2923  ;;  %v4027_v54 = vrot.slane %v4025_v62, 5  ;;  %v5129_v19 = vsel %vm8959_vm13, %v5127_v52, %v5128_v39  ;;  %v1885_v29 = vsel %vm9397_vm15, %v1726_v27, %v1884_v59  ;;  %v11110_v22 = vsel %vm8915_vm10, %v9091_v21, %v9083_v51 }
 0x21c   : > { %v3079_v33 = vsel %vm9476_vm1, %v2924_v53, %v3078_v49  ;;  %7031 = vmatmul.mubr.msk.bf16.gmra.mxu1 %vm3294_vm6, %v9659_v31  ;;  %v3161_v61 = vld [vmem:[#allocation2 + $0x44] sm:$0x1]  ;;  %v9673_v57 = vcombine.low %v9153_v23, %v5129_v19  ;;  %1886 = vst [vmem:[#allocation2 + $0x8c] sm:$0x1] %v1885_v29  ;;  %v4093_v11 = vrot.slane %v4091_v7, 4  ;;  %v11111_v23 = vrot.slane %v9003_v34, 5 }
 0x21d   : > { %3080 = vst [vmem:[#allocation2 + $0x5c] sm:$0x1] %v3079_v33  ;;  %v4028_v15 = vsel %vm8915_vm10, %v4023_v12, %v4027_v54  ;;  %v4049_v2 = vshll.u32 %v3161_v61, 16  ;;  %v5135_v58 = vrot.slane %v3161_v61, 5  ;;  %v4115_v42 = vshrl.u32 %v9199_v32, 16  ;;  %v1732_v52 = vpop.permute.xlu0 %1731 }
 0x21e   : > { %6999 = vmatmul.mubr.msk.bf16.gmra.mxu0 %vm3294_vm6, %v9223_v13  ;;  %v9684_v50 = vcombine.low %v11110_v22, %v4028_v15  ;;  %v5134_v25 = vrot.slane %v11111_v23, 4  ;;  %v4047_v13 = vrot.slane %v4046_v48, 4  ;;  %v4070_v59 = vor.u32 %v4069_v40, %v9233_v24  ;;  %v1898_v54 = vld [vmem:[#allocation2 + $0xa4] sm:$0x1]  ;;  %v3092_v33 = vld [vmem:[#allocation2 + $0x74] sm:$0x1] }
 0x21f   : > { %v2930_v62 = vpop.permute.xlu1 %2929  ;;  %7002 = vmatprep.mubr.msk.bf16.mxu0 %vm3294_vm6, %v9239_v47  ;;  %v4051_v39 = vrot.slane %v4049_v2, 5  ;;  %v1892_v51 = vsel %vm9397_vm15, %v1732_v52, %v1891_v63  ;;  %v11112_v0 = vrot.slane %v9207_v45, 5  ;;  %v4139_v12 = vshrl.u32 %v9051_v28, 16  ;;  %v11115_v52 = vld [vmem:[#allocation12_spill] sm:$0xff] }
 0x220   : > { %v3086_v34 = vsel %vm9476_vm1, %v2930_v62, %v3085_v3  ;;  %7034 = vmatprep.mubr.msk.bf16.mxu1 %vm3294_vm6, %v9684_v50  ;;  %v3164_v21 = vld [vmem:[#allocation2 + $0x50] sm:$0x1]  ;;  %v5136_v7 = vsel %vm8959_vm13, %v5134_v25, %v5135_v58  ;;  %1893 = vst [vmem:[#allocation2 + $0x98] sm:$0x1] %v1892_v51  ;;  %v11113_v40 = vsel %vm8915_vm10, %v9019_v41, %v9021_v46  ;;  %v4071_v15 = vrot.slane %v4070_v59, 4 }
 0x221   : > { %v5141_v47 = vrot.slane %v11112_v0, 4  ;;  %3087 = vst [vmem:[#allocation2 + $0x68] sm:$0x1] %v3086_v34  ;;  %v4052_v48 = vsel %vm8915_vm10, %v4047_v13, %v4051_v39  ;;  %v4073_v27 = vshll.u32 %v3164_v21, 16  ;;  %v9705_v53 = vcombine.low %v9173_v14, %v5136_v7  ;;  %v1738_v29 = vpop.permute.xlu0 %1737  ;;  %v11114_v46 = vld [vmem:[#allocation38_spill] sm:$0xff] }
 0x222   : > { %v5142_v49 = vrot.slane %v3164_v21, 5  ;;  %v9713_v45 = vcombine.low %v11113_v40, %v4052_v48  ;;  %v4094_v19 = vor.u32 %v4093_v11, %v9007_v8  ;;  %v4117_v14 = vrot.slane %v4115_v42, 4  ;;  %v1905_v3 = vld [vmem:[#allocation2 + $0xb0] sm:$0x1]  ;;  %v11119_v21 = vld [vmem:[#allocation20_spill] sm:$0xff] }
 0x223   : > { %v2936_v61 = vpop.permute.xlu1 %2935  ;;  %v4075_v2 = vrot.slane %v4073_v27, 5  ;;  %v1899_v22 = vsel %vm9397_vm15, %v1738_v29, %v1898_v54  ;;  %v4141_v42 = vrot.slane %v4139_v12, 4  ;;  %v11116_v62 = vld [vmem:[#allocation30_spill] sm:$0xff]  ;;  %v11118_v59 = vrot.slane %v8992_v35, 5  ;;  %v11121_v54 = vld [vmem:[#allocation28_spill] sm:$0xff] }
 0x224   : > { %v5143_v63 = vsel %vm8959_vm13, %v5141_v47, %v5142_v49  ;;  %v3093_v23 = vsel %vm9476_vm1, %v2936_v61, %v3092_v33  ;;  %7035 = vmatmul.mubr.msk.bf16.gmra.mxu1 %vm3294_vm6, %v9713_v45  ;;  %v3167_v41 = vld [vmem:[#allocation2 + $0x5c] sm:$0x1]  ;;  %1900 = vst [vmem:[#allocation2 + $0xa4] sm:$0x1] %v1899_v22  ;;  %v11117_v13 = vsel %vm8915_vm10, %v11116_v62, %v9233_v24  ;;  %v4163_v7 = vshrl.u32 %v11119_v21, 16  ;;  %v11120_v27 = vld [vmem:[#allocation14_spill] sm:$0xff] }
 0x225   : > { %v9725_v11 = vcombine.low %v11114_v46, %v5143_v63  ;;  %3094 = vst [vmem:[#allocation2 + $0x74] sm:$0x1] %v3093_v23  ;;  %v4076_v25 = vsel %vm8915_vm10, %v4071_v15, %v4075_v2  ;;  %v4097_v58 = vshll.u32 %v3167_v41, 16  ;;  %v5148_v51 = vrot.slane %v11118_v59, 4  ;;  %v1744_v0 = vpop.permute.xlu0 %1743  ;;  %v3099_v47 = vld [vmem:[#allocation2 + $0x80] sm:$0x1] }
 0x226   : > { %7003 = vmatmul.mubr.msk.bf16.gmra.mxu0 %vm3294_vm6, %v11115_v52  ;;  %v9736_v39 = vcombine.low %v11117_v13, %v4076_v25  ;;  %v5149_v34 = vrot.slane %v3167_v41, 5  ;;  %v4095_v49 = vrot.slane %v4094_v19, 4  ;;  %v4118_v40 = vor.u32 %v4117_v14, %v11121_v54  ;;  %v11123_v14 = vld [vmem:[#allocation33_spill] sm:$0xff]  ;;  %v11124_v23 = vld [vmem:[#allocation22_spill] sm:$0xff]  ;;  %v1912_v46 = vld [vmem:[#allocation2 + $0xbc] sm:$0x1] }
 0x227   : > { %v2942_v48 = vpop.permute.xlu1 %2941  ;;  %7006 = vmatprep.mubr.msk.bf16.mxu0 %vm3294_vm6, %v11120_v27  ;;  %v4099_v12 = vrot.slane %v4097_v58, 5  ;;  %v1906_v24 = vsel %vm9397_vm15, %v1744_v0, %v1905_v3  ;;  %v11122_v61 = vrot.slane %v9199_v32, 5  ;;  %v4187_v41 = vshrl.u32 %v11124_v23, 16  ;;  %v11125_v25 = vld [vmem:[#allocation24_spill] sm:$0xff]  ;;  %v11127_v52 = vld [vmem:[#allocation37_spill] sm:$0xff] }
 0x228   : > { %v3100_v35 = vsel %vm9476_vm1, %v2942_v48, %v3099_v47  ;;  %7038 = vmatprep.mubr.msk.bf16.mxu1 %vm3294_vm6, %v9736_v39  ;;  %v3170_v29 = vld [vmem:[#allocation2 + $0x68] sm:$0x1]  ;;  %v5150_v33 = vsel %vm8959_vm13, %v5148_v51, %v5149_v34  ;;  %1907 = vst [vmem:[#allocation2 + $0xb0] sm:$0x1] %v1906_v24  ;;  %v11126_v58 = vsel %vm8915_vm10, %v11125_v25, %v9007_v8  ;;  %v3106_v13 = vld [vmem:[#allocation2 + $0x8c] sm:$0x1] }
 0x229   : > { %v5155_v15 = vrot.slane %v11122_v61, 4  ;;  %3101 = vst [vmem:[#allocation2 + $0x80] sm:$0x1] %v3100_v35  ;;  %v4100_v19 = vsel %vm8915_vm10, %v4095_v49, %v4099_v12  ;;  %v4121_v2 = vshll.u32 %v3170_v29, 16  ;;  %v9757_v63 = vcombine.low %v11123_v14, %v5150_v33  ;;  %v1750_v62 = vpop.permute.xlu0 %1749  ;;  %v11131_v61 = vld [vmem:[#allocation16_spill] sm:$0xff] }
 0x22a   : > { %v5156_v22 = vrot.slane %v3170_v29, 5  ;;  %v9765_v32 = vcombine.low %v11126_v58, %v4100_v19  ;;  %v4142_v3 = vor.u32 %v4141_v42, %v11127_v52  ;;  %v4119_v51 = vrot.slane %v4118_v40, 4  ;;  %v11128_v42 = vld [vmem:[#allocation39_spill] sm:$0xff]  ;;  %v11130_v29 = vld [vmem:[#allocation36_spill] sm:$0xff] }
 0x22b   : > { %v2948_v59 = vpop.permute.xlu1 %2947  ;;  %v4123_v34 = vrot.slane %v4121_v2, 5  ;;  %v4165_v0 = vrot.slane %v4163_v7, 4  ;;  %v1913_v48 = vsel %vm9397_vm15, %v1750_v62, %v1912_v46  ;;  %v11129_v40 = vrot.slane %v9051_v28, 5  ;;  %v3113_v25 = vld [vmem:[#allocation2 + $0x98] sm:$0x1]  ;;  %v11134_v62 = vld [vmem:[#allocation42_spill] sm:$0xff] }
 0x22c   : > { %v5157_v47 = vsel %vm8959_vm13, %v5155_v15, %v5156_v22  ;;  %v3107_v27 = vsel %vm9476_vm1, %v2948_v59, %v3106_v13  ;;  %7039 = vmatmul.mubr.msk.bf16.gmra.mxu1 %vm3294_vm6, %v9765_v32  ;;  %v3173_v8 = vld [vmem:[#allocation2 + $0x74] sm:$0x1]  ;;  %1914 = vst [vmem:[#allocation2 + $0xbc] sm:$0x1] %v1913_v48  ;;  %v4189_v35 = vrot.slane %v4187_v41, 4  ;;  %v4211_v33 = vshrl.u32 %v11130_v29, 16 }
 0x22d   : > { %v9777_v49 = vcombine.low %v11128_v42, %v5157_v47  ;;  %3108 = vst [vmem:[#allocation2 + $0x8c] sm:$0x1] %v3107_v27  ;;  %v4124_v7 = vsel %vm8915_vm10, %v4119_v51, %v4123_v34  ;;  %v4145_v12 = vshll.u32 %v3173_v8, 16  ;;  %v5162_v24 = vrot.slane %v11129_v40, 4  ;;  %v11132_v15 = vld [vmem:[#allocation27_spill] sm:$0xff]  ;;  %v1756_v46 = vpop.permute.xlu0 %1755 }
 0x22e   : > { %7007 = vmatmul.mubr.msk.bf16.gmra.mxu0 %vm3294_vm6, %v11131_v61  ;;  %v11133_v19 = vsel %vm8915_vm10, %v11132_v15, %v11121_v54  ;;  %v5163_v14 = vrot.slane %v3173_v8, 5  ;;  %v1919_v22 = vld [vmem:[#allocation2 + $0xc8] sm:$0x1]  ;;  %v4143_v28 = vrot.slane %v4142_v3, 4  ;;  %v4166_v13 = vor.u32 %v4165_v0, %v11134_v62  ;;  %v11136_v0 = vld [vmem:[#allocation15_spill] sm:$0xff] }
 0x22f   : > { %v9791_v2 = vcombine.low %v11133_v19, %v4124_v7  ;;  %v2954_v58 = vpop.permute.xlu1 %2953  ;;  %7010 = vmatprep.mubr.msk.bf16.mxu0 %vm3294_vm6, %v9355_v4  ;;  %v4147_v41 = vrot.slane %v4145_v12, 5  ;;  %v1920_v59 = vsel %vm9397_vm15, %v1756_v46, %v1919_v22  ;;  %v11135_v47 = vrot.slane %v11119_v21, 5  ;;  %v11137_v8 = vld [vmem:[#allocation19_spill] sm:$0xff]  ;;  %v11139_v12 = vld [vmem:[#allocation41_spill] sm:$0xff]  ;;  %v3120_v15 = vld [vmem:[#allocation2 + $0xa4] sm:$0x1] }
 0x230   : > { %v3114_v54 = vsel %vm9476_vm1, %v2954_v58, %v3113_v25  ;;  %v3176_v51 = vld [vmem:[#allocation2 + $0x80] sm:$0x1]  ;;  %v5164_v34 = vsel %vm8959_vm13, %v5162_v24, %v5163_v14  ;;  %1921 = vst [vmem:[#allocation2 + $0xc8] sm:$0x1] %v1920_v59  ;;  %v11138_v42 = vsel %vm8915_vm10, %v11137_v8, %v11127_v52  ;;  %v4190_v21 = vor.u32 %v4189_v35, %v11139_v12 }
 0x231   : > { %7042 = vmatprep.mubr.msk.bf16.mxu1 %vm3294_vm6, %v9791_v2  ;;  %v5169_v4 = vrot.slane %v11135_v47, 4  ;;  %3115 = vst [vmem:[#allocation2 + $0x98] sm:$0x1] %v3114_v54  ;;  %v4148_v3 = vsel %vm8915_vm10, %v4143_v28, %v4147_v41  ;;  %v4169_v26 = vshll.u32 %v3176_v51, 16  ;;  %v9809_v48 = vcombine.low %v11136_v0, %v5164_v34  ;;  %v2972_v61 = vpop.permute.xlu0 %2971  ;;  %v11142_v47 = vld [vmem:[#allocation31_spill] sm:$0xff]  ;;  %v11145_v0 = vld [vmem:[#allocation26_spill] sm:$0xff] }
 0x232   : > { %v5170_v27 = vrot.slane %v3176_v51, 5  ;;  %v9816_v7 = vcombine.low %v11138_v42, %v4148_v3  ;;  %v4213_v40 = vrot.slane %v4211_v33, 4  ;;  %v4235_v24 = vshrl.u32 %v9381_v17, 16  ;;  %v11140_v33 = vld [vmem:[#allocation29_spill] sm:$0xff] }
 0x233   : > { %v2960_v19 = vpop.permute.xlu1 %2959  ;;  %v4167_v14 = vrot.slane %v4166_v13, 4  ;;  %v4171_v22 = vrot.slane %v4169_v26, 5  ;;  %v4283_v25 = vshrl.u32 %v9461_v1, 16  ;;  %v3134_v58 = vld [vmem:[#allocation2 + $0xbc] sm:$0x1]  ;;  %v11141_v54 = vrot.slane %v11124_v23, 5 }
 0x234   : > { %v5171_v46 = vsel %vm8959_vm13, %v5169_v4, %v5170_v27  ;;  %v3121_v52 = vsel %vm9476_vm1, %v2960_v19, %v3120_v15  ;;  %7043 = vmatmul.mubr.msk.bf16.gmra.mxu1 %vm3294_vm6, %v9816_v7  ;;  %v3179_v35 = vld [vmem:[#allocation2 + $0x8c] sm:$0x1]  ;;  %v3135_v41 = vsel %vm9476_vm1, %v2972_v61, %v3134_v58  ;;  %v4259_v34 = vshrl.u32 %v9435_v43, 16  ;;  %v3127_v61 = vld [vmem:[#allocation2 + $0xb0] sm:$0x1] }
 0x235   : > { %v9828_v28 = vcombine.low %v11140_v33, %v5171_v46  ;;  %3122 = vst [vmem:[#allocation2 + $0xa4] sm:$0x1] %v3121_v52  ;;  %v4172_v13 = vsel %vm8915_vm10, %v4167_v14, %v4171_v22  ;;  %v4193_v59 = vshll.u32 %v3179_v35, 16  ;;  %v5176_v51 = vrot.slane %v11141_v54, 4  ;;  %3136 = vst [vmem:[#allocation2 + $0xbc] sm:$0x1] %v3135_v41 }
 0x236   : > { %7011 = vmatmul.mubr.msk.bf16.gmra.mxu0 %vm3294_vm6, %v11142_v47  ;;  %v11143_v4 = vld [vmem:[#allocation25_spill] sm:$0xff]  ;;  %v4214_v27 = vor.u32 %v4213_v40, %v11145_v0  ;;  %v5177_v8 = vrot.slane %v3179_v35, 5  ;;  %v4237_v42 = vrot.slane %v4235_v24, 4  ;;  %v11146_v15 = vld [vmem:[#allocation34_spill] sm:$0xff]  ;;  %v4191_v19 = vrot.slane %v4190_v21, 4  ;;  %v11148_v35 = vld [vmem:[#allocation32_spill] sm:$0xff] }
 0x237   : > { %v11144_v3 = vsel %vm8915_vm10, %v11143_v4, %v11134_v62  ;;  %v2966_v23 = vpop.permute.xlu1 %2965  ;;  %7014 = vmatprep.mubr.msk.bf16.mxu0 %vm3294_vm6, %v11146_v15  ;;  %v4195_v14 = vrot.slane %v4193_v59, 5  ;;  %v4285_v22 = vrot.slane %v4283_v25, 4  ;;  %v11147_v24 = vrot.slane %v11130_v29, 5  ;;  %v11149_v41 = vld [vmem:[#allocation13_spill] sm:$0xff] }
 0x238   : > { %v9844_v26 = vcombine.low %v11144_v3, %v4172_v13  ;;  %v3128_v46 = vsel %vm9476_vm1, %v2966_v23, %v3127_v61  ;;  %v3182_v62 = vld [vmem:[#allocation2 + $0x98] sm:$0x1]  ;;  %v5178_v40 = vsel %vm8959_vm13, %v5176_v51, %v5177_v8  ;;  %v11150_v13 = vsel %vm8915_vm10, %v11149_v41, %v11139_v12  ;;  %v3141_v47 = vld [vmem:[#allocation2 + $0xc8] sm:$0x1] }
 0x239   : > { %v5183_v58 = vrot.slane %v11147_v24, 4  ;;  %3129 = vst [vmem:[#allocation2 + $0xb0] sm:$0x1] %v3128_v46  ;;  %v4196_v52 = vsel %vm8915_vm10, %v4191_v19, %v4195_v14  ;;  %v4217_v21 = vshll.u32 %v3182_v62, 16  ;;  %v9860_v25 = vcombine.low %v11148_v35, %v5178_v40  ;;  %v11151_v8 = vld [vmem:[#allocation23_spill] sm:$0xff]  ;;  %v11158_v35 = vld [vmem:[#allocation21_spill] sm:$0xff] }
 0x23a   : > { %7046 = vmatprep.mubr.msk.bf16.mxu1 %vm3294_vm6, %v9844_v26  ;;  %v5184_v33 = vrot.slane %v3182_v62, 5  ;;  %v9867_v59 = vcombine.low %v11150_v13, %v4196_v52  ;;  %v4215_v54 = vrot.slane %v4214_v27, 4  ;;  %v4261_v51 = vrot.slane %v4259_v34, 4  ;;  %v11152_v19 = vld [vmem:[#allocation3_spill] sm:$0xff]  ;;  %v11153_v34 = vld [vmem:[#allocation40_spill] sm:$0xff] }
 0x23b   : > { %v4612_v29 = vshrl.u32 %v9493_v37, 16  ;;  %v2978_v4 = vpop.permute.xlu1 %2977  ;;  %v4219_v3 = vrot.slane %v4217_v21, 5  ;;  %v4238_v61 = vor.u32 %v4237_v42, %v11151_v8  ;;  %v4286_v27 = vor.u32 %v4285_v22, %v11152_v19  ;;  %v9894_v21 = vld [vmem:[#allocation2 + $0xcc] sm:$0xf] }
 0x23c   : > { %v5185_v23 = vsel %vm8959_vm13, %v5183_v58, %v5184_v33  ;;  %v3142_v15 = vsel %vm9476_vm1, %v2978_v4, %v3141_v47  ;;  %7047 = vmatmul.mubr.msk.bf16.gmra.mxu1 %vm3294_vm6, %v9867_v59  ;;  %v3185_v12 = vld [vmem:[#allocation2 + $0xa4] sm:$0x1]  ;;  %v3191_v62 = vld [vmem:[#allocation2 + $0xbc] sm:$0x1]  ;;  %v11154_v40 = vrot.slane %v9381_v17, 5  ;;  %v11156_v58 = vld [vmem:[#allocation17_spill] sm:$0xff]  ;;  %v4262_v33 = vor.u32 %v4261_v51, %v11158_v35 }
 0x23d   : > { %v9879_v14 = vcombine.low %v11153_v34, %v5185_v23  ;;  %3143 = vst [vmem:[#allocation2 + $0xc8] sm:$0x1] %v3142_v15  ;;  %v4220_v46 = vsel %vm8915_vm10, %v4215_v54, %v4219_v3  ;;  %v4241_v42 = vshll.u32 %v3185_v12, 16  ;;  %v11157_v22 = vsel %vm8915_vm10, %v11156_v58, %v11145_v0  ;;  %v11159_v54 = vld [vmem:[#allocation46_spill] sm:$0xff] }
 0x23e   : > { %v5190_v24 = vrot.slane %v11154_v40, 4  ;;  %7015 = vmatmul.mubr.msk.bf16.gmra.mxu0 %vm3294_vm6, %v11155_v10  ;;  %v9892_v52 = vcombine.low %v11157_v22, %v4220_v46  ;;  %v4289_v41 = vshll.u32 %v3191_v62, 16  ;;  %v5191_v13 = vrot.slane %v3185_v12, 5  ;;  %v9899_v4 = vld [vmem:[#allocation2 + $0xd0] sm:$0xf]  ;;  %v11162_v10 = vld [vmem:[#allocation35_spill] sm:$0xff] }
 0x23f   : > { %7018 = vmatprep.mubr.msk.bf16.mxu0 %vm3294_vm6, %v11159_v54  ;;  %v4239_v17 = vrot.slane %v4238_v61, 4  ;;  %v4243_v47 = vrot.slane %v4241_v42, 5  ;;  %v4614_v3 = vrot.slane %v4612_v29, 4  ;;  %v4287_v23 = vrot.slane %v4286_v27, 4  ;;  %v11161_v42 = vld [vmem:[#allocation7_spill] sm:$0xff] }
 0x240   : > { %7050 = vmatprep.mubr.msk.bf16.mxu1 %vm3294_vm6, %v9892_v52  ;;  %v3188_v0 = vld [vmem:[#allocation2 + $0xb0] sm:$0x1]  ;;  %v4291_v15 = vrot.slane %v4289_v41, 5  ;;  %v5192_v34 = vsel %vm8959_vm13, %v5190_v24, %v5191_v13  ;;  %v11160_v51 = vrot.slane %v9435_v43, 5  ;;  %v11163_v27 = vsel %vm8915_vm10, %v11162_v10, %v11151_v8  ;;  %v11164_v13 = vld [vmem:[#allocation9_spill] sm:$0xff] }
 0x241   : > { %v4244_v46 = vsel %vm8915_vm10, %v4239_v17, %v4243_v47  ;;  %v4265_v61 = vshll.u32 %v3188_v0, 16  ;;  %v9910_v40 = vcombine.low %v11161_v42, %v5192_v34  ;;  %v5198_v29 = vrot.slane %v3188_v0, 5  ;;  %v11166_v0 = vld [vmem:[#allocation5_spill] sm:$0xff] }
 0x242   : > { %v5197_v12 = vrot.slane %v11160_v51, 4  ;;  %v9917_v58 = vcombine.low %v11163_v27, %v4244_v46  ;;  %v6323_v24 = vcombine.low %v9894_v21, %v9899_v4  ;;  %v4263_v43 = vrot.slane %v4262_v33, 4 }
 0x243   : > { %v4292_v22 = vsel %vm8915_vm10, %v4287_v23, %v4291_v15  ;;  %v4267_v41 = vrot.slane %v4265_v61, 5  ;;  %v11165_v54 = vsel %vm8915_vm10, %v11164_v13, %v11152_v19  ;;  %v4615_v47 = vor.u32 %v4614_v3, %v9526_v56  ;;  %v11168_v3 = vld [vmem:[#allocation8_spill] sm:$0xff] }
 0x244   : > { %v9928_v17 = vcombine.low %v11165_v54, %v4292_v22  ;;  %v5199_v8 = vsel %vm8959_vm13, %v5197_v12, %v5198_v29  ;;  %7051 = vmatmul.mubr.msk.bf16.gmra.mxu1 %vm3294_vm6, %v9917_v58  ;;  %v3194_v33 = vld [vmem:[#allocation2 + $0xc8] sm:$0x1]  ;;  %v11167_v19 = vrot.slane %v9461_v1, 5  ;;  %v5205_v46 = vrot.slane %v3191_v62, 5  ;;  %v11170_v1 = vld [vmem:[#allocation10_spill] sm:$0xff] }
 0x245   : > { %v9936_v34 = vcombine.low %v11166_v0, %v5199_v8  ;;  %v4268_v23 = vsel %vm8915_vm10, %v4263_v43, %v4267_v41  ;;  %v4618_v15 = vshll.u32 %v3194_v33, 16  ;;  %v11169_v12 = vsel %vm8915_vm10, %v11168_v3, %v11158_v35  ;;  %v7320_v41 = vld [vmem:[%s10835_s7 + $0x18] sm:$0xff]  }
 0x246   : > { %v5204_v51 = vrot.slane %v11167_v19, 4  ;;  %7019 = vmatmul.mubr.msk.bf16.gmra.mxu0 %vm3294_vm6, %v6323_v24  ;;  %v9948_v61 = vcombine.low %v11169_v12, %v4268_v23  ;;  %v4616_v42 = vrot.slane %v4615_v47, 4  ;;  %v5518_v35 = vrot.slane %v3194_v33, 5  ;;  %v7327_v47 = vld [vmem:[#allocation2 + $0x8] sm:$0x1] }
 0x247   : > { %7062 = vmatprep.mubr.msk.bf16.mxu0 %vm3294_vm6, %v9591_v9  ;;  %v4620_v29 = vrot.slane %v4618_v15, 5  ;;  %v11171_v24 = vrot.slane %v9493_v37, 5  ;;  %v5317_v22 = vsel %vm3343_vm3, %v9578_v6, 0  ;;  %v7323_v6 = vld [vmem:[%s10835_s7 + $0x3c] sm:$0xff]   ;;  %v5100_v8 = vrot.slane %v7327_v47, 5 }
 0x248   : > { %v5206_v10 = vsel %vm8959_vm13, %v5204_v51, %v5205_v46  ;;  %7054 = vmatprep.mubr.msk.bf16.mxu1 %vm3294_vm6, %v9948_v61  ;;  %v6499_v3 = vrot.slane %v9894_v21, 9  ;;  %v5738_v12 = vrot.slane %v9899_v4, 5 }
 0x249   : > { %v9957_v62 = vcombine.low %v11170_v1, %v5206_v10  ;;  %v4621_v27 = vsel %vm8915_vm10, %v4616_v42, %v4620_v29  ;;  %v5517_v43 = vrot.slane %v11171_v24, 4  ;;  %v7324_v24 = vld [vmem:[%s10835_s7 + $0x60] sm:$0xff]  }
 0x24a   : > { %v9966_v9 = vcombine.low %v4611_v20, %v4621_v27  ;;  %v5540_v20 = vsel %vm3343_vm3, %v9622_v38, 0  ;;  %v4841_v38 = vshll.u32 %v9894_v21, 16 }
 0x24b   : > { %v5519_v56 = vsel %vm8959_vm13, %v5517_v43, %v5518_v35 }
 0x24c   : > { %7055 = vmatmul.mubr.msk.bf16.gmra.mxu1 %vm3294_vm6, %v9928_v17  ;;  %v9984_v37 = vcombine.low %v9568_v18, %v5519_v56  ;;  %v4838_v18 = vshrl.u32 %v9894_v21, 16  ;;  %v10071_v21 = vsel %vm8959_vm13, %v6499_v3, %v5738_v12 }
 0x24d   : > { %7098 = vmatprep.mubr.msk.bf16.mxu1 %vm3294_vm6, %v9635_v16 }
 0x24e   : > { %7063 = vmatmul.mubr.msk.bf16.vlgmr.msra.gmra.mxu0 %vm3294_vm6, %v9635_v16  ;;  %v4847_v16 = vshll.u32 %v9899_v4, 16 }
 0x24f   : > { %7131 = vmatpush3.bf16.msra.mxu0 %v5317_v22  ;;  %7066 = vmatprep.mubr.msk.bf16.mxu0 %vm3294_vm6, %v9659_v31 }
 0x250   : > { %7132 = vmatprep.subr.bf16.mxu0 %v7320_v41 }
 0x253   : > { %7133 = vmatpush3.bf16.msra.mxu0 %v7320_v41 }
 0x254   : > { %7099 = vmatmul.mubr.msk.bf16.vlgmr.msra.gmra.mxu1 %vm3294_vm6, %v9659_v31  ;;  %7252 = vmatprep.subr.msk.bf16.mxu0 %vm3343_vm3, %v9991_v36  ;;  %v4851_v31 = vshrl.u32 %v9899_v4, 16  ;;  %v5740_v4 = vrot.slane %v5738_v12, 4 }
 0x255   : > { %7102 = vmatprep.mubr.msk.bf16.mxu1 %vm3294_vm6, %v9684_v50  ;;  %7167 = vmatpush3.bf16.msra.mxu1 %v5540_v20 }
 0x256   : > { %7067 = vmatmul.mubr.msk.bf16.gmra.mxu0 %vm3294_vm6, %v9684_v50  ;;  %7168 = vmatprep.subr.bf16.mxu1 %v7323_v6  ;;  %v7325_v50 = vld [vmem:[#allocation2 + $0x4] sm:$0xf] }
 0x257   : > { %7070 = vmatprep.mubr.msk.bf16.mxu0 %vm3294_vm6, %v9713_v45 }
 0x259   : > { %7169 = vmatpush3.bf16.msra.mxu1 %v7323_v6 }
 0x25c   : > { %7103 = vmatmul.mubr.msk.bf16.gmra.mxu1 %vm3294_vm6, %v9713_v45  ;;  %v5097_v45 = vrot.slane %v7325_v50, 5 }
 0x25d   : > { %7106 = vmatprep.mubr.msk.bf16.mxu1 %vm3294_vm6, %v9736_v39 }
 0x25e   : > { %7071 = vmatmul.mubr.msk.bf16.gmra.mxu0 %vm3294_vm6, %v9736_v39  ;;  %v4840_v39 = vrot.slane %v4838_v18, 4  ;;  %v5099_v54 = vrot.slane %v5097_v45, 4 }
 0x25f   : > { %7074 = vmatprep.mubr.msk.bf16.mxu0 %vm3294_vm6, %v9765_v32 }
 0x260   : > { %v5101_v23 = vsel %vm8959_vm13, %v5099_v54, %v5100_v8 }
 0x264   : > { %7107 = vmatmul.mubr.msk.bf16.gmra.mxu1 %vm3294_vm6, %v9765_v32  ;;  %v4843_v32 = vrot.slane %v4841_v38, 5 }
 0x265   : > { %7110 = vmatprep.mubr.msk.bf16.mxu1 %vm3294_vm6, %v9791_v2 }
 0x266   : > { %7075 = vmatmul.mubr.msk.bf16.gmra.mxu0 %vm3294_vm6, %v9791_v2  ;;  %v4849_v2 = vrot.slane %v4847_v16, 5 }
 0x267   : > { %7078 = vmatprep.mubr.msk.bf16.mxu0 %vm3294_vm6, %v9816_v7 }
 0x26a   : > { %v6956_v46 = vpop.f32.mrf.mxu1 }
 0x26c   : > { %7111 = vmatmul.mubr.msk.bf16.gmra.mxu1 %vm3294_vm6, %v9816_v7  ;;  %v4853_v7 = vrot.slane %v4851_v31, 4  ;;  %v3562_v10 = vpop.f32.mrf.mxu1 }
 0x26d   : > { %7114 = vmatprep.mubr.msk.bf16.mxu1 %vm3294_vm6, %v9844_v26 }
 0x26e   : > { %7079 = vmatmul.mubr.msk.bf16.gmra.mxu0 %vm3294_vm6, %v9844_v26  ;;  %v3197_v26 = vld [vmem:[#allocation2 + $0xd4] sm:$0x1]  ;;  %v4854_v33 = vor.u32 %v4853_v7, %v4849_v2  ;;  %v6957_v35 = vpop.f32.mrf.mxu1 }
 0x26f   : > { %7082 = vmatprep.mubr.msk.bf16.mxu0 %vm3294_vm6, %v9867_v59  ;;  %v4857_v0 = vshll.u32 %v3197_v26, 16 }
 0x270   : > { %v4855_v19 = vrot.slane %v4854_v33, 4  ;;  %v3565_v43 = vpop.f32.mrf.mxu1 }
 0x271   : > { %v4859_v51 = vrot.slane %v4857_v0, 5 }
 0x273   : > { %v4860_v29 = vsel %vm8915_vm10, %v4855_v19, %v4859_v51 }
 0x274   : > { %7115 = vmatmul.mubr.msk.bf16.gmra.mxu1 %vm3294_vm6, %v9867_v59  ;;  %v7326_v59 = vld [vmem:[#allocation2] sm:$0xf] }
 0x275   : > { %7118 = vmatprep.mubr.msk.bf16.mxu1 %vm3294_vm6, %v9892_v52  ;;  %v6423_v13 = vrot.slane %v7326_v59, 9 }
 0x276   : > { %7083 = vmatmul.mubr.msk.bf16.gmra.mxu0 %vm3294_vm6, %v9892_v52  ;;  %v4844_v52 = vor.u32 %v4843_v32, %v4840_v39 }
 0x277   : > { %7086 = vmatprep.mubr.msk.bf16.mxu0 %vm3294_vm6, %v9917_v58 }
 0x278   : > { %v4845_v15 = vrot.slane %v4844_v52, 4 }
 0x27c   : > { %7119 = vmatmul.mubr.msk.bf16.gmra.mxu1 %vm3294_vm6, %v9917_v58  ;;  %v5098_v58 = vsel %vm8959_vm13, %v6423_v13, %v5097_v45 }
 0x27d   : > { %7122 = vmatprep.mubr.msk.bf16.mxu1 %vm3294_vm6, %v9948_v61  ;;  %v6442_v42 = vcombine.low %v5098_v58, %v5101_v23 }
 0x27e   : > { %7087 = vmatmul.mubr.msk.bf16.gmra.mxu0 %vm3294_vm6, %v9948_v61  ;;  %v4850_v61 = vsel %vm8915_vm10, %v4845_v15, %v4849_v2 }
 0x27f   : > { %7090 = vmatprep.mubr.msk.bf16.mxu0 %vm3294_vm6, %v9928_v17  ;;  %v6404_v1 = vcombine.low %v4850_v61, %v4860_v29 }
 0x284   : > { %7123 = vmatmul.mubr.msk.bf16.gmra.mxu1 %vm3294_vm6, %v9928_v17  ;;  %v5741_v17 = vrot.slane %v3197_v26, 5 }
 0x285   : > { %7126 = vmatprep.mubr.msk.bf16.mxu1 %vm3294_vm6, %v9966_v9 }
 0x286   : > { %7091 = vmatmul.mubr.msk.bf16.gmra.mxu0 %vm3294_vm6, %v9966_v9  ;;  %v10075_v27 = vsel %vm8959_vm13, %v5740_v4, %v5741_v17  ;;  %v5763_v9 = vsel %vm3343_vm3, %v9991_v36, 0 }
 0x287   : > { %7134 = vmatprep.mubr.msk.bf16.mxu0 %vm3294_vm6, %v6442_v42  ;;  %v6503_v55 = vcombine.low %v10071_v21, %v10075_v27 }
 0x289   : > { %v6920_v30 = vpop.f32.mrf.mxu0 }
 0x28a   : > { %v10089_v22 = vadd.f32 %v6956_v46, %v6920_v30 }
 0x28b   : > { %v6960_v41 = vpop.f32.mrf.mxu1  ;;  %v3381_v56 = vpop.f32.mrf.mxu0 }
 0x28c   : > { %7127 = vmatmul.mubr.msk.bf16.gmra.mxu1 %vm3294_vm6, %v6404_v1  ;;  %v10093_v36 = vadd.f32 %v3562_v10, %v3381_v56 }
 0x28d   : > { %7170 = vmatprep.mubr.msk.bf16.mxu1 %vm3294_vm6, %v9599_v60  ;;  %v3578_v20 = vpop.f32.mrf.mxu1  ;;  %v6921_v6 = vpop.f32.mrf.mxu0 }
 0x28e   : > { %7135 = vmatmul.mubr.msk.bf16.vlgmr.msra.gmra.mxu0 %vm3294_vm6, %v9599_v60  ;;  %v10095_v18 = vadd.f32 %v6957_v35, %v6921_v6 }
 0x28f   : > { %7203 = vmatpush3.bf16.msra.mxu0 %v5763_v9  ;;  %7138 = vmatprep.mubr.msk.bf16.mxu0 %vm3294_vm6, %v9625_v5  ;;  %v6961_v38 = vpop.f32.mrf.mxu1  ;;  %v3384_v16 = vpop.f32.mrf.mxu0 }
 0x290   : > { %7204 = vmatprep.subr.bf16.mxu0 %v7324_v24  ;;  %v10099_v60 = vadd.f32 %v3565_v43, %v3384_v16 }
 0x291   : > { %v3581_v31 = vpop.f32.mrf.mxu1  ;;  %v6924_v50 = vpop.f32.mrf.mxu0 }
 0x292   : > { %v10105_v45 = vadd.f32 %v6960_v41, %v6924_v50 }
 0x293   : > { %7205 = vmatpush3.bf16.msra.mxu0 %v7324_v24  ;;  %v6964_v39 = vpop.f32.mrf.mxu1  ;;  %v3397_v32 = vpop.f32.mrf.mxu0 }
 0x294   : > { %7171 = vmatmul.mubr.msk.bf16.vlgmr.msra.gmra.mxu1 %vm3294_vm6, %v9625_v5  ;;  %v10109_v2 = vadd.f32 %v3578_v20, %v3397_v32 }
 0x295   : > { %7174 = vmatprep.mubr.msk.bf16.mxu1 %vm3294_vm6, %v9651_v44  ;;  %v3594_v7 = vpop.f32.mrf.mxu1  ;;  %v6925_v26 = vpop.f32.mrf.mxu0 }
 0x296   : > { %7139 = vmatmul.mubr.msk.bf16.gmra.mxu0 %vm3294_vm6, %v9651_v44  ;;  %v10111_v59 = vadd.f32 %v6961_v38, %v6925_v26 }
 0x297   : > { %7142 = vmatprep.mubr.msk.bf16.mxu0 %vm3294_vm6, %v9673_v57  ;;  %v6965_v13 = vpop.f32.mrf.mxu1  ;;  %v3400_v54 = vpop.f32.mrf.mxu0 }
 0x298   : > { %v10115_v47 = vadd.f32 %v3581_v31, %v3400_v54 }
 0x299   : > { %v3597_v8 = vpop.f32.mrf.mxu1  ;;  %v6928_v52 = vpop.f32.mrf.mxu0 }
 0x29a   : > { %v10121_v33 = vadd.f32 %v6964_v39, %v6928_v52 }
 0x29b   : > { %v6968_v0 = vpop.f32.mrf.mxu1  ;;  %v3413_v58 = vpop.f32.mrf.mxu0 }
 0x29c   : > { %7175 = vmatmul.mubr.msk.bf16.gmra.mxu1 %vm3294_vm6, %v9673_v57  ;;  %v10125_v23 = vadd.f32 %v3594_v7, %v3413_v58 }
 0x29d   : > { %7178 = vmatprep.mubr.msk.bf16.mxu1 %vm3294_vm6, %v9705_v53  ;;  %v3610_v15 = vpop.f32.mrf.mxu1  ;;  %v6929_v19 = vpop.f32.mrf.mxu0 }
 0x29e   : > { %7143 = vmatmul.mubr.msk.bf16.gmra.mxu0 %vm3294_vm6, %v9705_v53  ;;  %v10127_v51 = vadd.f32 %v6965_v13, %v6929_v19 }
 0x29f   : > { %7146 = vmatprep.mubr.msk.bf16.mxu0 %vm3294_vm6, %v9725_v11  ;;  %v6969_v46 = vpop.f32.mrf.mxu1  ;;  %v3416_v3 = vpop.f32.mrf.mxu0 }
 0x2a0   : > { %v10131_v12 = vadd.f32 %v3597_v8, %v3416_v3 }
 0x2a1   : > { %v3613_v42 = vpop.f32.mrf.mxu1  ;;  %v6932_v61 = vpop.f32.mrf.mxu0 }
 0x2a2   : > { %v10137_v29 = vadd.f32 %v6968_v0, %v6932_v61 }
 0x2a3   : > { %v6972_v10 = vpop.f32.mrf.mxu1  ;;  %v3429_v4 = vpop.f32.mrf.mxu0 }
 0x2a4   : > { %7179 = vmatmul.mubr.msk.bf16.gmra.mxu1 %vm3294_vm6, %v9725_v11  ;;  %v10141_v17 = vadd.f32 %v3610_v15, %v3429_v4 }
 0x2a5   : > { %7182 = vmatprep.mubr.msk.bf16.mxu1 %vm3294_vm6, %v9757_v63  ;;  %v3626_v1 = vpop.f32.mrf.mxu1  ;;  %v6933_v35 = vpop.f32.mrf.mxu0 }
 0x2a6   : > { %7147 = vmatmul.mubr.msk.bf16.gmra.mxu0 %vm3294_vm6, %v9757_v63  ;;  %v10143_v9 = vadd.f32 %v6969_v46, %v6933_v35 }
 0x2a7   : > { %7150 = vmatprep.mubr.msk.bf16.mxu0 %vm3294_vm6, %v9777_v49  ;;  %v6973_v24 = vpop.f32.mrf.mxu1  ;;  %v3432_v43 = vpop.f32.mrf.mxu0 }
 0x2a8   : > { %v10147_v30 = vadd.f32 %v3613_v42, %v3432_v43 }
 0x2a9   : > { %v3629_v41 = vpop.f32.mrf.mxu1  ;;  %v6936_v56 = vpop.f32.mrf.mxu0 }
 0x2aa   : > { %v10153_v20 = vadd.f32 %v6972_v10, %v6936_v56 }
 0x2ab   : > { %v6976_v6 = vpop.f32.mrf.mxu1  ;;  %v3445_v38 = vpop.f32.mrf.mxu0 }
 0x2ac   : > { %7183 = vmatmul.mubr.msk.bf16.gmra.mxu1 %vm3294_vm6, %v9777_v49  ;;  %v10157_v16 = vadd.f32 %v3626_v1, %v3445_v38 }
 0x2ad   : > { %7186 = vmatprep.mubr.msk.bf16.mxu1 %vm3294_vm6, %v9809_v48  ;;  %v3642_v31 = vpop.f32.mrf.mxu1  ;;  %v6937_v50 = vpop.f32.mrf.mxu0 }
 0x2ae   : > { %7151 = vmatmul.mubr.msk.bf16.gmra.mxu0 %vm3294_vm6, %v9809_v48  ;;  %v10159_v39 = vadd.f32 %v6973_v24, %v6937_v50 }
 0x2af   : > { %7154 = vmatprep.mubr.msk.bf16.mxu0 %vm3294_vm6, %v9828_v28  ;;  %v6977_v32 = vpop.f32.mrf.mxu1  ;;  %v3448_v7 = vpop.f32.mrf.mxu0 }
 0x2b0   : > { %v10163_v26 = vadd.f32 %v3629_v41, %v3448_v7 }
 0x2b1   : > { %v3645_v13 = vpop.f32.mrf.mxu1  ;;  %v6940_v54 = vpop.f32.mrf.mxu0 }
 0x2b2   : > { %v10169_v8 = vadd.f32 %v6976_v6, %v6940_v54 }
 0x2b3   : > { %v3461_v0 = vpop.f32.mrf.mxu0 }
 0x2b4   : > { %7187 = vmatmul.mubr.msk.bf16.gmra.mxu1 %vm3294_vm6, %v9828_v28  ;;  %v6980_v52 = vpop.f32.mrf.mxu1  ;;  %v10173_v58 = vadd.f32 %v3642_v31, %v3461_v0 }
 0x2b5   : > { %7190 = vmatprep.mubr.msk.bf16.mxu1 %vm3294_vm6, %v9860_v25  ;;  %v6941_v19 = vpop.f32.mrf.mxu0 }
 0x2b6   : > { %7155 = vmatmul.mubr.msk.bf16.gmra.mxu0 %vm3294_vm6, %v9860_v25  ;;  %v3658_v15 = vpop.f32.mrf.mxu1  ;;  %v10175_v46 = vadd.f32 %v6977_v32, %v6941_v19 }
 0x2b7   : > { %7158 = vmatprep.mubr.msk.bf16.mxu0 %vm3294_vm6, %v9879_v14  ;;  %v3464_v42 = vpop.f32.mrf.mxu0 }
 0x2b8   : > { %v6981_v3 = vpop.f32.mrf.mxu1  ;;  %v10179_v61 = vadd.f32 %v3645_v13, %v3464_v42 }
 0x2ba   : > { %v3661_v1 = vpop.f32.mrf.mxu1 }
 0x2bc   : > { %7191 = vmatmul.mubr.msk.bf16.gmra.mxu1 %vm3294_vm6, %v9879_v14 }
 0x2bd   : > { %7194 = vmatprep.mubr.msk.bf16.mxu1 %vm3294_vm6, %v9910_v40 }
 0x2be   : > { %v6944_v10 = vpop.f32.mrf.mxu0  ;;  %7159 = vmatmul.mubr.msk.bf16.gmra.mxu0 %vm3294_vm6, %v9910_v40 }
 0x2bf   : > { %v10185_v4 = vadd.f32 %v6980_v52, %v6944_v10  ;;  %7162 = vmatprep.mubr.msk.bf16.mxu0 %vm3294_vm6, %v9936_v34 }
 0x2c0   : > { %v3477_v35 = vpop.f32.mrf.mxu0 }
 0x2c1   : > { %v10189_v24 = vadd.f32 %v3658_v15, %v3477_v35 }
 0x2c2   : > { %v6945_v43 = vpop.f32.mrf.mxu0  ;;  %v6984_v41 = vpop.f32.mrf.mxu1 }
 0x2c3   : > { %v10191_v56 = vadd.f32 %v6981_v3, %v6945_v43 }
 0x2c4   : > { %v3480_v6 = vpop.f32.mrf.mxu0  ;;  %v3674_v38 = vpop.f32.mrf.mxu1  ;;  %7195 = vmatmul.mubr.msk.bf16.gmra.mxu1 %vm3294_vm6, %v9936_v34 }
 0x2c5   : > { %v10195_v31 = vadd.f32 %v3661_v1, %v3480_v6  ;;  %7198 = vmatprep.mubr.msk.bf16.mxu1 %vm3294_vm6, %v9957_v62 }
 0x2c6   : > { %v6948_v50 = vpop.f32.mrf.mxu0  ;;  %7163 = vmatmul.mubr.msk.bf16.gmra.mxu0 %vm3294_vm6, %v9957_v62  ;;  %v6985_v7 = vpop.f32.mrf.mxu1 }
 0x2c7   : > { %v10201_v32 = vadd.f32 %v6984_v41, %v6948_v50  ;;  %7206 = vmatprep.mubr.msk.bf16.mxu0 %vm3294_vm6, %v9625_v5 }
 0x2c8   : > { %v3493_v13 = vpop.f32.mrf.mxu0  ;;  %v3677_v15 = vpop.f32.mrf.mxu1 }
 0x2c9   : > { %v10205_v54 = vadd.f32 %v3674_v38, %v3493_v13 }
 0x2ca   : > { %v6949_v52 = vpop.f32.mrf.mxu0 }
 0x2cb   : > { %v10207_v0 = vadd.f32 %v6985_v7, %v6949_v52 }
 0x2cc   : > { %v3496_v19 = vpop.f32.mrf.mxu0  ;;  %7199 = vmatmul.mubr.msk.bf16.gmra.mxu1 %vm3294_vm6, %v9984_v37 }
 0x2cd   : > { %v10211_v3 = vadd.f32 %v3677_v15, %v3496_v19 }
 0x2ce   : > { %v6992_v42 = vpop.f32.mrf.mxu0  ;;  %7207 = vmatmul.mubr.msk.bf16.vlgmr.msra.gmra.mxu0 %vm3294_vm6, %v9651_v44 }
 0x2cf   : > { %v3876_v5 = vadd.f32 %v6992_v42, %v10089_v22  ;;  %7210 = vmatprep.mubr.msk.bf16.mxu0 %vm3294_vm6, %v9673_v57 }
 0x2d0   : > { %v3747_v10 = vpop.f32.mrf.mxu0 }
 0x2d1   : > { %v3874_v1 = vadd.f32 %v3747_v10, %v10093_v36 }
 0x2d2   : > { %v6993_v35 = vpop.f32.mrf.mxu0 }
 0x2d3   : > { %v3877_v43 = vadd.f32 %v6993_v35, %v10095_v18 }
 0x2d4   : > { %v3750_v41 = vpop.f32.mrf.mxu0  ;;  %v7028_v6 = vpop.f32.mrf.mxu1 }
 0x2d5   : > { %v3875_v38 = vadd.f32 %v3750_v41, %v10099_v60  ;;  %v10221_v50 = vadd.f32 %v7028_v6, %v3876_v5 }
 0x2d6   : > { %v6996_v7 = vpop.f32.mrf.mxu0  ;;  %v4439_v13 = vpop.f32.mrf.mxu1  ;;  %7211 = vmatmul.mubr.msk.bf16.gmra.mxu0 %vm3294_vm6, %v9705_v53 }
 0x2d7   : > { %v3880_v44 = vadd.f32 %v6996_v7, %v10105_v45  ;;  %v10226_v57 = vadd.f32 %v4439_v13, %v3874_v1  ;;  %7214 = vmatprep.mubr.msk.bf16.mxu0 %vm3294_vm6, %v9725_v11 }
 0x2d8   : > { %v3763_v22 = vpop.f32.mrf.mxu0  ;;  %v7029_v36 = vpop.f32.mrf.mxu1 }
 0x2d9   : > { %v3878_v18 = vadd.f32 %v3763_v22, %v10109_v2  ;;  %v10231_v52 = vadd.f32 %v7029_v36, %v3877_v43 }
 0x2da   : > { %v6997_v60 = vpop.f32.mrf.mxu0  ;;  %v4442_v15 = vpop.f32.mrf.mxu1 }
 0x2db   : > { %v3881_v19 = vadd.f32 %v6997_v60, %v10111_v59  ;;  %v10234_v42 = vadd.f32 %v4442_v15, %v3875_v38 }
 0x2dc   : > { %v3766_v53 = vpop.f32.mrf.mxu0  ;;  %v7032_v5 = vpop.f32.mrf.mxu1 }
 0x2dd   : > { %v3879_v45 = vadd.f32 %v3766_v53, %v10115_v47  ;;  %v10237_v10 = vadd.f32 %v7032_v5, %v3880_v44 }
 0x2de   : > { %v7000_v1 = vpop.f32.mrf.mxu0  ;;  %v4455_v11 = vpop.f32.mrf.mxu1  ;;  %7215 = vmatmul.mubr.msk.bf16.gmra.mxu0 %vm3294_vm6, %v9757_v63 }
 0x2df   : > { %v3884_v2 = vadd.f32 %v7000_v1, %v10121_v33  ;;  %v10242_v35 = vadd.f32 %v4455_v11, %v3878_v18  ;;  %7218 = vmatprep.mubr.msk.bf16.mxu0 %vm3294_vm6, %v9777_v49 }
 0x2e0   : > { %v3779_v59 = vpop.f32.mrf.mxu0  ;;  %v7033_v43 = vpop.f32.mrf.mxu1 }
 0x2e1   : > { %v3882_v41 = vadd.f32 %v3779_v59, %v10125_v23  ;;  %v10247_v6 = vadd.f32 %v7033_v43, %v3881_v19 }
 0x2e2   : > { %v7001_v47 = vpop.f32.mrf.mxu0  ;;  %v4458_v38 = vpop.f32.mrf.mxu1 }
 0x2e3   : > { %v3885_v7 = vadd.f32 %v7001_v47, %v10127_v51  ;;  %v10250_v13 = vadd.f32 %v4458_v38, %v3879_v45 }
 0x2e4   : > { %v3782_v63 = vpop.f32.mrf.mxu0  ;;  %v7036_v44 = vpop.f32.mrf.mxu1 }
 0x2e5   : > { %v3883_v33 = vadd.f32 %v3782_v63, %v10131_v12  ;;  %v10253_v22 = vadd.f32 %v7036_v44, %v3884_v2 }
 0x2e6   : > { %v7004_v36 = vpop.f32.mrf.mxu0  ;;  %v4471_v49 = vpop.f32.mrf.mxu1  ;;  %7219 = vmatmul.mubr.msk.bf16.gmra.mxu0 %vm3294_vm6, %v9809_v48 }
 0x2e7   : > { %v3888_v23 = vadd.f32 %v7004_v36, %v10137_v29  ;;  %v10258_v18 = vadd.f32 %v4471_v49, %v3882_v41  ;;  %7222 = vmatprep.mubr.msk.bf16.mxu0 %vm3294_vm6, %v9828_v28 }
 0x2e8   : > { %v3795_v51 = vpop.f32.mrf.mxu0  ;;  %v7037_v60 = vpop.f32.mrf.mxu1 }
 0x2e9   : > { %v3886_v15 = vadd.f32 %v3795_v51, %v10141_v17  ;;  %v10263_v19 = vadd.f32 %v7037_v60, %v3885_v7 }
 0x2ea   : > { %v7005_v12 = vpop.f32.mrf.mxu0  ;;  %v4474_v53 = vpop.f32.mrf.mxu1 }
 0x2eb   : > { %v3889_v5 = vadd.f32 %v7005_v12, %v10143_v9  ;;  %v10266_v45 = vadd.f32 %v4474_v53, %v3883_v33 }
 0x2ec   : > { %v3798_v48 = vpop.f32.mrf.mxu0  ;;  %v7040_v1 = vpop.f32.mrf.mxu1 }
 0x2ed   : > { %v3887_v29 = vadd.f32 %v3798_v48, %v10147_v30  ;;  %v10269_v11 = vadd.f32 %v7040_v1, %v3888_v23 }
 0x2ee   : > { %v7008_v2 = vpop.f32.mrf.mxu0  ;;  %v4487_v28 = vpop.f32.mrf.mxu1  ;;  %7223 = vmatmul.mubr.msk.bf16.gmra.mxu0 %vm3294_vm6, %v9860_v25 }
 0x2ef   : > { %v3892_v17 = vadd.f32 %v7008_v2, %v10153_v20  ;;  %v10274_v59 = vadd.f32 %v4487_v28, %v3886_v15  ;;  %7226 = vmatprep.mubr.msk.bf16.mxu0 %vm3294_vm6, %v9879_v14 }
 0x2f0   : > { %v3811_v9 = vpop.f32.mrf.mxu0  ;;  %v7041_v43 = vpop.f32.mrf.mxu1 }
 0x2f1   : > { %v3890_v41 = vadd.f32 %v3811_v9, %v10157_v16  ;;  %v10279_v47 = vadd.f32 %v7041_v43, %v3889_v5 }
 0x2f2   : > { %v7009_v30 = vpop.f32.mrf.mxu0  ;;  %v4490_v38 = vpop.f32.mrf.mxu1 }
 0x2f3   : > { %v3893_v7 = vadd.f32 %v7009_v30, %v10159_v39  ;;  %v10282_v63 = vadd.f32 %v4490_v38, %v3887_v29 }
 0x2f4   : > { %v3814_v25 = vpop.f32.mrf.mxu0  ;;  %v7044_v44 = vpop.f32.mrf.mxu1 }
 0x2f5   : > { %v3891_v20 = vadd.f32 %v3814_v25, %v10163_v26  ;;  %v10285_v33 = vadd.f32 %v7044_v44, %v3892_v17 }
 0x2f6   : > { %v7012_v36 = vpop.f32.mrf.mxu0  ;;  %v4503_v14 = vpop.f32.mrf.mxu1  ;;  %7227 = vmatmul.mubr.msk.bf16.gmra.mxu0 %vm3294_vm6, %v9910_v40 }
 0x2f7   : > { %v3896_v16 = vadd.f32 %v7012_v36, %v10169_v8  ;;  %v10290_v49 = vadd.f32 %v4503_v14, %v3890_v41  ;;  %7230 = vmatprep.mubr.msk.bf16.mxu0 %vm3294_vm6, %v9936_v34 }
 0x2f8   : > { %v3827_v39 = vpop.f32.mrf.mxu0  ;;  %v7045_v23 = vpop.f32.mrf.mxu1 }
 0x2f9   : > { %v3894_v51 = vadd.f32 %v3827_v39, %v10173_v58  ;;  %v10295_v60 = vadd.f32 %v7045_v23, %v3893_v7 }
 0x2fa   : > { %v7013_v26 = vpop.f32.mrf.mxu0  ;;  %v4506_v15 = vpop.f32.mrf.mxu1 }
 0x2fb   : > { %v3897_v12 = vadd.f32 %v7013_v26, %v10175_v46  ;;  %v10298_v53 = vadd.f32 %v4506_v15, %v3891_v20 }
 0x2fc   : > { %v3830_v40 = vpop.f32.mrf.mxu0  ;;  %v7048_v5 = vpop.f32.mrf.mxu1 }
 0x2fd   : > { %v3895_v8 = vadd.f32 %v3830_v40, %v10179_v61  ;;  %v10301_v48 = vadd.f32 %v7048_v5, %v3896_v16 }
 0x2fe   : > { %v7016_v1 = vpop.f32.mrf.mxu0  ;;  %v4519_v34 = vpop.f32.mrf.mxu1  ;;  %7231 = vmatmul.mubr.msk.bf16.gmra.mxu0 %vm3294_vm6, %v9957_v62 }
 0x2ff   : > { %v3900_v58 = vadd.f32 %v7016_v1, %v10185_v4  ;;  %v10306_v29 = vadd.f32 %v4519_v34, %v3894_v51  ;;  %7234 = vmatprep.mubr.msk.bf16.mxu0 %vm3294_vm6, %v9984_v37 }
 0x300   : > { %v3843_v46 = vpop.f32.mrf.mxu0  ;;  %v7049_v2 = vpop.f32.mrf.mxu1 }
 0x301   : > { %v3898_v28 = vadd.f32 %v3843_v46, %v10189_v24  ;;  %v10311_v17 = vadd.f32 %v7049_v2, %v3897_v12 }
 0x302   : > { %v7017_v61 = vpop.f32.mrf.mxu0  ;;  %v4522_v9 = vpop.f32.mrf.mxu1 }
 0x303   : > { %v3901_v43 = vadd.f32 %v7017_v61, %v10191_v56  ;;  %v10314_v41 = vadd.f32 %v4522_v9, %v3895_v8 }
 0x304   : > { %v3846_v62 = vpop.f32.mrf.mxu0  ;;  %v7052_v30 = vpop.f32.mrf.mxu1 }
 0x305   : > { %v3899_v4 = vadd.f32 %v3846_v62, %v10195_v31  ;;  %v10317_v38 = vadd.f32 %v7052_v30, %v3900_v58 }
 0x306   : > { %v7020_v7 = vpop.f32.mrf.mxu0  ;;  %v4535_v37 = vpop.f32.mrf.mxu1  ;;  %7235 = vmatmul.mubr.msk.bf16.gmra.mxu0 %vm3294_vm6, %v6503_v55 }
 0x307   : > { %v3904_v24 = vadd.f32 %v7020_v7, %v10201_v32  ;;  %v10324_v25 = vadd.f32 %v4535_v37, %v3898_v28 }
 0x308   : > { %v3859_v56 = vpop.f32.mrf.mxu0  ;;  %v7053_v44 = vpop.f32.mrf.mxu1 }
 0x309   : > { %v3902_v20 = vadd.f32 %v3859_v56, %v10205_v54  ;;  %v10327_v36 = vadd.f32 %v7053_v44, %v3901_v43 }
 0x30a   : > { %v7021_v31 = vpop.f32.mrf.mxu0  ;;  %v4538_v14 = vpop.f32.mrf.mxu1 }
 0x30b   : > { %v3905_v16 = vadd.f32 %v7021_v31, %v10207_v0  ;;  %v10330_v39 = vadd.f32 %v4538_v14, %v3899_v4 }
 0x30c   : > { %v3862_v23 = vpop.f32.mrf.mxu0  ;;  %v7056_v21 = vpop.f32.mrf.mxu1 }
 0x30d   : > { %v3903_v27 = vadd.f32 %v3862_v23, %v10211_v3  ;;  %v10333_v55 = vadd.f32 %v7056_v21, %v3904_v24 }
 0x30e   : > { %v4551_v32 = vpop.f32.mrf.mxu1  ;;  %v7064_v51 = vpop.f32.mrf.mxu0 }
 0x30f   : > { %v10335_v26 = vadd.f32 %v4551_v32, %v3902_v20  ;;  %v10338_v54 = vadd.f32 %v7064_v51, %v10221_v50 }
 0x310   : > { %v7057_v15 = vpop.f32.mrf.mxu1  ;;  %v4678_v12 = vpop.f32.mrf.mxu0 }
 0x311   : > { %v10340_v40 = vadd.f32 %v7057_v15, %v3905_v16  ;;  %v10343_v0 = vadd.f32 %v4678_v12, %v10226_v57 }
 0x312   : > { %v4554_v5 = vpop.f32.mrf.mxu1  ;;  %v7065_v8 = vpop.f32.mrf.mxu0 }
 0x313   : > { %v10345_v1 = vadd.f32 %v4554_v5, %v3903_v27  ;;  %v10348_v3 = vadd.f32 %v7065_v8, %v10231_v52 }
 0x314   : > { %v4681_v34 = vpop.f32.mrf.mxu0  ;;  %v10350_v58 = vpop.f32.mrf.mxu1 }
 0x315   : > { %v10353_v50 = vadd.f32 %v4681_v34, %v10234_v42 }
 0x316   : > { %v7068_v46 = vpop.f32.mrf.mxu0  ;;  %v10355_v2 = vpop.f32.mrf.mxu1 }
 0x317   : > { %v10358_v28 = vadd.f32 %v7068_v46, %v10237_v10 }
 0x318   : > { %v4694_v57 = vpop.f32.mrf.mxu0  ;;  %v10360_v61 = vpop.f32.mrf.mxu1 }
 0x319   : > { %v10363_v9 = vadd.f32 %v4694_v57, %v10242_v35 }
 0x31a   : > { %v7069_v52 = vpop.f32.mrf.mxu0  ;;  %v10365_v43 = vpop.f32.mrf.mxu1 }
 0x31b   : > { %v10368_v62 = vadd.f32 %v7069_v52, %v10247_v6 }
 0x31c   : > { %v4697_v42 = vpop.f32.mrf.mxu0  ;;  %v10370_v30 = vpop.f32.mrf.mxu1 }
 0x31d   : > { %v10373_v4 = vadd.f32 %v4697_v42, %v10250_v13 }
 0x31e   : > { %v7072_v10 = vpop.f32.mrf.mxu0  ;;  %v10375_v7 = vpop.f32.mrf.mxu1 }
 0x31f   : > { %v10378_v37 = vadd.f32 %v7072_v10, %v10253_v22 }
 0x320   : > { %v4710_v35 = vpop.f32.mrf.mxu0  ;;  %v10380_v24 = vpop.f32.mrf.mxu1 }
 0x321   : > { %v10383_v56 = vadd.f32 %v4710_v35, %v10258_v18 }
 0x322   : > { %v7073_v6 = vpop.f32.mrf.mxu0  ;;  %v10385_v44 = vpop.f32.mrf.mxu1 }
 0x323   : > { %v10388_v20 = vadd.f32 %v7073_v6, %v10263_v19 }
 0x324   : > { %v4713_v13 = vpop.f32.mrf.mxu0  ;;  %v10390_v31 = vpop.f32.mrf.mxu1 }
 0x325   : > { %v10393_v14 = vadd.f32 %v4713_v13, %v10266_v45 }
 0x326   : > { %v7076_v22 = vpop.f32.mrf.mxu0  ;;  %v10395_v16 = vpop.f32.mrf.mxu1 }
 0x327   : > { %v10398_v23 = vadd.f32 %v7076_v22, %v10269_v11 }
 0x328   : > { %v4726_v18 = vpop.f32.mrf.mxu0  ;;  %v10400_v21 = vpop.f32.mrf.mxu1 }
 0x329   : > { %v10403_v27 = vadd.f32 %v4726_v18, %v10274_v59 }
 0x32a   : > { %v7077_v19 = vpop.f32.mrf.mxu0  ;;  %v10405_v32 = vpop.f32.mrf.mxu1 }
 0x32b   : > { %v10408_v51 = vadd.f32 %v7077_v19, %v10279_v47 }
 0x32c   : > { %v4729_v45 = vpop.f32.mrf.mxu0  ;;  %v10410_v15 = vpop.f32.mrf.mxu1 }
 0x32d   : > { %v10413_v12 = vadd.f32 %v4729_v45, %v10282_v63 }
 0x32e   : > { %v7080_v11 = vpop.f32.mrf.mxu0  ;;  %v10415_v5 = vpop.f32.mrf.mxu1 }
 0x32f   : > { %11172 = vst [vmem:[#allocation43_spill] sm:$0xff] %v10413_v12  ;;  %v10418_v8 = vadd.f32 %v7080_v11, %v10285_v33 }
 0x330   : > { %v4742_v59 = vpop.f32.mrf.mxu0  ;;  %v10420_v34 = vpop.f32.mrf.mxu1 }
 0x331   : > { %11173 = vst [vmem:[#allocation6_spill] sm:$0xff] %v10418_v8  ;;  %11174 = vst [vmem:[#allocation51_spill] sm:$0xff] %v10420_v34  ;;  %v10423_v46 = vadd.f32 %v4742_v59, %v10290_v49 }
 0x332   : > { %v7081_v47 = vpop.f32.mrf.mxu0  ;;  %v10425_v57 = vpop.f32.mrf.mxu1 }
 0x333   : > { %11175 = vst [vmem:[#allocation11_spill] sm:$0xff] %v10423_v46  ;;  %11176 = vst [vmem:[#allocation48_spill] sm:$0xff] %v10425_v57  ;;  %v10428_v52 = vadd.f32 %v7081_v47, %v10295_v60 }
 0x334   : > { %v4745_v63 = vpop.f32.mrf.mxu0  ;;  %v10430_v42 = vpop.f32.mrf.mxu1 }
 0x335   : > { %11177 = vst [vmem:[#allocation18_spill] sm:$0xff] %v10428_v52  ;;  %11178 = vst [vmem:[#allocation44_spill] sm:$0xff] %v10430_v42  ;;  %v10433_v10 = vadd.f32 %v4745_v63, %v10298_v53 }
 0x336   : > { %v7084_v33 = vpop.f32.mrf.mxu0  ;;  %v10435_v35 = vpop.f32.mrf.mxu1 }
 0x337   : > { %11179 = vst [vmem:[#allocation47_spill] sm:$0xff] %v10433_v10  ;;  %11180 = vst [vmem:[#allocation45_spill] sm:$0xff] %v10435_v35  ;;  %v10438_v6 = vadd.f32 %v7084_v33, %v10301_v48 }
 0x338   : > { %v4758_v49 = vpop.f32.mrf.mxu0  ;;  %v10440_v13 = vpop.f32.mrf.mxu1 }
 0x339   : > { %11181 = vst [vmem:[#allocation52_spill] sm:$0xff] %v10438_v6  ;;  %11182 = vst [vmem:[#allocation50_spill] sm:$0xff] %v10440_v13  ;;  %v10443_v22 = vadd.f32 %v4758_v49, %v10306_v29 }
 0x33a   : > { %v7085_v60 = vpop.f32.mrf.mxu0  ;;  %v10445_v18 = vpop.f32.mrf.mxu1 }
 0x33b   : > { %11183 = vst [vmem:[#allocation49_spill] sm:$0xff] %v10443_v22  ;;  %11184 = vst [vmem:[#allocation53_spill] sm:$0xff] %v10445_v18  ;;  %v10448_v19 = vadd.f32 %v7085_v60, %v10311_v17 }
 0x33c   : > { %v4761_v53 = vpop.f32.mrf.mxu0  ;;  %v10450_v45 = vpop.f32.mrf.mxu1 }
 0x33d   : > { %11185 = vst [vmem:[#allocation38_spill] sm:$0xff] %v10448_v19  ;;  %11186 = vst [vmem:[#allocation12_spill] sm:$0xff] %v10450_v45  ;;  %v10453_v11 = vadd.f32 %v4761_v53, %v10314_v41 }
 0x33e   : > { %v7088_v48 = vpop.f32.mrf.mxu0  ;;  %v10455_v59 = vpop.f32.mrf.mxu1 }
 0x33f   : > { %11187 = vst [vmem:[#allocation30_spill] sm:$0xff] %v10453_v11  ;;  %11188 = vst [vmem:[#allocation20_spill] sm:$0xff] %v10455_v59  ;;  %v10458_v47 = vadd.f32 %v7088_v48, %v10317_v38 }
 0x340   : > { %v4774_v29 = vpop.f32.mrf.mxu0  ;;  %v10460_v63 = vpop.f32.mrf.mxu1 }
 0x341   : > { %11189 = vst [vmem:[#allocation14_spill] sm:$0xff] %v10458_v47  ;;  %11190 = vst [vmem:[#allocation28_spill] sm:$0xff] %v10460_v63  ;;  %v10463_v33 = vadd.f32 %v4774_v29, %v10324_v25 }
 0x342   : > { %v7089_v17 = vpop.f32.mrf.mxu0  ;;  %v10465_v49 = vpop.f32.mrf.mxu1 }
 0x343   : > { %11191 = vst [vmem:[#allocation33_spill] sm:$0xff] %v10463_v33  ;;  %11192 = vst [vmem:[#allocation22_spill] sm:$0xff] %v10465_v49  ;;  %v10468_v60 = vadd.f32 %v7089_v17, %v10327_v36 }
 0x344   : > { %v4777_v41 = vpop.f32.mrf.mxu0  ;;  %v10470_v53 = vpop.f32.mrf.mxu1 }
 0x345   : > { %11193 = vst [vmem:[#allocation24_spill] sm:$0xff] %v10468_v60  ;;  %11194 = vst [vmem:[#allocation37_spill] sm:$0xff] %v10470_v53  ;;  %v10473_v11 = vadd.f32 %v4777_v41, %v10330_v39 }
 0x346   : > { %v7092_v38 = vpop.f32.mrf.mxu0  ;;  %v10475_v48 = vpop.f32.mrf.mxu1 }
 0x347   : > { %11195 = vst [vmem:[#allocation39_spill] sm:$0xff] %v10473_v11  ;;  %11196 = vst [vmem:[#allocation36_spill] sm:$0xff] %v10475_v48  ;;  %v10478_v47 = vadd.f32 %v7092_v38, %v10333_v55 }
 0x348   : > { %v4790_v25 = vpop.f32.mrf.mxu0  ;;  %v10480_v29 = vpop.f32.mrf.mxu1 }
 0x349   : > { %11197 = vst [vmem:[#allocation16_spill] sm:$0xff] %v10478_v47  ;;  %11198 = vst [vmem:[#allocation27_spill] sm:$0xff] %v10480_v29  ;;  %v10483_v33 = vadd.f32 %v4790_v25, %v10335_v26 }
 0x34a   : > { %v7093_v36 = vpop.f32.mrf.mxu0  ;;  %v10485_v17 = vpop.f32.mrf.mxu1 }
 0x34b   : > { %11199 = vst [vmem:[#allocation42_spill] sm:$0xff] %v10483_v33  ;;  %11200 = vst [vmem:[#allocation15_spill] sm:$0xff] %v10485_v17  ;;  %v10488_v60 = vadd.f32 %v7093_v36, %v10340_v40 }
 0x34c   : > { %v4793_v39 = vpop.f32.mrf.mxu0  ;;  %v10490_v41 = vpop.f32.mrf.mxu1 }
 0x34d   : > { %11201 = vst [vmem:[#allocation19_spill] sm:$0xff] %v10488_v60  ;;  %11202 = vst [vmem:[#allocation41_spill] sm:$0xff] %v10490_v41  ;;  %v10493_v11 = vadd.f32 %v4793_v39, %v10345_v1 }
 0x34e   : > { %v10495_v55 = vpop.f32.mrf.mxu1  ;;  %v7136_v38 = vpop.f32.mrf.mxu0 }
 0x34f   : > { %11203 = vst [vmem:[#allocation29_spill] sm:$0xff] %v10493_v11  ;;  %11204 = vst [vmem:[#allocation31_spill] sm:$0xff] %v10495_v55 }
 0x350   : > { %v10497_v47 = vpop.f32.mrf.mxu1  ;;  %v5353_v29 = vpop.f32.mrf.mxu0 }
 0x351   : > { %11205 = vst [vmem:[#allocation25_spill] sm:$0xff] %v10497_v47 }
 0x352   : > { %v10499_v26 = vpop.f32.mrf.mxu1  ;;  %v7137_v25 = vpop.f32.mrf.mxu0 }
 0x353   : > { %11206 = vst [vmem:[#allocation26_spill] sm:$0xff] %v10499_v26 }
 0x354   : > { %v10501_v33 = vpop.f32.mrf.mxu0  ;;  %v7172_v17 = vpop.f32.mrf.mxu1 }
 0x356   : > { %v10503_v40 = vpop.f32.mrf.mxu0  ;;  %v5576_v36 = vpop.f32.mrf.mxu1 }
 0x358   : > { %v10505_v60 = vpop.f32.mrf.mxu0  ;;  %v7173_v41 = vpop.f32.mrf.mxu1 }
 0x35a   : > { %v10507_v1 = vpop.f32.mrf.mxu0  ;;  %v10509_v39 = vpop.f32.mrf.mxu1 }
 0x35c   : > { %v10511_v11 = vpop.f32.mrf.mxu0  ;;  %v10513_v47 = vpop.f32.mrf.mxu1 }
 0x35e   : > { %v10515_v55 = vpop.f32.mrf.mxu0  ;;  %v10517_v26 = vpop.f32.mrf.mxu1 }
 0x360   : > { %v10519_v48 = vpop.f32.mrf.mxu0  ;;  %v10523_v49 = vpop.f32.mrf.mxu1 }
 0x362   : > { %v10521_v53 = vpop.f32.mrf.mxu0  ;;  %v10529_v59 = vpop.f32.mrf.mxu1 }
 0x364   : > { %v10525_v63 = vpop.f32.mrf.mxu0  ;;  %v10535_v6 = vpop.f32.mrf.mxu1 }
 0x366   : > { %v10527_v19 = vpop.f32.mrf.mxu0  ;;  %v10541_v13 = vpop.f32.mrf.mxu1 }
 0x368   : > { %v10531_v22 = vpop.f32.mrf.mxu0  ;;  %v10547_v46 = vpop.f32.mrf.mxu1 }
 0x369   : > { %11207 = vst [vmem:[#allocation34_spill] sm:$0xff] %v10531_v22 }
 0x36a   : > { %v10533_v45 = vpop.f32.mrf.mxu0  ;;  %v10553_v57 = vpop.f32.mrf.mxu1 }
 0x36b   : > { %11208 = vst [vmem:[#allocation32_spill] sm:$0xff] %v10533_v45 }
 0x36c   : > { %v10537_v18 = vpop.f32.mrf.mxu0 }
 0x36d   : > { %11209 = vst [vmem:[#allocation13_spill] sm:$0xff] %v10537_v18  ;;  %v10559_v18 = vpop.f32.mrf.mxu1 }
 0x36e   : > { %v10539_v10 = vpop.f32.mrf.mxu0  ;;  %11217 = vst [vmem:[#allocation7_spill] sm:$0xff] %v10559_v18 }
 0x36f   : > { %11210 = vst [vmem:[#allocation23_spill] sm:$0xff] %v10539_v10 }
 0x370   : > { %v10543_v52 = vpop.f32.mrf.mxu0 }
 0x371   : > { %11211 = vst [vmem:[#allocation3_spill] sm:$0xff] %v10543_v52  ;;  %v10565_v52 = vpop.f32.mrf.mxu1 }
 0x372   : > { %v10545_v35 = vpop.f32.mrf.mxu0  ;;  %11220 = vst [vmem:[#allocation5_spill] sm:$0xff] %v10565_v52 }
 0x373   : > { %11212 = vst [vmem:[#allocation40_spill] sm:$0xff] %v10545_v35 }
 0x374   : > { %v10549_v42 = vpop.f32.mrf.mxu0 }
 0x375   : > { %11213 = vst [vmem:[#allocation4_spill] sm:$0xff] %v10549_v42 }
 0x376   : > { %v10551_v8 = vpop.f32.mrf.mxu0 }
 0x377   : > { %11214 = vst [vmem:[#allocation17_spill] sm:$0xff] %v10551_v8  ;;  %v10571_v8 = vpop.f32.mrf.mxu1 }
 0x378   : > { %v10555_v45 = vpop.f32.mrf.mxu0  ;;  %11223 = vst [vmem:[#allocation54_spill] sm:$0xff] %v10571_v8 }
 0x379   : > { %11215 = vst [vmem:[#allocation21_spill] sm:$0xff] %v10555_v45 }
 0x37a   : > { %v10557_v12 = vpop.f32.mrf.mxu0 }
 0x37b   : > { %11216 = vst [vmem:[#allocation46_spill] sm:$0xff] %v10557_v12  ;;  %v10577_v12 = vpop.f32.mrf.mxu1 }
 0x37c   : > { %v10561_v10 = vpop.f32.mrf.mxu0  ;;  %11226 = vst [vmem:[#allocation57_spill] sm:$0xff] %v10577_v12 }
 0x37d   : > { %11218 = vst [vmem:[#allocation35_spill] sm:$0xff] %v10561_v10 }
 0x37e   : > { %v10563_v22 = vpop.f32.mrf.mxu0 }
 0x37f   : > { %11219 = vst [vmem:[#allocation9_spill] sm:$0xff] %v10563_v22  ;;  %v5046_v22 = vadd.f32 %v10350_v58, %v10338_v54  ;;  %v10597_v54 = vld [vmem:[%s10836_s8] ss:$0 sm:$0xff] }
 0x380   : > { %v10567_v35 = vpop.f32.mrf.mxu0 }
 0x381   : > { %11221 = vst [vmem:[#allocation8_spill] sm:$0xff] %v10567_v35  ;;  %v5044_v35 = vadd.f32 %v10355_v2, %v10343_v0  ;;  %v5482_v52 = vadd.f32 %v7136_v38, %v5046_v22  ;;  %v5045_v0 = vadd.f32 %v10365_v43, %v10353_v50  ;;  %v5050_v38 = vadd.f32 %v10370_v30, %v10358_v28 }
 0x382   : > { %v10569_v42 = vpop.f32.mrf.mxu0  ;;  %v5048_v28 = vadd.f32 %v10375_v7, %v10363_v9 }
 0x383   : > { %11222 = vst [vmem:[#allocation10_spill] sm:$0xff] %v10569_v42  ;;  %v10587_v42 = vpop.f32.mrf.mxu1  ;;  %v5705_v12 = vadd.f32 %v7172_v17, %v5482_v52 }
 0x384   : > { %v10573_v34 = vpop.f32.mrf.mxu0  ;;  %v5484_v17 = vadd.f32 %v10505_v60, %v5048_v28  ;;  %v5054_v60 = vadd.f32 %v10390_v31, %v10378_v37 }
 0x385   : > { %11224 = vst [vmem:[#allocation55_spill] sm:$0xff] %v10573_v34  ;;  %v5480_v34 = vadd.f32 %v5353_v29, %v5044_v35 }
 0x386   : > { %v10575_v45 = vpop.f32.mrf.mxu0 }
 0x387   : > { %11225 = vst [vmem:[#allocation56_spill] sm:$0xff] %v10575_v45  ;;  %v5047_v45 = vadd.f32 %v10360_v61, %v10348_v3  ;;  %v5703_v2 = vadd.f32 %v5576_v36, %v5480_v34  ;;  %v5481_v61 = vadd.f32 %v10501_v33, %v5045_v0  ;;  %v5486_v34 = vadd.f32 %v10503_v40, %v5050_v38 }
 0x388   : > { %v10579_v18 = vpop.f32.mrf.mxu0 }
 0x389   : > { %11227 = vst [vmem:[#allocation58_spill] sm:$0xff] %v10579_v18  ;;  %v5483_v58 = vadd.f32 %v7137_v25, %v5047_v45  ;;  %v5704_v52 = vadd.f32 %v10509_v39, %v5481_v61  ;;  %v5051_v45 = vadd.f32 %v10380_v24, %v10368_v62  ;;  %v5709_v9 = vadd.f32 %v10513_v47, %v5486_v34 }
 0x38a   : > { %v10583_v10 = vpop.f32.mrf.mxu0  ;;  %v5049_v25 = vadd.f32 %v10385_v44, %v10373_v4  ;;  %v5707_v62 = vadd.f32 %v10517_v26, %v5484_v17 }
 0x38b   : > { %v5706_v50 = vadd.f32 %v7173_v41, %v5483_v58  ;;  %v5487_v36 = vadd.f32 %v10507_v1, %v5051_v45  ;;  %v5052_v1 = vadd.f32 %v10395_v16, %v10383_v56 }
 0x38c   : > { %v10589_v8 = vpop.f32.mrf.mxu0  ;;  %v5485_v58 = vadd.f32 %v10511_v11, %v5049_v25 }
 0x38d   : > { %11228 = vst [vmem:[#allocation59_spill] sm:$0xff] %v10589_v8  ;;  %v10603_v8 = vpop.f32.mrf.mxu1  ;;  %v5710_v4 = vadd.f32 %v10523_v49, %v5487_v36  ;;  %v5055_v49 = vadd.f32 %v10400_v21, %v10388_v20  ;;  %v5488_v61 = vadd.f32 %v10519_v48, %v5052_v1  ;;  %v5058_v48 = vadd.f32 %v10410_v15, %v10398_v23 }
 0x38e   : > { %v7208_v18 = vpop.f32.mrf.mxu0  ;;  %v5708_v37 = vadd.f32 %v10529_v59, %v5485_v58 }
 0x38f   : > { %v5928_v22 = vadd.f32 %v7208_v18, %v5705_v12  ;;  %v10621_v33 = vpop.f32.mrf.mxu1  ;;  %v5711_v20 = vadd.f32 %v10541_v13, %v5488_v61 }
 0x390   : > { %v5799_v3 = vpop.f32.mrf.mxu0 }
 0x391   : > { %v5967_v43 = vadd.f32 %v10597_v54, %v5928_v22  ;;  %v5926_v12 = vadd.f32 %v5799_v3, %v5703_v2  ;;  %v10637_v39 = vpop.f32.mrf.mxu1  ;;  %v5490_v22 = vadd.f32 %v10515_v55, %v5054_v60  ;;  %v5053_v55 = vadd.f32 %v10405_v32, %v10393_v14  ;;  %v11236_v60 = vld [vmem:[#allocation6_spill] sm:$0xff] }
 0x392   : > { %v7209_v30 = vpop.f32.mrf.mxu0 }
 0x393   : > { %6000 = vst.msk [vmem:[%s10608_s10 + $0x10] sm:$0xff] %vm5997_vm2, %v5967_v43  ;;  %v5965_v35 = vadd.f32 %v10597_v54, %v5926_v12  ;;  %v5929_v18 = vadd.f32 %v7209_v30, %v5706_v50  ;;  %v10653_v38 = vpop.f32.mrf.mxu1  ;;  %v5713_v56 = vadd.f32 %v10535_v6, %v5490_v22  ;;  %v5491_v43 = vadd.f32 %v10521_v53, %v5055_v49  ;;  %v11241_v49 = vld [vmem:[#allocation45_spill] sm:$0xff] }
 0x394   : > { %v5802_v29 = vpop.f32.mrf.mxu0  ;;  %v5489_v30 = vadd.f32 %v10525_v63, %v5053_v55  ;;  %v5056_v53 = vadd.f32 %v10415_v5, %v10403_v27  ;;  %v11229_v63 = vld [vmem:[#allocation51_spill] sm:$0xff] }
 0x395   : > { %5998 = vst.msk [vmem:[%s10608_s10] sm:$0xff] %vm5997_vm2, %v5965_v35  ;;  %v5968_v7 = vadd.f32 %v10597_v54, %v5929_v18  ;;  %v5927_v41 = vadd.f32 %v5802_v29, %v5704_v52  ;;  %v10669_v12 = vpop.f32.mrf.mxu1  ;;  %v5714_v14 = vadd.f32 %v10547_v46, %v5491_v43  ;;  %v5494_v52 = vadd.f32 %v10527_v19, %v5058_v48  ;;  %v11230_v29 = vld [vmem:[#allocation34_spill] sm:$0xff]  ;;  %v11231_v27 = vld [vmem:[#allocation7_spill] sm:$0xff] }
 0x396   : > { %v7212_v40 = vpop.f32.mrf.mxu0  ;;  %v5712_v23 = vadd.f32 %v10553_v57, %v5489_v30  ;;  %v5059_v35 = vadd.f32 %v11229_v63, %v10408_v51  ;;  %v5492_v17 = vadd.f32 %v11230_v29, %v5056_v53  ;;  %v11235_v51 = vld [vmem:[#allocation5_spill] sm:$0xff]  ;;  %v11246_v30 = vld [vmem:[#allocation3_spill] sm:$0xff]  ;;  %v11250_v29 = vld [vmem:[#allocation52_spill] sm:$0xff] }
 0x397   : > { %6001 = vst.msk [vmem:[%s10608_s10 + $0x18] sm:$0xff] %vm5997_vm2, %v5968_v7  ;;  %v5966_v24 = vadd.f32 %v10597_v54, %v5927_v41  ;;  %v5932_v47 = vadd.f32 %v7212_v40, %v5709_v9  ;;  %v10685_v18 = vpop.f32.mrf.mxu1  ;;  %v5717_v5 = vadd.f32 %v11231_v27, %v5494_v52  ;;  %v11232_v9 = vld [vmem:[#allocation43_spill] sm:$0xff]  ;;  %v11233_v7 = vld [vmem:[#allocation48_spill] sm:$0xff]  ;;  %v11248_v52 = vld [vmem:[#allocation53_spill] sm:$0xff] }
 0x398   : > { %v5815_v0 = vpop.f32.mrf.mxu0  ;;  %v5057_v41 = vadd.f32 %v11233_v7, %v11232_v9  ;;  %v11234_v40 = vld [vmem:[#allocation32_spill] sm:$0xff] }
 0x399   : > { %5999 = vst.msk [vmem:[%s10608_s10 + $0x8] sm:$0xff] %vm5997_vm2, %v5966_v24  ;;  %v5971_v44 = vadd.f32 %v10597_v54, %v5932_v47  ;;  %v5930_v26 = vadd.f32 %v5815_v0, %v5707_v62  ;;  %v5495_v36 = vadd.f32 %v11234_v40, %v5059_v35  ;;  %v5715_v62 = vadd.f32 %v11235_v51, %v5492_v17  ;;  %v11237_v0 = vld [vmem:[#allocation44_spill] sm:$0xff] }
 0x39a   : > { %v7213_v2 = vpop.f32.mrf.mxu0  ;;  %v5062_v58 = vadd.f32 %v11237_v0, %v11236_v60  ;;  %v11251_v17 = vld [vmem:[#allocation12_spill] sm:$0xff]  ;;  %v11256_v0 = vld [vmem:[#allocation38_spill] sm:$0xff] }
 0x39b   : > { %6004 = vst.msk [vmem:[%s10608_s10 + $0x30] sm:$0xff] %vm5997_vm2, %v5971_v44  ;;  %v5969_v31 = vadd.f32 %v10597_v54, %v5930_v26  ;;  %v5933_v11 = vadd.f32 %v7213_v2, %v5710_v4  ;;  %v10701_v4 = vpop.f32.mrf.mxu1  ;;  %v11238_v26 = vld [vmem:[#allocation13_spill] sm:$0xff]  ;;  %v11239_v2 = vld [vmem:[#allocation54_spill] sm:$0xff]  ;;  %v5066_v27 = vadd.f32 %v11251_v17, %v11250_v29  ;;  %v11254_v40 = vld [vmem:[#allocation20_spill] sm:$0xff] }
 0x39c   : > { %v5818_v3 = vpop.f32.mrf.mxu0  ;;  %v5493_v1 = vadd.f32 %v11238_v26, %v5057_v41  ;;  %v5718_v22 = vadd.f32 %v11239_v2, %v5495_v36  ;;  %v11258_v2 = vld [vmem:[#allocation21_spill] sm:$0xff] }
 0x39d   : > { %6002 = vst.msk [vmem:[%s10608_s10 + $0x20] sm:$0xff] %vm5997_vm2, %v5969_v31  ;;  %v5972_v16 = vadd.f32 %v10597_v54, %v5933_v11  ;;  %v5931_v59 = vadd.f32 %v5818_v3, %v5708_v37  ;;  %v11240_v11 = vld [vmem:[#allocation11_spill] sm:$0xff]  ;;  %v10717_v48 = vpop.f32.mrf.mxu1 }
 0x39e   : > { %v7216_v50 = vpop.f32.mrf.mxu0  ;;  %v5060_v3 = vadd.f32 %v11241_v49, %v11240_v11  ;;  %v11259_v11 = vld [vmem:[#allocation30_spill] sm:$0xff] }
 0x39f   : > { %6005 = vst.msk [vmem:[%s10608_s10 + $0x38] sm:$0xff] %vm5997_vm2, %v5972_v16  ;;  %v5970_v21 = vadd.f32 %v10597_v54, %v5931_v59  ;;  %v5936_v6 = vadd.f32 %v7216_v50, %v5713_v56  ;;  %v11242_v56 = vld [vmem:[#allocation23_spill] sm:$0xff]  ;;  %v11243_v59 = vld [vmem:[#allocation57_spill] sm:$0xff]  ;;  %v11260_v49 = vld [vmem:[#allocation22_spill] sm:$0xff] }
 0x3a0   : > { %v5831_v28 = vpop.f32.mrf.mxu0  ;;  %v5498_v16 = vadd.f32 %v11242_v56, %v5062_v58  ;;  %v5716_v55 = vadd.f32 %v11243_v59, %v5493_v1  ;;  %v11257_v58 = vld [vmem:[#allocation28_spill] sm:$0xff]  ;;  %v11261_v56 = vld [vmem:[#allocation46_spill] sm:$0xff] }
 0x3a1   : > { %6003 = vst.msk [vmem:[%s10608_s10 + $0x28] sm:$0xff] %vm5997_vm2, %v5970_v21  ;;  %v5975_v32 = vadd.f32 %v10597_v54, %v5936_v6  ;;  %v5934_v13 = vadd.f32 %v5831_v28, %v5711_v20  ;;  %v11244_v20 = vld [vmem:[#allocation18_spill] sm:$0xff] }
 0x3a2   : > { %v7217_v34 = vpop.f32.mrf.mxu0  ;;  %v11245_v21 = vld [vmem:[#allocation50_spill] sm:$0xff] }
 0x3a3   : > { %6008 = vst.msk [vmem:[%s10608_s10 + $0x50] sm:$0xff] %vm5997_vm2, %v5975_v32  ;;  %v5973_v15 = vadd.f32 %v10597_v54, %v5934_v13  ;;  %v5937_v46 = vadd.f32 %v7217_v34, %v5714_v14  ;;  %v5063_v6 = vadd.f32 %v11245_v21, %v11244_v20  ;;  %v5496_v14 = vadd.f32 %v11246_v30, %v5060_v3  ;;  %v11247_v34 = vld [vmem:[#allocation47_spill] sm:$0xff] }
 0x3a4   : > { %v5834_v45 = vpop.f32.mrf.mxu0  ;;  %v5721_v32 = vadd.f32 %v10587_v42, %v5498_v16  ;;  %v5065_v3 = vadd.f32 %v11260_v49, %v11259_v11  ;;  %v11279_v11 = vld [vmem:[#allocation56_spill] sm:$0xff] }
 0x3a5   : > { %6006 = vst.msk [vmem:[%s10608_s10 + $0x40] sm:$0xff] %vm5997_vm2, %v5973_v15  ;;  %v5976_v57 = vadd.f32 %v10597_v54, %v5937_v46  ;;  %v5935_v19 = vadd.f32 %v5834_v45, %v5712_v23  ;;  %v5061_v23 = vadd.f32 %v11248_v52, %v11247_v34  ;;  %v11249_v46 = vld [vmem:[#allocation40_spill] sm:$0xff]  ;;  %v5719_v35 = vadd.f32 %v10603_v8, %v5496_v14 }
 0x3a6   : > { %v7220_v25 = vpop.f32.mrf.mxu0  ;;  %v5499_v63 = vadd.f32 %v11249_v46, %v5063_v6 }
 0x3a7   : > { %6009 = vst.msk [vmem:[%s10608_s10 + $0x58] sm:$0xff] %vm5997_vm2, %v5976_v57  ;;  %v5974_v24 = vadd.f32 %v10597_v54, %v5935_v19  ;;  %v5940_v47 = vadd.f32 %v7220_v25, %v5717_v5  ;;  %v5672_v5 = vpop.f32.mrf.mxu1  ;;  %v11252_v19 = vld [vmem:[#allocation4_spill] sm:$0xff]  ;;  %v11253_v25 = vld [vmem:[#allocation49_spill] sm:$0xff] }
 0x3a8   : > { %v5847_v44 = vpop.f32.mrf.mxu0  ;;  %v5497_v9 = vadd.f32 %v11252_v19, %v5061_v23  ;;  %v5722_v7 = vadd.f32 %v10621_v33, %v5499_v63  ;;  %v5064_v36 = vadd.f32 %v11254_v40, %v11253_v25  ;;  %v11267_v23 = vld [vmem:[#allocation9_spill] sm:$0xff]  ;;  %v11273_v40 = vld [vmem:[#allocation10_spill] sm:$0xff] }
 0x3a9   : > { %6007 = vst.msk [vmem:[%s10608_s10 + $0x48] sm:$0xff] %vm5997_vm2, %v5974_v24  ;;  %v5979_v37 = vadd.f32 %v10597_v54, %v5940_v47  ;;  %v5938_v31 = vadd.f32 %v5847_v44, %v5715_v62  ;;  %v11255_v62 = vld [vmem:[#allocation17_spill] sm:$0xff]  ;;  %v5067_v44 = vadd.f32 %v11257_v58, %v11256_v0  ;;  %v7197_v26 = vpop.f32.mrf.mxu1  ;;  %v11276_v58 = vld [vmem:[#allocation55_spill] sm:$0xff] }
 0x3aa   : > { %v7221_v61 = vpop.f32.mrf.mxu0  ;;  %v5502_v24 = vadd.f32 %v11255_v62, %v5066_v27  ;;  %v5720_v47 = vadd.f32 %v10637_v39, %v5497_v9  ;;  %v11270_v27 = vld [vmem:[#allocation8_spill] sm:$0xff] }
 0x3ab   : > { %6012 = vst.msk [vmem:[%s10608_s10 + $0x70] sm:$0xff] %vm5997_vm2, %v5979_v37  ;;  %v5977_v50 = vadd.f32 %v10597_v54, %v5938_v31  ;;  %v5941_v43 = vadd.f32 %v7221_v61, %v5718_v22  ;;  %v5500_v22 = vadd.f32 %v11258_v2, %v5064_v36  ;;  %v5503_v16 = vadd.f32 %v11261_v56, %v5067_v44  ;;  %v5675_v21 = vpop.f32.mrf.mxu1 }
 0x3ac   : > { %v5850_v28 = vpop.f32.mrf.mxu0  ;;  %v5725_v37 = vadd.f32 %v10653_v38, %v5502_v24 }
 0x3ad   : > { %6010 = vst.msk [vmem:[%s10608_s10 + $0x60] sm:$0xff] %vm5997_vm2, %v5977_v50  ;;  %v5980_v13 = vadd.f32 %v10597_v54, %v5941_v43  ;;  %v5939_v53 = vadd.f32 %v5850_v28, %v5716_v55  ;;  %v5723_v59 = vadd.f32 %v10669_v12, %v5500_v22  ;;  %v11262_v50 = vld [vmem:[#allocation14_spill] sm:$0xff]  ;;  %v11263_v43 = vld [vmem:[#allocation37_spill] sm:$0xff]  ;;  %v11264_v28 = vld [vmem:[#allocation35_spill] sm:$0xff]  ;;  %v5726_v14 = vadd.f32 %v10685_v18, %v5503_v16  ;;  %v7200_v29 = vpop.f32.mrf.mxu1 }
 0x3ae   : > { %v7224_v15 = vpop.f32.mrf.mxu0  ;;  %v5070_v20 = vadd.f32 %v11263_v43, %v11262_v50  ;;  %v5501_v30 = vadd.f32 %v11264_v28, %v5065_v3  ;;  %v11277_v22 = vld [vmem:[#allocation42_spill] sm:$0xff]  ;;  %v11281_v16 = vld [vmem:[#allocation25_spill] sm:$0xff] }
 0x3af   : > { %6013 = vst.msk [vmem:[%s10608_s10 + $0x78] sm:$0xff] %vm5997_vm2, %v5980_v13  ;;  %v5978_v45 = vadd.f32 %v10597_v54, %v5939_v53  ;;  %v5944_v42 = vadd.f32 %v7224_v15, %v5721_v32  ;;  %v11265_v13 = vld [vmem:[#allocation33_spill] sm:$0xff]  ;;  %v11266_v53 = vld [vmem:[#allocation36_spill] sm:$0xff]  ;;  %v11282_v50 = vld [vmem:[#allocation58_spill] sm:$0xff] }
 0x3b0   : > { %v5863_v57 = vpop.f32.mrf.mxu0  ;;  %v5068_v34 = vadd.f32 %v11266_v53, %v11265_v13  ;;  %v5506_v15 = vadd.f32 %v11267_v23, %v5070_v20  ;;  %v5724_v46 = vadd.f32 %v10701_v4, %v5501_v30  ;;  %v11283_v28 = vld [vmem:[#allocation29_spill] sm:$0xff]  ;;  %v11284_v30 = vld [vmem:[#allocation26_spill] sm:$0xff] }
 0x3b1   : > { %6011 = vst.msk [vmem:[%s10608_s10 + $0x68] sm:$0xff] %vm5997_vm2, %v5978_v45  ;;  %v5983_v8 = vadd.f32 %v10597_v54, %v5944_v42  ;;  %v5942_v41 = vadd.f32 %v5863_v57, %v5719_v35  ;;  %v11268_v35 = vld [vmem:[#allocation24_spill] sm:$0xff]  ;;  %v11269_v45 = vld [vmem:[#allocation27_spill] sm:$0xff] }
 0x3b2   : > { %v7225_v51 = vpop.f32.mrf.mxu0  ;;  %v5071_v42 = vadd.f32 %v11269_v45, %v11268_v35  ;;  %v5504_v57 = vadd.f32 %v11270_v27, %v5068_v34  ;;  %v5729_v19 = vadd.f32 %v10717_v48, %v5506_v15  ;;  %v11274_v48 = vld [vmem:[#allocation16_spill] sm:$0xff]  ;;  %v11285_v15 = vld [vmem:[#allocation59_spill] sm:$0xff] }
 0x3b3   : > { %6016 = vst.msk [vmem:[%s10608_s10 + $0x90] sm:$0xff] %vm5997_vm2, %v5983_v8  ;;  %v5981_v60 = vadd.f32 %v10597_v54, %v5942_v41  ;;  %v5945_v33 = vadd.f32 %v7225_v51, %v5722_v7  ;;  %v11271_v7 = vld [vmem:[#allocation39_spill] sm:$0xff] }
 0x3b4   : > { %v5866_v1 = vpop.f32.mrf.mxu0  ;;  %v11272_v8 = vld [vmem:[#allocation15_spill] sm:$0xff]  ;;  %v5507_v36 = vadd.f32 %v11273_v40, %v5071_v42  ;;  %v5727_v51 = vadd.f32 %v5672_v5, %v5504_v57 }
 0x3b5   : > { %6014 = vst.msk [vmem:[%s10608_s10 + $0x80] sm:$0xff] %vm5997_vm2, %v5981_v60  ;;  %v5984_v39 = vadd.f32 %v10597_v54, %v5945_v33  ;;  %v5943_v31 = vadd.f32 %v5866_v1, %v5720_v47  ;;  %v5069_v41 = vadd.f32 %v11272_v8, %v11271_v7  ;;  %v11275_v47 = vld [vmem:[#allocation41_spill] sm:$0xff]  ;;  %v5688_v33 = vpop.f32.mrf.mxu1 }
 0x3b6   : > { %v7228_v61 = vpop.f32.mrf.mxu0  ;;  %v5074_v60 = vadd.f32 %v11275_v47, %v11274_v48  ;;  %v5730_v1 = vadd.f32 %v7197_v26, %v5507_v36  ;;  %v11280_v26 = vld [vmem:[#allocation19_spill] sm:$0xff] }
 0x3b7   : > { %6017 = vst.msk [vmem:[%s10608_s10 + $0x98] sm:$0xff] %vm5997_vm2, %v5984_v39  ;;  %v5982_v55 = vadd.f32 %v10597_v54, %v5943_v31  ;;  %v5948_v38 = vadd.f32 %v7228_v61, %v5725_v37  ;;  %v5505_v44 = vadd.f32 %v11276_v58, %v5069_v41  ;;  %v11278_v37 = vld [vmem:[#allocation31_spill] sm:$0xff] }
 0x3b8   : > { %v5879_v6 = vpop.f32.mrf.mxu0  ;;  %v5072_v39 = vadd.f32 %v11278_v37, %v11277_v22  ;;  %v5510_v49 = vadd.f32 %v11279_v11, %v5074_v60 }
 0x3b9   : > { %6015 = vst.msk [vmem:[%s10608_s10 + $0x88] sm:$0xff] %vm5997_vm2, %v5982_v55  ;;  %v5987_v12 = vadd.f32 %v10597_v54, %v5948_v38  ;;  %v5946_v32 = vadd.f32 %v5879_v6, %v5723_v59  ;;  %v5728_v3 = vadd.f32 %v5675_v21, %v5505_v44  ;;  %v5075_v59 = vadd.f32 %v11281_v16, %v11280_v26  ;;  %v7201_v55 = vpop.f32.mrf.mxu1 }
 0x3ba   : > { %v7229_v52 = vpop.f32.mrf.mxu0  ;;  %v5508_v43 = vadd.f32 %v11282_v50, %v5072_v39  ;;  %v5733_v20 = vadd.f32 %v7200_v29, %v5510_v49 }
 0x3bb   : > { %6020 = vst.msk [vmem:[%s10608_s10 + $0xb0] sm:$0xff] %vm5997_vm2, %v5987_v12  ;;  %v5985_v63 = vadd.f32 %v10597_v54, %v5946_v32  ;;  %v5949_v18 = vadd.f32 %v7229_v52, %v5726_v14  ;;  %v5073_v14 = vadd.f32 %v11284_v30, %v11283_v28  ;;  %v5511_v32 = vadd.f32 %v10583_v10, %v5075_v59  ;;  %v5691_v52 = vpop.f32.mrf.mxu1 }
 0x3bc   : > { %v5882_v17 = vpop.f32.mrf.mxu0  ;;  %v5731_v13 = vadd.f32 %v5688_v33, %v5508_v43 }
 0x3bd   : > { %6018 = vst.msk [vmem:[%s10608_s10 + $0xa0] sm:$0xff] %vm5997_vm2, %v5985_v63  ;;  %v5988_v4 = vadd.f32 %v10597_v54, %v5949_v18  ;;  %v5947_v9 = vadd.f32 %v5882_v17, %v5724_v46  ;;  %v5509_v46 = vadd.f32 %v11285_v15, %v5073_v14  ;;  %v5734_v63 = vadd.f32 %v7201_v55, %v5511_v32 }
 0x3be   : > { %v7232_v25 = vpop.f32.mrf.mxu0 }
 0x3bf   : > { %6021 = vst.msk [vmem:[%s10608_s10 + $0xb8] sm:$0xff] %vm5997_vm2, %v5988_v4  ;;  %v5986_v62 = vadd.f32 %v10597_v54, %v5947_v9  ;;  %v5952_v24 = vadd.f32 %v7232_v25, %v5729_v19  ;;  %v5732_v45 = vadd.f32 %v5691_v52, %v5509_v46 }
 0x3c0   : > { %v5895_v0 = vpop.f32.mrf.mxu0 }
 0x3c1   : > { %6019 = vst.msk [vmem:[%s10608_s10 + $0xa8] sm:$0xff] %vm5997_vm2, %v5986_v62  ;;  %v5991_v2 = vadd.f32 %v10597_v54, %v5952_v24  ;;  %v5950_v5 = vadd.f32 %v5895_v0, %v5727_v51 }
 0x3c2   : > { %v7233_v31 = vpop.f32.mrf.mxu0 }
 0x3c3   : > { %6024 = vst.msk [vmem:[%s10608_s10 + $0xd0] sm:$0xff] %vm5997_vm2, %v5991_v2  ;;  %v5989_v61 = vadd.f32 %v10597_v54, %v5950_v5  ;;  %v5953_v56 = vadd.f32 %v7233_v31, %v5730_v1 }
 0x3c4   : > { %v5898_v38 = vpop.f32.mrf.mxu0 }
 0x3c5   : > { %6022 = vst.msk [vmem:[%s10608_s10 + $0xc0] sm:$0xff] %vm5997_vm2, %v5989_v61  ;;  %v5992_v6 = vadd.f32 %v10597_v54, %v5953_v56  ;;  %v5951_v21 = vadd.f32 %v5898_v38, %v5728_v3 }
 0x3c6   : > { %v7236_v12 = vpop.f32.mrf.mxu0 }
 0x3c7   : > { %6025 = vst.msk [vmem:[%s10608_s10 + $0xd8] sm:$0xff] %vm5997_vm2, %v5992_v6  ;;  %v5990_v53 = vadd.f32 %v10597_v54, %v5951_v21  ;;  %v5956_v34 = vadd.f32 %v7236_v12, %v5733_v20 }
 0x3c8   : > { %v5911_v23 = vpop.f32.mrf.mxu0 }
 0x3c9   : > { %6023 = vst.msk [vmem:[%s10608_s10 + $0xc8] sm:$0xff] %vm5997_vm2, %v5990_v53  ;;  %v5995_v18 = vadd.f32 %v10597_v54, %v5956_v34  ;;  %v5954_v35 = vadd.f32 %v5911_v23, %v5731_v13 }
 0x3ca   : > { %v7237_v10 = vpop.f32.mrf.mxu0 }
 0x3cb   : > { %6028 = vst.msk [vmem:[%s10608_s10 + $0xf0] sm:$0xff] %vm5997_vm2, %v5995_v18  ;;  %v5993_v42 = vadd.f32 %v10597_v54, %v5954_v35  ;;  %v5957_v29 = vadd.f32 %v7237_v10, %v5734_v63 }
 0x3cc   : > { %v5914_v17 = vpop.f32.mrf.mxu0 }
 0x3cd   : > { %6026 = vst.msk [vmem:[%s10608_s10 + $0xe0] sm:$0xff] %vm5997_vm2, %v5993_v42  ;;  %v5996_v27 = vadd.f32 %v10597_v54, %v5957_v29  ;;  %v5955_v57 = vadd.f32 %v5914_v17, %v5732_v45 }
 0x3cf   : > { %6029 = vst.msk [vmem:[%s10608_s10 + $0xf8] sm:$0xff] %vm5997_vm2, %v5996_v27  ;;  %v5994_v19 = vadd.f32 %v10597_v54, %v5955_v57 }
 0x3d1   : > { %6027 = vst.msk [vmem:[%s10608_s10 + $0xe8] sm:$0xff] %vm5997_vm2, %v5994_v19 }
 0x3d2 PF: > { %s19_s30 = sadd.s32 1, %s7334_s30  }
 0x3d3   : > { %p16_p4 = scmp.ge.s32.totalorder %s19_s30, 4  }
 0x3d5   :  { %18 = sbr.rel (!%p16_p4) target bundleno = 1 (0x1), region = 105 }

</bundles_post_ra>
